<compile_context>
chip_gen: v7x
topology: tpu7x:2x2x1
jax: 0.10.0
libtpu: 0.0.40
codegen_flags: <defaults>
</compile_context>

<pallas_src>
import functools

import numpy as np
import jax
import jax.numpy as jnp
from jax import lax
from jax.experimental import pallas as pl
from jax.experimental.pallas import tpu as pltpu

# ---------------------------------------------------------------------------
# "config" values (stand-in for the configparser reads in the original code)
# ---------------------------------------------------------------------------
VOCAB_SIZE = 50                    # Encoder.vocab_size == dec_vocab_size
EMB_SIZE = 16
ENC_HIDDEN = 16                    # enc_hidden_size
DEC_HIDDEN = 2 * ENC_HIDDEN        # dec_hidden_size (decoder h0 = bi-enc concat)
VOCAB_PAD = 128                    # output vocab padded -> lane-dense logit store
ONEHOT_PAD = 64                    # one-hot width for the in-kernel embedding matmul
NEG_BIG = -1e9


# ---------------------------------------------------------------------------
# Fused kernel: embed + bi-GRU encoder + GRU decoder + attention + head + NLL
# ---------------------------------------------------------------------------
def _seq2seq_kernel(B, L, T,
                    src_ref, tgt_ref,
                    enc_tab_ref, bihe_ref, whhe_ref, bhhe_ref,
                    dec_tab_ref, bihd_ref, whhd_ref, bhhd_ref,
                    gsel_ref, abias_ref,
                    wa_ref, w1_ref, w2_ref, b2_ref, w3_ref, b3_ref,
                    out_ref,
                    enc_s, dec_s):
    f32 = jnp.float32
    bf16 = jnp.bfloat16
    He = ENC_HIDDEN
    H2 = 2 * He                    # fused encoder state width (= DEC_HIDDEN)
    Hd = DEC_HIDDEN

    def onehot(ids_ref, rows):
        ids = ids_ref[...]                                             # (rows, 1) i32
        cols = lax.broadcasted_iota(jnp.int32, (rows, ONEHOT_PAD), 1)
        return jnp.where(ids == cols, 1.0, 0.0).astype(bf16)           # (rows, 64)

    # --- embedding as one-hot MXU matmul, folded with the GRU input proj ---
    proj_e = (jnp.dot(onehot(src_ref, L * B), enc_tab_ref[...],
                      preferred_element_type=f32) + bihe_ref[...])     # (L*B, 6He)
    proj_d = (jnp.dot(onehot(tgt_ref, T * B), dec_tab_ref[...],
                      preferred_element_type=f32) + bihd_ref[...])     # (T*B, 3Hd)

    # Fused fwd/bwd encoder step l needs fwd gate columns from time l and bwd
    # gate columns from time L-1-l: select between proj_e and its time-reversal.
    proj_e_rev = jnp.concatenate(
        [proj_e[(L - 1 - l) * B:(L - l) * B, :] for l in range(L)], axis=0)
    gsel = gsel_ref[...]                                               # (1, 6He), 1=fwd col
    xp_enc = gsel * proj_e + (1.0 - gsel) * proj_e_rev                 # (L*B, 6He)

    whhe = whhe_ref[...]; bhhe = bhhe_ref[...]
    whhd = whhd_ref[...]; bhhd = bhhd_ref[...]

    # --- encoder: fwd+bwd GRUs fused into ONE recurrence over [h_fwd | h_bwd] ---
    h2 = jnp.zeros((B, H2), f32)
    for l in range(L):
        xp = xp_enc[l * B:(l + 1) * B, :]
        hp = jnp.dot(h2.astype(bf16), whhe, preferred_element_type=f32) + bhhe
        r = jax.nn.sigmoid(xp[:, 0:H2] + hp[:, 0:H2])
        z = jax.nn.sigmoid(xp[:, H2:2 * H2] + hp[:, H2:2 * H2])
        n = jnp.tanh(xp[:, 2 * H2:3 * H2] + r * hp[:, 2 * H2:3 * H2])
        h2 = (1.0 - z) * n + z * h2
        enc_s[l * B:(l + 1) * B, :] = h2            # one slab store per step

    # Row-block l of enc_s holds [fwd(l) | bwd(L-1-l)]; put bwd back in time order.
    enc_raw = enc_s[...]
    enc_rev = jnp.concatenate(
        [enc_raw[(L - 1 - l) * B:(L - l) * B, :] for l in range(L)], axis=0)
    lane = lax.broadcasted_iota(jnp.int32, (L * B, H2), 1)
    enc_all = jnp.where(lane < He, enc_raw, enc_rev)                   # (L*B, 2He)

    # --- decoder GRU; h0 = [fwd final | bwd final] = h2 after the fused loop ---
    h = h2
    for t in range(T):
        xp = proj_d[t * B:(t + 1) * B, :]
        hp = jnp.dot(h.astype(bf16), whhd, preferred_element_type=f32) + bhhd
        r = jax.nn.sigmoid(xp[:, 0:Hd] + hp[:, 0:Hd])
        z = jax.nn.sigmoid(xp[:, Hd:2 * Hd] + hp[:, Hd:2 * Hd])
        n = jnp.tanh(xp[:, 2 * Hd:3 * Hd] + r * hp[:, 2 * Hd:3 * Hd])
        h = (1.0 - z) * n + z * h
        dec_s[t * B:(t + 1) * B, :] = h             # one slab store per step

    dec_all = dec_s[...]                                               # (T*B, Hd)

    # --- attention, batched over B with an additive block-diagonal mask ---
    enc_bf = enc_all.astype(bf16)
    dec_bf = dec_all.astype(bf16)
    eproj = jnp.dot(enc_bf, wa_ref[...], preferred_element_type=f32)   # (L*B, Hd)
    scores = lax.dot_general(dec_bf, eproj.astype(bf16),
                             (((1,), (1,)), ((), ())),
                             preferred_element_type=f32)               # (T*B, L*B)
    scores = scores + abias_ref[...]                # cross-batch entries -> -1e9
    scores = scores - jnp.max(scores, axis=-1, keepdims=True)
    p = jnp.exp(scores)
    A = p / jnp.sum(p, axis=-1, keepdims=True)      # exact normalization
    C = jnp.dot(A.astype(bf16), enc_bf, preferred_element_type=f32)    # (T*B, 2He)

    # --- output head + (-log_softmax) over all B*T rows at once ---
    x = (jnp.dot(C.astype(bf16), w1_ref[...], preferred_element_type=f32)
         + jnp.dot(dec_bf, w2_ref[...], preferred_element_type=f32) + b2_ref[...])
    P = jnp.dot(x.astype(bf16), w3_ref[...], preferred_element_type=f32) + b3_ref[...]
    m = jnp.max(P, axis=-1, keepdims=True)
    sh = P - m
    lse = jnp.log(jnp.sum(jnp.exp(sh), axis=-1, keepdims=True))
    out_ref[...] = -(sh - lse)                      # (T*B, 128) lane-dense slab store


def _full_spec(shape):
    n = len(shape)
    return pl.BlockSpec(shape, lambda i, _n=n: (0,) * _n)


@jax.jit
def seq2seq_forward(prep, source, target):
    B, L = source.shape
    _, T = target.shape

    # ids flattened time-major (row = l*B + b); tiny int32 ops.
    src_ids = source.T.reshape(L * B, 1).astype(jnp.int32)
    tgt_ids = target.T.reshape(T * B, 1).astype(jnp.int32)

    # Additive attention mask: 0 where decoder row (t*B+b) and encoder column
    # (l*B+b') belong to the same batch element, NEG_BIG otherwise (constant).
    same = (np.arange(T * B)[:, None] % B) == (np.arange(L * B)[None, :] % B)
    attn_bias = jnp.asarray(np.where(same, 0.0, NEG_BIG), dtype=jnp.float32)

    ins = (src_ids, tgt_ids,
           prep["enc_tab"], prep["b_ih_enc"], prep["whh_enc"], prep["b_hh_enc"],
           prep["dec_tab"], prep["b_ih_dec"], prep["whh_dec"], prep["b_hh_dec"],
           prep["gate_sel"], attn_bias,
           prep["wa_t"], prep["w1_t"], prep["w2_t"], prep["b2"],
           prep["w3_t_pad"], prep["b3_pad"])

    nll_tm = pl.pallas_call(
        functools.partial(_seq2seq_kernel, B, L, T),
        out_shape=jax.ShapeDtypeStruct((T * B, VOCAB_PAD), jnp.float32),
        grid=(1,),
        in_specs=[_full_spec(x.shape) for x in ins],
        out_specs=pl.BlockSpec((T * B, VOCAB_PAD), lambda i: (0, 0)),
        scratch_shapes=[
            pltpu.VMEM((L * B, 2 * ENC_HIDDEN), jnp.float32),   # merged fwd|bwd enc states
            pltpu.VMEM((T * B, DEC_HIDDEN), jnp.float32),       # dec states
        ],
        compiler_params=pltpu.CompilerParams(dimension_semantics=("arbitrary",)),
    )(*ins)

    # time-major (T*B, Vp) -> (B, T, VOCAB_SIZE)
    return nll_tm.reshape(T, B, VOCAB_PAD).transpose(1, 0, 2)[:, :, :VOCAB_SIZE]


# ---------------------------------------------------------------------------
# Parameters: init in PyTorch layout, then prepare once into kernel layout.
# ---------------------------------------------------------------------------
def init_params(key):
    ks = jax.random.split(key, 20)

    def rn(k, shape, scale=0.1):
        return (scale * jax.random.normal(k, shape)).astype(jnp.float32)

    p = {}
    p["emb_enc"] = rn(ks[0], (VOCAB_SIZE, EMB_SIZE))
    p["emb_dec"] = rn(ks[1], (VOCAB_SIZE, EMB_SIZE))
    # encoder bidirectional GRU
    p["enc_f_w_ih"] = rn(ks[2], (3 * ENC_HIDDEN, EMB_SIZE))
    p["enc_f_w_hh"] = rn(ks[3], (3 * ENC_HIDDEN, ENC_HIDDEN))
    p["enc_f_b_ih"] = rn(ks[4], (3 * ENC_HIDDEN,))
    p["enc_f_b_hh"] = rn(ks[5], (3 * ENC_HIDDEN,))
    p["enc_b_w_ih"] = rn(ks[6], (3 * ENC_HIDDEN, EMB_SIZE))
    p["enc_b_w_hh"] = rn(ks[7], (3 * ENC_HIDDEN, ENC_HIDDEN))
    p["enc_b_b_ih"] = rn(ks[8], (3 * ENC_HIDDEN,))
    p["enc_b_b_hh"] = rn(ks[9], (3 * ENC_HIDDEN,))
    # decoder GRU
    p["dec_w_ih"] = rn(ks[10], (3 * DEC_HIDDEN, EMB_SIZE))
    p["dec_w_hh"] = rn(ks[11], (3 * DEC_HIDDEN, DEC_HIDDEN))
    p["dec_b_ih"] = rn(ks[12], (3 * DEC_HIDDEN,))
    p["dec_b_hh"] = rn(ks[13], (3 * DEC_HIDDEN,))
    # attention linear (bias=False) and Seq2Seq output head
    p["wa"] = rn(ks[14], (DEC_HIDDEN, 2 * ENC_HIDDEN))       # Attention.linear
    p["w1"] = rn(ks[15], (DEC_HIDDEN, 2 * ENC_HIDDEN))       # linear1 (no bias)
    p["w2"] = rn(ks[16], (DEC_HIDDEN, DEC_HIDDEN))           # linear2
    p["b2"] = rn(ks[17], (DEC_HIDDEN,))
    p["w3"] = rn(ks[18], (VOCAB_SIZE, DEC_HIDDEN))           # linear3
    p["b3"] = rn(ks[19], (VOCAB_SIZE,))
    return p


def prepare_params(p):
    """One-time conversion PyTorch layout -> fused kernel layout (bf16 weights)."""
    f32 = jnp.float32
    bf16 = jnp.bfloat16
    He = ENC_HIDDEN
    Hd = DEC_HIDDEN

    t = lambda w: jnp.asarray(w, f32).T
    row = lambda b: jnp.asarray(b, f32).reshape(1, -1)

    def pad_rows(emb):
        v, e = emb.shape
        return jnp.zeros((ONEHOT_PAD, e), f32).at[:v].set(jnp.asarray(emb, f32))

    # encoder fwd/bwd GRU fused: gate-column order [r_f, r_b, z_f, z_b, n_f, n_b]
    wf_ih_t, wb_ih_t = t(p["enc_f_w_ih"]), t(p["enc_b_w_ih"])      # (E, 3He)
    wf_hh_t, wb_hh_t = t(p["enc_f_w_hh"]), t(p["enc_b_w_hh"])      # (He, 3He)

    def interleave_cols(wf, wb):
        return jnp.concatenate(
            [jnp.concatenate([wf[:, g * He:(g + 1) * He],
                              wb[:, g * He:(g + 1) * He]], axis=1)
             for g in range(3)], axis=1)

    def interleave_bias(bf_, bb_):
        bf_, bb_ = jnp.asarray(bf_, f32), jnp.asarray(bb_, f32)
        return jnp.concatenate(
            [jnp.concatenate([bf_[g * He:(g + 1) * He],
                              bb_[g * He:(g + 1) * He]])
             for g in range(3)]).reshape(1, -1)

    wih_enc = interleave_cols(wf_ih_t, wb_ih_t)                    # (E, 6He)
    whh_enc = jnp.zeros((2 * He, 6 * He), f32)                     # block-diagonal
    for g in range(3):
        whh_enc = whh_enc.at[0:He, (2 * g) * He:(2 * g + 1) * He].set(
            wf_hh_t[:, g * He:(g + 1) * He])
        whh_enc = whh_enc.at[He:2 * He, (2 * g + 1) * He:(2 * g + 2) * He].set(
            wb_hh_t[:, g * He:(g + 1) * He])

    # Fold the embedding lookup into the GRU input projections (exact algebra):
    #   one_hot(ids) @ (emb @ W_ih^T)  ==  emb[ids] @ W_ih^T
    enc_tab = pad_rows(p["emb_enc"]) @ wih_enc                     # (ONEHOT_PAD, 6He)
    dec_tab = pad_rows(p["emb_dec"]) @ t(p["dec_w_ih"])            # (ONEHOT_PAD, 3Hd)

    gate_sel = jnp.tile(
        jnp.concatenate([jnp.ones((He,), f32), jnp.zeros((He,), f32)]), 3
    ).reshape(1, 6 * He)

    w3_t = t(p["w3"])                                              # (Hd, V)
    v = w3_t.shape[1]
    w3_pad = jnp.zeros((Hd, VOCAB_PAD), f32).at[:, :v].set(w3_t)
    b3_pad = (jnp.full((1, VOCAB_PAD), NEG_BIG, f32)
              .at[0, :v].set(jnp.asarray(p["b3"], f32)))

    return {
        "enc_tab": enc_tab.astype(bf16),
        "b_ih_enc": interleave_bias(p["enc_f_b_ih"], p["enc_b_b_ih"]),
        "whh_enc": whh_enc.astype(bf16),
        "b_hh_enc": interleave_bias(p["enc_f_b_hh"], p["enc_b_b_hh"]),
        "dec_tab": dec_tab.astype(bf16),
        "b_ih_dec": row(p["dec_b_ih"]),
        "whh_dec": t(p["dec_w_hh"]).astype(bf16),
        "b_hh_dec": row(p["dec_b_hh"]),
        "gate_sel": gate_sel,
        "wa_t": t(p["wa"]).astype(bf16),
        "w1_t": t(p["w1"]).astype(bf16),
        "w2_t": t(p["w2"]).astype(bf16),
        "b2": row(p["b2"]),
        "w3_t_pad": w3_pad.astype(bf16),
        "b3_pad": b3_pad,
    }


# ---------------------------------------------------------------------------
# Pure-JAX f32 reference (PyTorch-layout params) for a correctness check.
# ---------------------------------------------------------------------------
def _reference_forward(params, source, target):
    B, L = source.shape
    _, T = target.shape

    def gru(x_seq, w_ih, b_ih, w_hh, b_hh, h0):
        def step(h, x):
            xp = x @ w_ih.T + b_ih
            hp = h @ w_hh.T + b_hh
            H = h.shape[-1]
            r = jax.nn.sigmoid(xp[:, :H] + hp[:, :H])
            z = jax.nn.sigmoid(xp[:, H:2 * H] + hp[:, H:2 * H])
            n = jnp.tanh(xp[:, 2 * H:] + r * hp[:, 2 * H:])
            h_new = (1.0 - z) * n + z * h
            return h_new, h_new
        h_last, outs = lax.scan(step, h0, x_seq)
        return outs, h_last

    xs = jnp.transpose(jnp.take(params["emb_enc"], source, axis=0), (1, 0, 2))
    xt = jnp.transpose(jnp.take(params["emb_dec"], target, axis=0), (1, 0, 2))
    h0 = jnp.zeros((B, ENC_HIDDEN), jnp.float32)
    out_f, h_f = gru(xs, params["enc_f_w_ih"], params["enc_f_b_ih"],
                     params["enc_f_w_hh"], params["enc_f_b_hh"], h0)
    out_b_rev, h_b = gru(xs[::-1], params["enc_b_w_ih"], params["enc_b_b_ih"],
                         params["enc_b_w_hh"], params["enc_b_b_hh"], h0)
    out_b = out_b_rev[::-1]
    enc_out = jnp.transpose(jnp.concatenate([out_f, out_b], axis=-1), (1, 0, 2))
    h0d = jnp.concatenate([h_f, h_b], axis=-1)
    out_d, _ = gru(xt, params["dec_w_ih"], params["dec_b_ih"],
                   params["dec_w_hh"], params["dec_b_hh"], h0d)
    dec_out = jnp.transpose(out_d, (1, 0, 2))

    eproj = jnp.einsum('bld,hd->blh', enc_out, params["wa"])
    scores = jnp.einsum('bth,blh->btl', dec_out, eproj)
    A = jax.nn.softmax(scores, axis=-1)
    C = jnp.einsum('btl,bld->btd', A, enc_out)
    x = C @ params["w1"].T + dec_out @ params["w2"].T + params["b2"]
    P = x @ params["w3"].T + params["b3"]
    return -jax.nn.log_softmax(P, axis=-1)


if __name__ == "__main__":
    key = jax.random.PRNGKey(0)
    kp, ksrc, ktgt = jax.random.split(key, 3)
    params = init_params(kp)
    prep = prepare_params(params)

    B, SRC_LEN, TGT_LEN = 2, 8, 8
    source = jax.random.randint(ksrc, (B, SRC_LEN), 0, VOCAB_SIZE, dtype=jnp.int32)
    target = jax.random.randint(ktgt, (B, TGT_LEN), 0, VOCAB_SIZE, dtype=jnp.int32)

    out = seq2seq_forward(prep, source, target)
    out = jax.block_until_ready(out)

    assert out.shape == (B, TGT_LEN, VOCAB_SIZE)
    # sanity: exp(-(-log_softmax)) rows sum to 1 over the real vocab columns
    row_sums = jnp.sum(jnp.exp(-out), axis=-1)
    assert bool(jnp.allclose(row_sums, 1.0, atol=1e-4))
    # check vs. pure-JAX f32 reference (tolerance covers the bf16 MXU operands)
    ref = _reference_forward(params, source, target)
    assert bool(jnp.allclose(out, ref, atol=5e-2, rtol=5e-2))
    print("KERNEL_OK")
</pallas_src>

<mosaic_0001>
module attributes {stable_mosaic.version = 11 : i64} {
  func.func @_seq2seq_kernel(%arg0: i32, %arg1: memref<16x1xi32, #tpu.memory_space<vmem>>, %arg2: memref<16x1xi32, #tpu.memory_space<vmem>>, %arg3: memref<64x96xbf16, #tpu.memory_space<vmem>>, %arg4: memref<1x96xf32, #tpu.memory_space<vmem>>, %arg5: memref<32x96xbf16, #tpu.memory_space<vmem>>, %arg6: memref<1x96xf32, #tpu.memory_space<vmem>>, %arg7: memref<64x96xbf16, #tpu.memory_space<vmem>>, %arg8: memref<1x96xf32, #tpu.memory_space<vmem>>, %arg9: memref<32x96xbf16, #tpu.memory_space<vmem>>, %arg10: memref<1x96xf32, #tpu.memory_space<vmem>>, %arg11: memref<1x96xf32, #tpu.memory_space<vmem>>, %arg12: memref<16x16xf32, #tpu.memory_space<vmem>>, %arg13: memref<32x32xbf16, #tpu.memory_space<vmem>>, %arg14: memref<32x32xbf16, #tpu.memory_space<vmem>>, %arg15: memref<32x32xbf16, #tpu.memory_space<vmem>>, %arg16: memref<1x32xf32, #tpu.memory_space<vmem>>, %arg17: memref<32x128xbf16, #tpu.memory_space<vmem>>, %arg18: memref<1x128xf32, #tpu.memory_space<vmem>>, %arg19: memref<16x128xf32, #tpu.memory_space<vmem>>, %arg20: memref<16x32xf32, #tpu.memory_space<vmem>>, %arg21: memref<16x32xf32, #tpu.memory_space<vmem>>) attributes {dimension_semantics = [#tpu.dimension_semantics<arbitrary>], iteration_bounds = array<i64: 1>, scalar_prefetch = 0 : i64, scratch_operands = 2 : i64, tpu.core_type = #tpu.core_type<tc>, window_params = [{pipeline_mode = #tpu.pipeline_mode<synchronous>, transform_indices = @transform_0, window_bounds = array<i64: 16, 1>}, {pipeline_mode = #tpu.pipeline_mode<synchronous>, transform_indices = @transform_1, window_bounds = array<i64: 16, 1>}, {pipeline_mode = #tpu.pipeline_mode<synchronous>, transform_indices = @transform_2, window_bounds = array<i64: 64, 96>}, {pipeline_mode = #tpu.pipeline_mode<synchronous>, transform_indices = @transform_3, window_bounds = array<i64: 1, 96>}, {pipeline_mode = #tpu.pipeline_mode<synchronous>, transform_indices = @transform_4, window_bounds = array<i64: 32, 96>}, {pipeline_mode = #tpu.pipeline_mode<synchronous>, transform_indices = @transform_5, window_bounds = array<i64: 1, 96>}, {pipeline_mode = #tpu.pipeline_mode<synchronous>, transform_indices = @transform_6, window_bounds = array<i64: 64, 96>}, {pipeline_mode = #tpu.pipeline_mode<synchronous>, transform_indices = @transform_7, window_bounds = array<i64: 1, 96>}, {pipeline_mode = #tpu.pipeline_mode<synchronous>, transform_indices = @transform_8, window_bounds = array<i64: 32, 96>}, {pipeline_mode = #tpu.pipeline_mode<synchronous>, transform_indices = @transform_9, window_bounds = array<i64: 1, 96>}, {pipeline_mode = #tpu.pipeline_mode<synchronous>, transform_indices = @transform_10, window_bounds = array<i64: 1, 96>}, {pipeline_mode = #tpu.pipeline_mode<synchronous>, transform_indices = @transform_11, window_bounds = array<i64: 16, 16>}, {pipeline_mode = #tpu.pipeline_mode<synchronous>, transform_indices = @transform_12, window_bounds = array<i64: 32, 32>}, {pipeline_mode = #tpu.pipeline_mode<synchronous>, transform_indices = @transform_13, window_bounds = array<i64: 32, 32>}, {pipeline_mode = #tpu.pipeline_mode<synchronous>, transform_indices = @transform_14, window_bounds = array<i64: 32, 32>}, {pipeline_mode = #tpu.pipeline_mode<synchronous>, transform_indices = @transform_15, window_bounds = array<i64: 1, 32>}, {pipeline_mode = #tpu.pipeline_mode<synchronous>, transform_indices = @transform_16, window_bounds = array<i64: 32, 128>}, {pipeline_mode = #tpu.pipeline_mode<synchronous>, transform_indices = @transform_17, window_bounds = array<i64: 1, 128>}, {pipeline_mode = #tpu.pipeline_mode<synchronous>, transform_indices = @transform_18, window_bounds = array<i64: 16, 128>}]} {
    %c0 = arith.constant 0 : index
    %c0_0 = arith.constant 0 : index
    %0 = vector.load %arg1[%c0, %c0_0] : memref<16x1xi32, #tpu.memory_space<vmem>>, vector<16x1xi32>
    %1 = tpu.iota {dimensions = array<i32: 1>} : vector<16x64xi32>
    %2 = vector.broadcast %0 : vector<16x1xi32> to vector<16x64xi32>
    %3 = arith.cmpi eq, %2, %1 : vector<16x64xi32>
    %cst = arith.constant 1.000000e+00 : f32
    %cst_1 = arith.constant 0.000000e+00 : f32
    %4 = vector.broadcast %cst : f32 to vector<16x64xf32>
    %5 = vector.broadcast %cst_1 : f32 to vector<16x64xf32>
    %6 = arith.select %3, %4, %5 : vector<16x64xi1>, vector<16x64xf32>
    %7 = arith.truncf %6 : vector<16x64xf32> to vector<16x64xbf16>
    %c0_2 = arith.constant 0 : index
    %c0_3 = arith.constant 0 : index
    %8 = vector.load %arg3[%c0_2, %c0_3] : memref<64x96xbf16, #tpu.memory_space<vmem>>, vector<64x96xbf16>
    %cst_4 = arith.constant dense<0.000000e+00> : vector<16x96xf32>
    %9 = tpu.matmul %7, %8, %cst_4 {dimension_numbers = #tpu.dot_dimension_numbers<[1], [0], [0], [1], [0, 0, 1, 1], [], []>} : vector<16x64xbf16>, vector<64x96xbf16>, vector<16x96xf32> -> vector<16x96xf32>
    %c0_5 = arith.constant 0 : index
    %c0_6 = arith.constant 0 : index
    %10 = vector.load %arg4[%c0_5, %c0_6] : memref<1x96xf32, #tpu.memory_space<vmem>>, vector<1x96xf32>
    %11 = vector.broadcast %10 : vector<1x96xf32> to vector<16x96xf32>
    %12 = arith.addf %9, %11 : vector<16x96xf32>
    %c0_7 = arith.constant 0 : index
    %c0_8 = arith.constant 0 : index
    %13 = vector.load %arg2[%c0_7, %c0_8] : memref<16x1xi32, #tpu.memory_space<vmem>>, vector<16x1xi32>
    %14 = tpu.iota {dimensions = array<i32: 1>} : vector<16x64xi32>
    %15 = vector.broadcast %13 : vector<16x1xi32> to vector<16x64xi32>
    %16 = arith.cmpi eq, %15, %14 : vector<16x64xi32>
    %cst_9 = arith.constant 1.000000e+00 : f32
    %cst_10 = arith.constant 0.000000e+00 : f32
    %17 = vector.broadcast %cst_9 : f32 to vector<16x64xf32>
    %18 = vector.broadcast %cst_10 : f32 to vector<16x64xf32>
    %19 = arith.select %16, %17, %18 : vector<16x64xi1>, vector<16x64xf32>
    %20 = arith.truncf %19 : vector<16x64xf32> to vector<16x64xbf16>
    %c0_11 = arith.constant 0 : index
    %c0_12 = arith.constant 0 : index
    %21 = vector.load %arg7[%c0_11, %c0_12] : memref<64x96xbf16, #tpu.memory_space<vmem>>, vector<64x96xbf16>
    %cst_13 = arith.constant dense<0.000000e+00> : vector<16x96xf32>
    %22 = tpu.matmul %20, %21, %cst_13 {dimension_numbers = #tpu.dot_dimension_numbers<[1], [0], [0], [1], [0, 0, 1, 1], [], []>} : vector<16x64xbf16>, vector<64x96xbf16>, vector<16x96xf32> -> vector<16x96xf32>
    %c0_14 = arith.constant 0 : index
    %c0_15 = arith.constant 0 : index
    %23 = vector.load %arg8[%c0_14, %c0_15] : memref<1x96xf32, #tpu.memory_space<vmem>>, vector<1x96xf32>
    %24 = vector.broadcast %23 : vector<1x96xf32> to vector<16x96xf32>
    %25 = arith.addf %22, %24 : vector<16x96xf32>
    %26 = vector.extract_strided_slice %12 {offsets = [14, 0], sizes = [2, 96], strides = [1, 1]} : vector<16x96xf32> to vector<2x96xf32>
    %27 = vector.extract_strided_slice %12 {offsets = [12, 0], sizes = [2, 96], strides = [1, 1]} : vector<16x96xf32> to vector<2x96xf32>
    %28 = vector.extract_strided_slice %12 {offsets = [10, 0], sizes = [2, 96], strides = [1, 1]} : vector<16x96xf32> to vector<2x96xf32>
    %29 = vector.extract_strided_slice %12 {offsets = [8, 0], sizes = [2, 96], strides = [1, 1]} : vector<16x96xf32> to vector<2x96xf32>
    %30 = vector.extract_strided_slice %12 {offsets = [6, 0], sizes = [2, 96], strides = [1, 1]} : vector<16x96xf32> to vector<2x96xf32>
    %31 = vector.extract_strided_slice %12 {offsets = [4, 0], sizes = [2, 96], strides = [1, 1]} : vector<16x96xf32> to vector<2x96xf32>
    %32 = vector.extract_strided_slice %12 {offsets = [2, 0], sizes = [2, 96], strides = [1, 1]} : vector<16x96xf32> to vector<2x96xf32>
    %33 = vector.extract_strided_slice %12 {offsets = [0, 0], sizes = [2, 96], strides = [1, 1]} : vector<16x96xf32> to vector<2x96xf32>
    %34 = tpu.concatenate %26, %27, %28, %29, %30, %31, %32, %33 in 0 : vector<2x96xf32>, vector<2x96xf32>, vector<2x96xf32>, vector<2x96xf32>, vector<2x96xf32>, vector<2x96xf32>, vector<2x96xf32>, vector<2x96xf32> -> vector<16x96xf32>
    %c0_16 = arith.constant 0 : index
    %c0_17 = arith.constant 0 : index
    %35 = vector.load %arg11[%c0_16, %c0_17] : memref<1x96xf32, #tpu.memory_space<vmem>>, vector<1x96xf32>
    %36 = vector.broadcast %35 : vector<1x96xf32> to vector<16x96xf32>
    %37 = arith.mulf %36, %12 : vector<16x96xf32>
    %cst_18 = arith.constant 1.000000e+00 : f32
    %38 = vector.broadcast %cst_18 : f32 to vector<1x96xf32>
    %39 = arith.subf %38, %35 : vector<1x96xf32>
    %40 = vector.broadcast %39 : vector<1x96xf32> to vector<16x96xf32>
    %41 = arith.mulf %40, %34 : vector<16x96xf32>
    %42 = arith.addf %37, %41 : vector<16x96xf32>
    %c0_19 = arith.constant 0 : index
    %c0_20 = arith.constant 0 : index
    %43 = vector.load %arg5[%c0_19, %c0_20] : memref<32x96xbf16, #tpu.memory_space<vmem>>, vector<32x96xbf16>
    %c0_21 = arith.constant 0 : index
    %c0_22 = arith.constant 0 : index
    %44 = vector.load %arg6[%c0_21, %c0_22] : memref<1x96xf32, #tpu.memory_space<vmem>>, vector<1x96xf32>
    %c0_23 = arith.constant 0 : index
    %c0_24 = arith.constant 0 : index
    %45 = vector.load %arg9[%c0_23, %c0_24] : memref<32x96xbf16, #tpu.memory_space<vmem>>, vector<32x96xbf16>
    %c0_25 = arith.constant 0 : index
    %c0_26 = arith.constant 0 : index
    %46 = vector.load %arg10[%c0_25, %c0_26] : memref<1x96xf32, #tpu.memory_space<vmem>>, vector<1x96xf32>
    %cst_27 = arith.constant 0.000000e+00 : f32
    %47 = vector.broadcast %cst_27 : f32 to vector<2x32xf32>
    %48 = vector.extract_strided_slice %42 {offsets = [0, 0], sizes = [2, 96], strides = [1, 1]} : vector<16x96xf32> to vector<2x96xf32>
    %49 = arith.truncf %47 : vector<2x32xf32> to vector<2x32xbf16>
    %cst_28 = arith.constant dense<0.000000e+00> : vector<2x96xf32>
    %50 = tpu.matmul %49, %43, %cst_28 {dimension_numbers = #tpu.dot_dimension_numbers<[1], [0], [0], [1], [0, 0, 1, 1], [], []>} : vector<2x32xbf16>, vector<32x96xbf16>, vector<2x96xf32> -> vector<2x96xf32>
    %51 = vector.broadcast %44 : vector<1x96xf32> to vector<2x96xf32>
    %52 = arith.addf %50, %51 : vector<2x96xf32>
    %53 = vector.extract_strided_slice %48 {offsets = [0, 0], sizes = [2, 32], strides = [1, 1]} : vector<2x96xf32> to vector<2x32xf32>
    %54 = vector.extract_strided_slice %52 {offsets = [0, 0], sizes = [2, 32], strides = [1, 1]} : vector<2x96xf32> to vector<2x32xf32>
    %55 = arith.addf %53, %54 : vector<2x32xf32>
    %56 = arith.negf %55 : vector<2x32xf32>
    %57 = math.exp %56 : vector<2x32xf32>
    %cst_29 = arith.constant 1.000000e+00 : f32
    %58 = vector.broadcast %cst_29 : f32 to vector<2x32xf32>
    %59 = arith.addf %58, %57 : vector<2x32xf32>
    %60 = arith.divf %58, %59 : vector<2x32xf32>
    %61 = vector.extract_strided_slice %48 {offsets = [0, 32], sizes = [2, 32], strides = [1, 1]} : vector<2x96xf32> to vector<2x32xf32>
    %62 = vector.extract_strided_slice %52 {offsets = [0, 32], sizes = [2, 32], strides = [1, 1]} : vector<2x96xf32> to vector<2x32xf32>
    %63 = arith.addf %61, %62 : vector<2x32xf32>
    %64 = arith.negf %63 : vector<2x32xf32>
    %65 = math.exp %64 : vector<2x32xf32>
    %cst_30 = arith.constant 1.000000e+00 : f32
    %66 = vector.broadcast %cst_30 : f32 to vector<2x32xf32>
    %67 = arith.addf %66, %65 : vector<2x32xf32>
    %68 = arith.divf %66, %67 : vector<2x32xf32>
    %69 = vector.extract_strided_slice %48 {offsets = [0, 64], sizes = [2, 32], strides = [1, 1]} : vector<2x96xf32> to vector<2x32xf32>
    %70 = vector.extract_strided_slice %52 {offsets = [0, 64], sizes = [2, 32], strides = [1, 1]} : vector<2x96xf32> to vector<2x32xf32>
    %71 = arith.mulf %60, %70 : vector<2x32xf32>
    %72 = arith.addf %69, %71 : vector<2x32xf32>
    %73 = math.tanh %72 : vector<2x32xf32>
    %cst_31 = arith.constant 1.000000e+00 : f32
    %74 = vector.broadcast %cst_31 : f32 to vector<2x32xf32>
    %75 = arith.subf %74, %68 : vector<2x32xf32>
    %76 = arith.mulf %75, %73 : vector<2x32xf32>
    %77 = arith.mulf %68, %47 : vector<2x32xf32>
    %78 = arith.addf %76, %77 : vector<2x32xf32>
    %c0_32 = arith.constant 0 : index
    %c0_33 = arith.constant 0 : index
    %79 = vector.load %arg20[%c0_32, %c0_33] : memref<16x32xf32, #tpu.memory_space<vmem>>, vector<2x32xf32>
    tpu.vector_store %arg20[%c0_32, %c0_33], %78 {strides = array<i32>} : memref<16x32xf32, #tpu.memory_space<vmem>>, vector<2x32xf32>,
    %80 = vector.extract_strided_slice %42 {offsets = [2, 0], sizes = [2, 96], strides = [1, 1]} : vector<16x96xf32> to vector<2x96xf32>
    %81 = arith.truncf %78 : vector<2x32xf32> to vector<2x32xbf16>
    %cst_34 = arith.constant dense<0.000000e+00> : vector<2x96xf32>
    %82 = tpu.matmul %81, %43, %cst_34 {dimension_numbers = #tpu.dot_dimension_numbers<[1], [0], [0], [1], [0, 0, 1, 1], [], []>} : vector<2x32xbf16>, vector<32x96xbf16>, vector<2x96xf32> -> vector<2x96xf32>
    %83 = vector.broadcast %44 : vector<1x96xf32> to vector<2x96xf32>
    %84 = arith.addf %82, %83 : vector<2x96xf32>
    %85 = vector.extract_strided_slice %80 {offsets = [0, 0], sizes = [2, 32], strides = [1, 1]} : vector<2x96xf32> to vector<2x32xf32>
    %86 = vector.extract_strided_slice %84 {offsets = [0, 0], sizes = [2, 32], strides = [1, 1]} : vector<2x96xf32> to vector<2x32xf32>
    %87 = arith.addf %85, %86 : vector<2x32xf32>
    %88 = arith.negf %87 : vector<2x32xf32>
    %89 = math.exp %88 : vector<2x32xf32>
    %cst_35 = arith.constant 1.000000e+00 : f32
    %90 = vector.broadcast %cst_35 : f32 to vector<2x32xf32>
    %91 = arith.addf %90, %89 : vector<2x32xf32>
    %92 = arith.divf %90, %91 : vector<2x32xf32>
    %93 = vector.extract_strided_slice %80 {offsets = [0, 32], sizes = [2, 32], strides = [1, 1]} : vector<2x96xf32> to vector<2x32xf32>
    %94 = vector.extract_strided_slice %84 {offsets = [0, 32], sizes = [2, 32], strides = [1, 1]} : vector<2x96xf32> to vector<2x32xf32>
    %95 = arith.addf %93, %94 : vector<2x32xf32>
    %96 = arith.negf %95 : vector<2x32xf32>
    %97 = math.exp %96 : vector<2x32xf32>
    %cst_36 = arith.constant 1.000000e+00 : f32
    %98 = vector.broadcast %cst_36 : f32 to vector<2x32xf32>
    %99 = arith.addf %98, %97 : vector<2x32xf32>
    %100 = arith.divf %98, %99 : vector<2x32xf32>
    %101 = vector.extract_strided_slice %80 {offsets = [0, 64], sizes = [2, 32], strides = [1, 1]} : vector<2x96xf32> to vector<2x32xf32>
    %102 = vector.extract_strided_slice %84 {offsets = [0, 64], sizes = [2, 32], strides = [1, 1]} : vector<2x96xf32> to vector<2x32xf32>
    %103 = arith.mulf %92, %102 : vector<2x32xf32>
    %104 = arith.addf %101, %103 : vector<2x32xf32>
    %105 = math.tanh %104 : vector<2x32xf32>
    %cst_37 = arith.constant 1.000000e+00 : f32
    %106 = vector.broadcast %cst_37 : f32 to vector<2x32xf32>
    %107 = arith.subf %106, %100 : vector<2x32xf32>
    %108 = arith.mulf %107, %105 : vector<2x32xf32>
    %109 = arith.mulf %100, %78 : vector<2x32xf32>
    %110 = arith.addf %108, %109 : vector<2x32xf32>
    %c2 = arith.constant 2 : index
    %c0_38 = arith.constant 0 : index
    %111 = vector.load %arg20[%c2, %c0_38] : memref<16x32xf32, #tpu.memory_space<vmem>>, vector<2x32xf32>
    tpu.vector_store %arg20[%c2, %c0_38], %110 {strides = array<i32>} : memref<16x32xf32, #tpu.memory_space<vmem>>, vector<2x32xf32>,
    %112 = vector.extract_strided_slice %42 {offsets = [4, 0], sizes = [2, 96], strides = [1, 1]} : vector<16x96xf32> to vector<2x96xf32>
    %113 = arith.truncf %110 : vector<2x32xf32> to vector<2x32xbf16>
    %cst_39 = arith.constant dense<0.000000e+00> : vector<2x96xf32>
    %114 = tpu.matmul %113, %43, %cst_39 {dimension_numbers = #tpu.dot_dimension_numbers<[1], [0], [0], [1], [0, 0, 1, 1], [], []>} : vector<2x32xbf16>, vector<32x96xbf16>, vector<2x96xf32> -> vector<2x96xf32>
    %115 = vector.broadcast %44 : vector<1x96xf32> to vector<2x96xf32>
    %116 = arith.addf %114, %115 : vector<2x96xf32>
    %117 = vector.extract_strided_slice %112 {offsets = [0, 0], sizes = [2, 32], strides = [1, 1]} : vector<2x96xf32> to vector<2x32xf32>
    %118 = vector.extract_strided_slice %116 {offsets = [0, 0], sizes = [2, 32], strides = [1, 1]} : vector<2x96xf32> to vector<2x32xf32>
    %119 = arith.addf %117, %118 : vector<2x32xf32>
    %120 = arith.negf %119 : vector<2x32xf32>
    %121 = math.exp %120 : vector<2x32xf32>
    %cst_40 = arith.constant 1.000000e+00 : f32
    %122 = vector.broadcast %cst_40 : f32 to vector<2x32xf32>
    %123 = arith.addf %122, %121 : vector<2x32xf32>
    %124 = arith.divf %122, %123 : vector<2x32xf32>
    %125 = vector.extract_strided_slice %112 {offsets = [0, 32], sizes = [2, 32], strides = [1, 1]} : vector<2x96xf32> to vector<2x32xf32>
    %126 = vector.extract_strided_slice %116 {offsets = [0, 32], sizes = [2, 32], strides = [1, 1]} : vector<2x96xf32> to vector<2x32xf32>
    %127 = arith.addf %125, %126 : vector<2x32xf32>
    %128 = arith.negf %127 : vector<2x32xf32>
    %129 = math.exp %128 : vector<2x32xf32>
    %cst_41 = arith.constant 1.000000e+00 : f32
    %130 = vector.broadcast %cst_41 : f32 to vector<2x32xf32>
    %131 = arith.addf %130, %129 : vector<2x32xf32>
    %132 = arith.divf %130, %131 : vector<2x32xf32>
    %133 = vector.extract_strided_slice %112 {offsets = [0, 64], sizes = [2, 32], strides = [1, 1]} : vector<2x96xf32> to vector<2x32xf32>
    %134 = vector.extract_strided_slice %116 {offsets = [0, 64], sizes = [2, 32], strides = [1, 1]} : vector<2x96xf32> to vector<2x32xf32>
    %135 = arith.mulf %124, %134 : vector<2x32xf32>
    %136 = arith.addf %133, %135 : vector<2x32xf32>
    %137 = math.tanh %136 : vector<2x32xf32>
    %cst_42 = arith.constant 1.000000e+00 : f32
    %138 = vector.broadcast %cst_42 : f32 to vector<2x32xf32>
    %139 = arith.subf %138, %132 : vector<2x32xf32>
    %140 = arith.mulf %139, %137 : vector<2x32xf32>
    %141 = arith.mulf %132, %110 : vector<2x32xf32>
    %142 = arith.addf %140, %141 : vector<2x32xf32>
    %c4 = arith.constant 4 : index
    %c0_43 = arith.constant 0 : index
    %143 = vector.load %arg20[%c4, %c0_43] : memref<16x32xf32, #tpu.memory_space<vmem>>, vector<2x32xf32>
    tpu.vector_store %arg20[%c4, %c0_43], %142 {strides = array<i32>} : memref<16x32xf32, #tpu.memory_space<vmem>>, vector<2x32xf32>,
    %144 = vector.extract_strided_slice %42 {offsets = [6, 0], sizes = [2, 96], strides = [1, 1]} : vector<16x96xf32> to vector<2x96xf32>
    %145 = arith.truncf %142 : vector<2x32xf32> to vector<2x32xbf16>
    %cst_44 = arith.constant dense<0.000000e+00> : vector<2x96xf32>
    %146 = tpu.matmul %145, %43, %cst_44 {dimension_numbers = #tpu.dot_dimension_numbers<[1], [0], [0], [1], [0, 0, 1, 1], [], []>} : vector<2x32xbf16>, vector<32x96xbf16>, vector<2x96xf32> -> vector<2x96xf32>
    %147 = vector.broadcast %44 : vector<1x96xf32> to vector<2x96xf32>
    %148 = arith.addf %146, %147 : vector<2x96xf32>
    %149 = vector.extract_strided_slice %144 {offsets = [0, 0], sizes = [2, 32], strides = [1, 1]} : vector<2x96xf32> to vector<2x32xf32>
    %150 = vector.extract_strided_slice %148 {offsets = [0, 0], sizes = [2, 32], strides = [1, 1]} : vector<2x96xf32> to vector<2x32xf32>
    %151 = arith.addf %149, %150 : vector<2x32xf32>
    %152 = arith.negf %151 : vector<2x32xf32>
    %153 = math.exp %152 : vector<2x32xf32>
    %cst_45 = arith.constant 1.000000e+00 : f32
    %154 = vector.broadcast %cst_45 : f32 to vector<2x32xf32>
    %155 = arith.addf %154, %153 : vector<2x32xf32>
    %156 = arith.divf %154, %155 : vector<2x32xf32>
    %157 = vector.extract_strided_slice %144 {offsets = [0, 32], sizes = [2, 32], strides = [1, 1]} : vector<2x96xf32> to vector<2x32xf32>
    %158 = vector.extract_strided_slice %148 {offsets = [0, 32], sizes = [2, 32], strides = [1, 1]} : vector<2x96xf32> to vector<2x32xf32>
    %159 = arith.addf %157, %158 : vector<2x32xf32>
    %160 = arith.negf %159 : vector<2x32xf32>
    %161 = math.exp %160 : vector<2x32xf32>
    %cst_46 = arith.constant 1.000000e+00 : f32
    %162 = vector.broadcast %cst_46 : f32 to vector<2x32xf32>
    %163 = arith.addf %162, %161 : vector<2x32xf32>
    %164 = arith.divf %162, %163 : vector<2x32xf32>
    %165 = vector.extract_strided_slice %144 {offsets = [0, 64], sizes = [2, 32], strides = [1, 1]} : vector<2x96xf32> to vector<2x32xf32>
    %166 = vector.extract_strided_slice %148 {offsets = [0, 64], sizes = [2, 32], strides = [1, 1]} : vector<2x96xf32> to vector<2x32xf32>
    %167 = arith.mulf %156, %166 : vector<2x32xf32>
    %168 = arith.addf %165, %167 : vector<2x32xf32>
    %169 = math.tanh %168 : vector<2x32xf32>
    %cst_47 = arith.constant 1.000000e+00 : f32
    %170 = vector.broadcast %cst_47 : f32 to vector<2x32xf32>
    %171 = arith.subf %170, %164 : vector<2x32xf32>
    %172 = arith.mulf %171, %169 : vector<2x32xf32>
    %173 = arith.mulf %164, %142 : vector<2x32xf32>
    %174 = arith.addf %172, %173 : vector<2x32xf32>
    %c6 = arith.constant 6 : index
    %c0_48 = arith.constant 0 : index
    %175 = vector.load %arg20[%c6, %c0_48] : memref<16x32xf32, #tpu.memory_space<vmem>>, vector<2x32xf32>
    tpu.vector_store %arg20[%c6, %c0_48], %174 {strides = array<i32>} : memref<16x32xf32, #tpu.memory_space<vmem>>, vector<2x32xf32>,
    %176 = vector.extract_strided_slice %42 {offsets = [8, 0], sizes = [2, 96], strides = [1, 1]} : vector<16x96xf32> to vector<2x96xf32>
    %177 = arith.truncf %174 : vector<2x32xf32> to vector<2x32xbf16>
    %cst_49 = arith.constant dense<0.000000e+00> : vector<2x96xf32>
    %178 = tpu.matmul %177, %43, %cst_49 {dimension_numbers = #tpu.dot_dimension_numbers<[1], [0], [0], [1], [0, 0, 1, 1], [], []>} : vector<2x32xbf16>, vector<32x96xbf16>, vector<2x96xf32> -> vector<2x96xf32>
    %179 = vector.broadcast %44 : vector<1x96xf32> to vector<2x96xf32>
    %180 = arith.addf %178, %179 : vector<2x96xf32>
    %181 = vector.extract_strided_slice %176 {offsets = [0, 0], sizes = [2, 32], strides = [1, 1]} : vector<2x96xf32> to vector<2x32xf32>
    %182 = vector.extract_strided_slice %180 {offsets = [0, 0], sizes = [2, 32], strides = [1, 1]} : vector<2x96xf32> to vector<2x32xf32>
    %183 = arith.addf %181, %182 : vector<2x32xf32>
    %184 = arith.negf %183 : vector<2x32xf32>
    %185 = math.exp %184 : vector<2x32xf32>
    %cst_50 = arith.constant 1.000000e+00 : f32
    %186 = vector.broadcast %cst_50 : f32 to vector<2x32xf32>
    %187 = arith.addf %186, %185 : vector<2x32xf32>
    %188 = arith.divf %186, %187 : vector<2x32xf32>
    %189 = vector.extract_strided_slice %176 {offsets = [0, 32], sizes = [2, 32], strides = [1, 1]} : vector<2x96xf32> to vector<2x32xf32>
    %190 = vector.extract_strided_slice %180 {offsets = [0, 32], sizes = [2, 32], strides = [1, 1]} : vector<2x96xf32> to vector<2x32xf32>
    %191 = arith.addf %189, %190 : vector<2x32xf32>
    %192 = arith.negf %191 : vector<2x32xf32>
    %193 = math.exp %192 : vector<2x32xf32>
    %cst_51 = arith.constant 1.000000e+00 : f32
    %194 = vector.broadcast %cst_51 : f32 to vector<2x32xf32>
    %195 = arith.addf %194, %193 : vector<2x32xf32>
    %196 = arith.divf %194, %195 : vector<2x32xf32>
    %197 = vector.extract_strided_slice %176 {offsets = [0, 64], sizes = [2, 32], strides = [1, 1]} : vector<2x96xf32> to vector<2x32xf32>
    %198 = vector.extract_strided_slice %180 {offsets = [0, 64], sizes = [2, 32], strides = [1, 1]} : vector<2x96xf32> to vector<2x32xf32>
    %199 = arith.mulf %188, %198 : vector<2x32xf32>
    %200 = arith.addf %197, %199 : vector<2x32xf32>
    %201 = math.tanh %200 : vector<2x32xf32>
    %cst_52 = arith.constant 1.000000e+00 : f32
    %202 = vector.broadcast %cst_52 : f32 to vector<2x32xf32>
    %203 = arith.subf %202, %196 : vector<2x32xf32>
    %204 = arith.mulf %203, %201 : vector<2x32xf32>
    %205 = arith.mulf %196, %174 : vector<2x32xf32>
    %206 = arith.addf %204, %205 : vector<2x32xf32>
    %c8 = arith.constant 8 : index
    %c0_53 = arith.constant 0 : index
    %207 = vector.load %arg20[%c8, %c0_53] : memref<16x32xf32, #tpu.memory_space<vmem>>, vector<2x32xf32>
    tpu.vector_store %arg20[%c8, %c0_53], %206 {strides = array<i32>} : memref<16x32xf32, #tpu.memory_space<vmem>>, vector<2x32xf32>,
    %208 = vector.extract_strided_slice %42 {offsets = [10, 0], sizes = [2, 96], strides = [1, 1]} : vector<16x96xf32> to vector<2x96xf32>
    %209 = arith.truncf %206 : vector<2x32xf32> to vector<2x32xbf16>
    %cst_54 = arith.constant dense<0.000000e+00> : vector<2x96xf32>
    %210 = tpu.matmul %209, %43, %cst_54 {dimension_numbers = #tpu.dot_dimension_numbers<[1], [0], [0], [1], [0, 0, 1, 1], [], []>} : vector<2x32xbf16>, vector<32x96xbf16>, vector<2x96xf32> -> vector<2x96xf32>
    %211 = vector.broadcast %44 : vector<1x96xf32> to vector<2x96xf32>
    %212 = arith.addf %210, %211 : vector<2x96xf32>
    %213 = vector.extract_strided_slice %208 {offsets = [0, 0], sizes = [2, 32], strides = [1, 1]} : vector<2x96xf32> to vector<2x32xf32>
    %214 = vector.extract_strided_slice %212 {offsets = [0, 0], sizes = [2, 32], strides = [1, 1]} : vector<2x96xf32> to vector<2x32xf32>
    %215 = arith.addf %213, %214 : vector<2x32xf32>
    %216 = arith.negf %215 : vector<2x32xf32>
    %217 = math.exp %216 : vector<2x32xf32>
    %cst_55 = arith.constant 1.000000e+00 : f32
    %218 = vector.broadcast %cst_55 : f32 to vector<2x32xf32>
    %219 = arith.addf %218, %217 : vector<2x32xf32>
    %220 = arith.divf %218, %219 : vector<2x32xf32>
    %221 = vector.extract_strided_slice %208 {offsets = [0, 32], sizes = [2, 32], strides = [1, 1]} : vector<2x96xf32> to vector<2x32xf32>
    %222 = vector.extract_strided_slice %212 {offsets = [0, 32], sizes = [2, 32], strides = [1, 1]} : vector<2x96xf32> to vector<2x32xf32>
    %223 = arith.addf %221, %222 : vector<2x32xf32>
    %224 = arith.negf %223 : vector<2x32xf32>
    %225 = math.exp %224 : vector<2x32xf32>
    %cst_56 = arith.constant 1.000000e+00 : f32
    %226 = vector.broadcast %cst_56 : f32 to vector<2x32xf32>
    %227 = arith.addf %226, %225 : vector<2x32xf32>
    %228 = arith.divf %226, %227 : vector<2x32xf32>
    %229 = vector.extract_strided_slice %208 {offsets = [0, 64], sizes = [2, 32], strides = [1, 1]} : vector<2x96xf32> to vector<2x32xf32>
    %230 = vector.extract_strided_slice %212 {offsets = [0, 64], sizes = [2, 32], strides = [1, 1]} : vector<2x96xf32> to vector<2x32xf32>
    %231 = arith.mulf %220, %230 : vector<2x32xf32>
    %232 = arith.addf %229, %231 : vector<2x32xf32>
    %233 = math.tanh %232 : vector<2x32xf32>
    %cst_57 = arith.constant 1.000000e+00 : f32
    %234 = vector.broadcast %cst_57 : f32 to vector<2x32xf32>
    %235 = arith.subf %234, %228 : vector<2x32xf32>
    %236 = arith.mulf %235, %233 : vector<2x32xf32>
    %237 = arith.mulf %228, %206 : vector<2x32xf32>
    %238 = arith.addf %236, %237 : vector<2x32xf32>
    %c10 = arith.constant 10 : index
    %c0_58 = arith.constant 0 : index
    %239 = vector.load %arg20[%c10, %c0_58] : memref<16x32xf32, #tpu.memory_space<vmem>>, vector<2x32xf32>
    tpu.vector_store %arg20[%c10, %c0_58], %238 {strides = array<i32>} : memref<16x32xf32, #tpu.memory_space<vmem>>, vector<2x32xf32>,
    %240 = vector.extract_strided_slice %42 {offsets = [12, 0], sizes = [2, 96], strides = [1, 1]} : vector<16x96xf32> to vector<2x96xf32>
    %241 = arith.truncf %238 : vector<2x32xf32> to vector<2x32xbf16>
    %cst_59 = arith.constant dense<0.000000e+00> : vector<2x96xf32>
    %242 = tpu.matmul %241, %43, %cst_59 {dimension_numbers = #tpu.dot_dimension_numbers<[1], [0], [0], [1], [0, 0, 1, 1], [], []>} : vector<2x32xbf16>, vector<32x96xbf16>, vector<2x96xf32> -> vector<2x96xf32>
    %243 = vector.broadcast %44 : vector<1x96xf32> to vector<2x96xf32>
    %244 = arith.addf %242, %243 : vector<2x96xf32>
    %245 = vector.extract_strided_slice %240 {offsets = [0, 0], sizes = [2, 32], strides = [1, 1]} : vector<2x96xf32> to vector<2x32xf32>
    %246 = vector.extract_strided_slice %244 {offsets = [0, 0], sizes = [2, 32], strides = [1, 1]} : vector<2x96xf32> to vector<2x32xf32>
    %247 = arith.addf %245, %246 : vector<2x32xf32>
    %248 = arith.negf %247 : vector<2x32xf32>
    %249 = math.exp %248 : vector<2x32xf32>
    %cst_60 = arith.constant 1.000000e+00 : f32
    %250 = vector.broadcast %cst_60 : f32 to vector<2x32xf32>
    %251 = arith.addf %250, %249 : vector<2x32xf32>
    %252 = arith.divf %250, %251 : vector<2x32xf32>
    %253 = vector.extract_strided_slice %240 {offsets = [0, 32], sizes = [2, 32], strides = [1, 1]} : vector<2x96xf32> to vector<2x32xf32>
    %254 = vector.extract_strided_slice %244 {offsets = [0, 32], sizes = [2, 32], strides = [1, 1]} : vector<2x96xf32> to vector<2x32xf32>
    %255 = arith.addf %253, %254 : vector<2x32xf32>
    %256 = arith.negf %255 : vector<2x32xf32>
    %257 = math.exp %256 : vector<2x32xf32>
    %cst_61 = arith.constant 1.000000e+00 : f32
    %258 = vector.broadcast %cst_61 : f32 to vector<2x32xf32>
    %259 = arith.addf %258, %257 : vector<2x32xf32>
    %260 = arith.divf %258, %259 : vector<2x32xf32>
    %261 = vector.extract_strided_slice %240 {offsets = [0, 64], sizes = [2, 32], strides = [1, 1]} : vector<2x96xf32> to vector<2x32xf32>
    %262 = vector.extract_strided_slice %244 {offsets = [0, 64], sizes = [2, 32], strides = [1, 1]} : vector<2x96xf32> to vector<2x32xf32>
    %263 = arith.mulf %252, %262 : vector<2x32xf32>
    %264 = arith.addf %261, %263 : vector<2x32xf32>
    %265 = math.tanh %264 : vector<2x32xf32>
    %cst_62 = arith.constant 1.000000e+00 : f32
    %266 = vector.broadcast %cst_62 : f32 to vector<2x32xf32>
    %267 = arith.subf %266, %260 : vector<2x32xf32>
    %268 = arith.mulf %267, %265 : vector<2x32xf32>
    %269 = arith.mulf %260, %238 : vector<2x32xf32>
    %270 = arith.addf %268, %269 : vector<2x32xf32>
    %c12 = arith.constant 12 : index
    %c0_63 = arith.constant 0 : index
    %271 = vector.load %arg20[%c12, %c0_63] : memref<16x32xf32, #tpu.memory_space<vmem>>, vector<2x32xf32>
    tpu.vector_store %arg20[%c12, %c0_63], %270 {strides = array<i32>} : memref<16x32xf32, #tpu.memory_space<vmem>>, vector<2x32xf32>,
    %272 = vector.extract_strided_slice %42 {offsets = [14, 0], sizes = [2, 96], strides = [1, 1]} : vector<16x96xf32> to vector<2x96xf32>
    %273 = arith.truncf %270 : vector<2x32xf32> to vector<2x32xbf16>
    %cst_64 = arith.constant dense<0.000000e+00> : vector<2x96xf32>
    %274 = tpu.matmul %273, %43, %cst_64 {dimension_numbers = #tpu.dot_dimension_numbers<[1], [0], [0], [1], [0, 0, 1, 1], [], []>} : vector<2x32xbf16>, vector<32x96xbf16>, vector<2x96xf32> -> vector<2x96xf32>
    %275 = vector.broadcast %44 : vector<1x96xf32> to vector<2x96xf32>
    %276 = arith.addf %274, %275 : vector<2x96xf32>
    %277 = vector.extract_strided_slice %272 {offsets = [0, 0], sizes = [2, 32], strides = [1, 1]} : vector<2x96xf32> to vector<2x32xf32>
    %278 = vector.extract_strided_slice %276 {offsets = [0, 0], sizes = [2, 32], strides = [1, 1]} : vector<2x96xf32> to vector<2x32xf32>
    %279 = arith.addf %277, %278 : vector<2x32xf32>
    %280 = arith.negf %279 : vector<2x32xf32>
    %281 = math.exp %280 : vector<2x32xf32>
    %cst_65 = arith.constant 1.000000e+00 : f32
    %282 = vector.broadcast %cst_65 : f32 to vector<2x32xf32>
    %283 = arith.addf %282, %281 : vector<2x32xf32>
    %284 = arith.divf %282, %283 : vector<2x32xf32>
    %285 = vector.extract_strided_slice %272 {offsets = [0, 32], sizes = [2, 32], strides = [1, 1]} : vector<2x96xf32> to vector<2x32xf32>
    %286 = vector.extract_strided_slice %276 {offsets = [0, 32], sizes = [2, 32], strides = [1, 1]} : vector<2x96xf32> to vector<2x32xf32>
    %287 = arith.addf %285, %286 : vector<2x32xf32>
    %288 = arith.negf %287 : vector<2x32xf32>
    %289 = math.exp %288 : vector<2x32xf32>
    %cst_66 = arith.constant 1.000000e+00 : f32
    %290 = vector.broadcast %cst_66 : f32 to vector<2x32xf32>
    %291 = arith.addf %290, %289 : vector<2x32xf32>
    %292 = arith.divf %290, %291 : vector<2x32xf32>
    %293 = vector.extract_strided_slice %272 {offsets = [0, 64], sizes = [2, 32], strides = [1, 1]} : vector<2x96xf32> to vector<2x32xf32>
    %294 = vector.extract_strided_slice %276 {offsets = [0, 64], sizes = [2, 32], strides = [1, 1]} : vector<2x96xf32> to vector<2x32xf32>
    %295 = arith.mulf %284, %294 : vector<2x32xf32>
    %296 = arith.addf %293, %295 : vector<2x32xf32>
    %297 = math.tanh %296 : vector<2x32xf32>
    %cst_67 = arith.constant 1.000000e+00 : f32
    %298 = vector.broadcast %cst_67 : f32 to vector<2x32xf32>
    %299 = arith.subf %298, %292 : vector<2x32xf32>
    %300 = arith.mulf %299, %297 : vector<2x32xf32>
    %301 = arith.mulf %292, %270 : vector<2x32xf32>
    %302 = arith.addf %300, %301 : vector<2x32xf32>
    %c14 = arith.constant 14 : index
    %c0_68 = arith.constant 0 : index
    %303 = vector.load %arg20[%c14, %c0_68] : memref<16x32xf32, #tpu.memory_space<vmem>>, vector<2x32xf32>
    tpu.vector_store %arg20[%c14, %c0_68], %302 {strides = array<i32>} : memref<16x32xf32, #tpu.memory_space<vmem>>, vector<2x32xf32>,
    %c0_69 = arith.constant 0 : index
    %c0_70 = arith.constant 0 : index
    %304 = vector.load %arg20[%c0_69, %c0_70] : memref<16x32xf32, #tpu.memory_space<vmem>>, vector<16x32xf32>
    %305 = vector.extract_strided_slice %304 {offsets = [14, 0], sizes = [2, 32], strides = [1, 1]} : vector<16x32xf32> to vector<2x32xf32>
    %306 = vector.extract_strided_slice %304 {offsets = [12, 0], sizes = [2, 32], strides = [1, 1]} : vector<16x32xf32> to vector<2x32xf32>
    %307 = vector.extract_strided_slice %304 {offsets = [10, 0], sizes = [2, 32], strides = [1, 1]} : vector<16x32xf32> to vector<2x32xf32>
    %308 = vector.extract_strided_slice %304 {offsets = [8, 0], sizes = [2, 32], strides = [1, 1]} : vector<16x32xf32> to vector<2x32xf32>
    %309 = vector.extract_strided_slice %304 {offsets = [6, 0], sizes = [2, 32], strides = [1, 1]} : vector<16x32xf32> to vector<2x32xf32>
    %310 = vector.extract_strided_slice %304 {offsets = [4, 0], sizes = [2, 32], strides = [1, 1]} : vector<16x32xf32> to vector<2x32xf32>
    %311 = vector.extract_strided_slice %304 {offsets = [2, 0], sizes = [2, 32], strides = [1, 1]} : vector<16x32xf32> to vector<2x32xf32>
    %312 = vector.extract_strided_slice %304 {offsets = [0, 0], sizes = [2, 32], strides = [1, 1]} : vector<16x32xf32> to vector<2x32xf32>
    %313 = tpu.concatenate %305, %306, %307, %308, %309, %310, %311, %312 in 0 : vector<2x32xf32>, vector<2x32xf32>, vector<2x32xf32>, vector<2x32xf32>, vector<2x32xf32>, vector<2x32xf32>, vector<2x32xf32>, vector<2x32xf32> -> vector<16x32xf32>
    %314 = tpu.iota {dimensions = array<i32: 1>} : vector<16x32xi32>
    %c16_i32 = arith.constant 16 : i32
    %315 = vector.broadcast %c16_i32 : i32 to vector<16x32xi32>
    %316 = arith.cmpi slt, %314, %315 : vector<16x32xi32>
    %317 = arith.select %316, %304, %313 : vector<16x32xi1>, vector<16x32xf32>
    %318 = vector.extract_strided_slice %25 {offsets = [0, 0], sizes = [2, 96], strides = [1, 1]} : vector<16x96xf32> to vector<2x96xf32>
    %319 = arith.truncf %302 : vector<2x32xf32> to vector<2x32xbf16>
    %cst_71 = arith.constant dense<0.000000e+00> : vector<2x96xf32>
    %320 = tpu.matmul %319, %45, %cst_71 {dimension_numbers = #tpu.dot_dimension_numbers<[1], [0], [0], [1], [0, 0, 1, 1], [], []>} : vector<2x32xbf16>, vector<32x96xbf16>, vector<2x96xf32> -> vector<2x96xf32>
    %321 = vector.broadcast %46 : vector<1x96xf32> to vector<2x96xf32>
    %322 = arith.addf %320, %321 : vector<2x96xf32>
    %323 = vector.extract_strided_slice %318 {offsets = [0, 0], sizes = [2, 32], strides = [1, 1]} : vector<2x96xf32> to vector<2x32xf32>
    %324 = vector.extract_strided_slice %322 {offsets = [0, 0], sizes = [2, 32], strides = [1, 1]} : vector<2x96xf32> to vector<2x32xf32>
    %325 = arith.addf %323, %324 : vector<2x32xf32>
    %326 = arith.negf %325 : vector<2x32xf32>
    %327 = math.exp %326 : vector<2x32xf32>
    %cst_72 = arith.constant 1.000000e+00 : f32
    %328 = vector.broadcast %cst_72 : f32 to vector<2x32xf32>
    %329 = arith.addf %328, %327 : vector<2x32xf32>
    %330 = arith.divf %328, %329 : vector<2x32xf32>
    %331 = vector.extract_strided_slice %318 {offsets = [0, 32], sizes = [2, 32], strides = [1, 1]} : vector<2x96xf32> to vector<2x32xf32>
    %332 = vector.extract_strided_slice %322 {offsets = [0, 32], sizes = [2, 32], strides = [1, 1]} : vector<2x96xf32> to vector<2x32xf32>
    %333 = arith.addf %331, %332 : vector<2x32xf32>
    %334 = arith.negf %333 : vector<2x32xf32>
    %335 = math.exp %334 : vector<2x32xf32>
    %cst_73 = arith.constant 1.000000e+00 : f32
    %336 = vector.broadcast %cst_73 : f32 to vector<2x32xf32>
    %337 = arith.addf %336, %335 : vector<2x32xf32>
    %338 = arith.divf %336, %337 : vector<2x32xf32>
    %339 = vector.extract_strided_slice %318 {offsets = [0, 64], sizes = [2, 32], strides = [1, 1]} : vector<2x96xf32> to vector<2x32xf32>
    %340 = vector.extract_strided_slice %322 {offsets = [0, 64], sizes = [2, 32], strides = [1, 1]} : vector<2x96xf32> to vector<2x32xf32>
    %341 = arith.mulf %330, %340 : vector<2x32xf32>
    %342 = arith.addf %339, %341 : vector<2x32xf32>
    %343 = math.tanh %342 : vector<2x32xf32>
    %cst_74 = arith.constant 1.000000e+00 : f32
    %344 = vector.broadcast %cst_74 : f32 to vector<2x32xf32>
    %345 = arith.subf %344, %338 : vector<2x32xf32>
    %346 = arith.mulf %345, %343 : vector<2x32xf32>
    %347 = arith.mulf %338, %302 : vector<2x32xf32>
    %348 = arith.addf %346, %347 : vector<2x32xf32>
    %c0_75 = arith.constant 0 : index
    %c0_76 = arith.constant 0 : index
    %349 = vector.load %arg21[%c0_75, %c0_76] : memref<16x32xf32, #tpu.memory_space<vmem>>, vector<2x32xf32>
    tpu.vector_store %arg21[%c0_75, %c0_76], %348 {strides = array<i32>} : memref<16x32xf32, #tpu.memory_space<vmem>>, vector<2x32xf32>,
    %350 = vector.extract_strided_slice %25 {offsets = [2, 0], sizes = [2, 96], strides = [1, 1]} : vector<16x96xf32> to vector<2x96xf32>
    %351 = arith.truncf %348 : vector<2x32xf32> to vector<2x32xbf16>
    %cst_77 = arith.constant dense<0.000000e+00> : vector<2x96xf32>
    %352 = tpu.matmul %351, %45, %cst_77 {dimension_numbers = #tpu.dot_dimension_numbers<[1], [0], [0], [1], [0, 0, 1, 1], [], []>} : vector<2x32xbf16>, vector<32x96xbf16>, vector<2x96xf32> -> vector<2x96xf32>
    %353 = vector.broadcast %46 : vector<1x96xf32> to vector<2x96xf32>
    %354 = arith.addf %352, %353 : vector<2x96xf32>
    %355 = vector.extract_strided_slice %350 {offsets = [0, 0], sizes = [2, 32], strides = [1, 1]} : vector<2x96xf32> to vector<2x32xf32>
    %356 = vector.extract_strided_slice %354 {offsets = [0, 0], sizes = [2, 32], strides = [1, 1]} : vector<2x96xf32> to vector<2x32xf32>
    %357 = arith.addf %355, %356 : vector<2x32xf32>
    %358 = arith.negf %357 : vector<2x32xf32>
    %359 = math.exp %358 : vector<2x32xf32>
    %cst_78 = arith.constant 1.000000e+00 : f32
    %360 = vector.broadcast %cst_78 : f32 to vector<2x32xf32>
    %361 = arith.addf %360, %359 : vector<2x32xf32>
    %362 = arith.divf %360, %361 : vector<2x32xf32>
    %363 = vector.extract_strided_slice %350 {offsets = [0, 32], sizes = [2, 32], strides = [1, 1]} : vector<2x96xf32> to vector<2x32xf32>
    %364 = vector.extract_strided_slice %354 {offsets = [0, 32], sizes = [2, 32], strides = [1, 1]} : vector<2x96xf32> to vector<2x32xf32>
    %365 = arith.addf %363, %364 : vector<2x32xf32>
    %366 = arith.negf %365 : vector<2x32xf32>
    %367 = math.exp %366 : vector<2x32xf32>
    %cst_79 = arith.constant 1.000000e+00 : f32
    %368 = vector.broadcast %cst_79 : f32 to vector<2x32xf32>
    %369 = arith.addf %368, %367 : vector<2x32xf32>
    %370 = arith.divf %368, %369 : vector<2x32xf32>
    %371 = vector.extract_strided_slice %350 {offsets = [0, 64], sizes = [2, 32], strides = [1, 1]} : vector<2x96xf32> to vector<2x32xf32>
    %372 = vector.extract_strided_slice %354 {offsets = [0, 64], sizes = [2, 32], strides = [1, 1]} : vector<2x96xf32> to vector<2x32xf32>
    %373 = arith.mulf %362, %372 : vector<2x32xf32>
    %374 = arith.addf %371, %373 : vector<2x32xf32>
    %375 = math.tanh %374 : vector<2x32xf32>
    %cst_80 = arith.constant 1.000000e+00 : f32
    %376 = vector.broadcast %cst_80 : f32 to vector<2x32xf32>
    %377 = arith.subf %376, %370 : vector<2x32xf32>
    %378 = arith.mulf %377, %375 : vector<2x32xf32>
    %379 = arith.mulf %370, %348 : vector<2x32xf32>
    %380 = arith.addf %378, %379 : vector<2x32xf32>
    %c2_81 = arith.constant 2 : index
    %c0_82 = arith.constant 0 : index
    %381 = vector.load %arg21[%c2_81, %c0_82] : memref<16x32xf32, #tpu.memory_space<vmem>>, vector<2x32xf32>
    tpu.vector_store %arg21[%c2_81, %c0_82], %380 {strides = array<i32>} : memref<16x32xf32, #tpu.memory_space<vmem>>, vector<2x32xf32>,
    %382 = vector.extract_strided_slice %25 {offsets = [4, 0], sizes = [2, 96], strides = [1, 1]} : vector<16x96xf32> to vector<2x96xf32>
    %383 = arith.truncf %380 : vector<2x32xf32> to vector<2x32xbf16>
    %cst_83 = arith.constant dense<0.000000e+00> : vector<2x96xf32>
    %384 = tpu.matmul %383, %45, %cst_83 {dimension_numbers = #tpu.dot_dimension_numbers<[1], [0], [0], [1], [0, 0, 1, 1], [], []>} : vector<2x32xbf16>, vector<32x96xbf16>, vector<2x96xf32> -> vector<2x96xf32>
    %385 = vector.broadcast %46 : vector<1x96xf32> to vector<2x96xf32>
    %386 = arith.addf %384, %385 : vector<2x96xf32>
    %387 = vector.extract_strided_slice %382 {offsets = [0, 0], sizes = [2, 32], strides = [1, 1]} : vector<2x96xf32> to vector<2x32xf32>
    %388 = vector.extract_strided_slice %386 {offsets = [0, 0], sizes = [2, 32], strides = [1, 1]} : vector<2x96xf32> to vector<2x32xf32>
    %389 = arith.addf %387, %388 : vector<2x32xf32>
    %390 = arith.negf %389 : vector<2x32xf32>
    %391 = math.exp %390 : vector<2x32xf32>
    %cst_84 = arith.constant 1.000000e+00 : f32
    %392 = vector.broadcast %cst_84 : f32 to vector<2x32xf32>
    %393 = arith.addf %392, %391 : vector<2x32xf32>
    %394 = arith.divf %392, %393 : vector<2x32xf32>
    %395 = vector.extract_strided_slice %382 {offsets = [0, 32], sizes = [2, 32], strides = [1, 1]} : vector<2x96xf32> to vector<2x32xf32>
    %396 = vector.extract_strided_slice %386 {offsets = [0, 32], sizes = [2, 32], strides = [1, 1]} : vector<2x96xf32> to vector<2x32xf32>
    %397 = arith.addf %395, %396 : vector<2x32xf32>
    %398 = arith.negf %397 : vector<2x32xf32>
    %399 = math.exp %398 : vector<2x32xf32>
    %cst_85 = arith.constant 1.000000e+00 : f32
    %400 = vector.broadcast %cst_85 : f32 to vector<2x32xf32>
    %401 = arith.addf %400, %399 : vector<2x32xf32>
    %402 = arith.divf %400, %401 : vector<2x32xf32>
    %403 = vector.extract_strided_slice %382 {offsets = [0, 64], sizes = [2, 32], strides = [1, 1]} : vector<2x96xf32> to vector<2x32xf32>
    %404 = vector.extract_strided_slice %386 {offsets = [0, 64], sizes = [2, 32], strides = [1, 1]} : vector<2x96xf32> to vector<2x32xf32>
    %405 = arith.mulf %394, %404 : vector<2x32xf32>
    %406 = arith.addf %403, %405 : vector<2x32xf32>
    %407 = math.tanh %406 : vector<2x32xf32>
    %cst_86 = arith.constant 1.000000e+00 : f32
    %408 = vector.broadcast %cst_86 : f32 to vector<2x32xf32>
    %409 = arith.subf %408, %402 : vector<2x32xf32>
    %410 = arith.mulf %409, %407 : vector<2x32xf32>
    %411 = arith.mulf %402, %380 : vector<2x32xf32>
    %412 = arith.addf %410, %411 : vector<2x32xf32>
    %c4_87 = arith.constant 4 : index
    %c0_88 = arith.constant 0 : index
    %413 = vector.load %arg21[%c4_87, %c0_88] : memref<16x32xf32, #tpu.memory_space<vmem>>, vector<2x32xf32>
    tpu.vector_store %arg21[%c4_87, %c0_88], %412 {strides = array<i32>} : memref<16x32xf32, #tpu.memory_space<vmem>>, vector<2x32xf32>,
    %414 = vector.extract_strided_slice %25 {offsets = [6, 0], sizes = [2, 96], strides = [1, 1]} : vector<16x96xf32> to vector<2x96xf32>
    %415 = arith.truncf %412 : vector<2x32xf32> to vector<2x32xbf16>
    %cst_89 = arith.constant dense<0.000000e+00> : vector<2x96xf32>
    %416 = tpu.matmul %415, %45, %cst_89 {dimension_numbers = #tpu.dot_dimension_numbers<[1], [0], [0], [1], [0, 0, 1, 1], [], []>} : vector<2x32xbf16>, vector<32x96xbf16>, vector<2x96xf32> -> vector<2x96xf32>
    %417 = vector.broadcast %46 : vector<1x96xf32> to vector<2x96xf32>
    %418 = arith.addf %416, %417 : vector<2x96xf32>
    %419 = vector.extract_strided_slice %414 {offsets = [0, 0], sizes = [2, 32], strides = [1, 1]} : vector<2x96xf32> to vector<2x32xf32>
    %420 = vector.extract_strided_slice %418 {offsets = [0, 0], sizes = [2, 32], strides = [1, 1]} : vector<2x96xf32> to vector<2x32xf32>
    %421 = arith.addf %419, %420 : vector<2x32xf32>
    %422 = arith.negf %421 : vector<2x32xf32>
    %423 = math.exp %422 : vector<2x32xf32>
    %cst_90 = arith.constant 1.000000e+00 : f32
    %424 = vector.broadcast %cst_90 : f32 to vector<2x32xf32>
    %425 = arith.addf %424, %423 : vector<2x32xf32>
    %426 = arith.divf %424, %425 : vector<2x32xf32>
    %427 = vector.extract_strided_slice %414 {offsets = [0, 32], sizes = [2, 32], strides = [1, 1]} : vector<2x96xf32> to vector<2x32xf32>
    %428 = vector.extract_strided_slice %418 {offsets = [0, 32], sizes = [2, 32], strides = [1, 1]} : vector<2x96xf32> to vector<2x32xf32>
    %429 = arith.addf %427, %428 : vector<2x32xf32>
    %430 = arith.negf %429 : vector<2x32xf32>
    %431 = math.exp %430 : vector<2x32xf32>
    %cst_91 = arith.constant 1.000000e+00 : f32
    %432 = vector.broadcast %cst_91 : f32 to vector<2x32xf32>
    %433 = arith.addf %432, %431 : vector<2x32xf32>
    %434 = arith.divf %432, %433 : vector<2x32xf32>
    %435 = vector.extract_strided_slice %414 {offsets = [0, 64], sizes = [2, 32], strides = [1, 1]} : vector<2x96xf32> to vector<2x32xf32>
    %436 = vector.extract_strided_slice %418 {offsets = [0, 64], sizes = [2, 32], strides = [1, 1]} : vector<2x96xf32> to vector<2x32xf32>
    %437 = arith.mulf %426, %436 : vector<2x32xf32>
    %438 = arith.addf %435, %437 : vector<2x32xf32>
    %439 = math.tanh %438 : vector<2x32xf32>
    %cst_92 = arith.constant 1.000000e+00 : f32
    %440 = vector.broadcast %cst_92 : f32 to vector<2x32xf32>
    %441 = arith.subf %440, %434 : vector<2x32xf32>
    %442 = arith.mulf %441, %439 : vector<2x32xf32>
    %443 = arith.mulf %434, %412 : vector<2x32xf32>
    %444 = arith.addf %442, %443 : vector<2x32xf32>
    %c6_93 = arith.constant 6 : index
    %c0_94 = arith.constant 0 : index
    %445 = vector.load %arg21[%c6_93, %c0_94] : memref<16x32xf32, #tpu.memory_space<vmem>>, vector<2x32xf32>
    tpu.vector_store %arg21[%c6_93, %c0_94], %444 {strides = array<i32>} : memref<16x32xf32, #tpu.memory_space<vmem>>, vector<2x32xf32>,
    %446 = vector.extract_strided_slice %25 {offsets = [8, 0], sizes = [2, 96], strides = [1, 1]} : vector<16x96xf32> to vector<2x96xf32>
    %447 = arith.truncf %444 : vector<2x32xf32> to vector<2x32xbf16>
    %cst_95 = arith.constant dense<0.000000e+00> : vector<2x96xf32>
    %448 = tpu.matmul %447, %45, %cst_95 {dimension_numbers = #tpu.dot_dimension_numbers<[1], [0], [0], [1], [0, 0, 1, 1], [], []>} : vector<2x32xbf16>, vector<32x96xbf16>, vector<2x96xf32> -> vector<2x96xf32>
    %449 = vector.broadcast %46 : vector<1x96xf32> to vector<2x96xf32>
    %450 = arith.addf %448, %449 : vector<2x96xf32>
    %451 = vector.extract_strided_slice %446 {offsets = [0, 0], sizes = [2, 32], strides = [1, 1]} : vector<2x96xf32> to vector<2x32xf32>
    %452 = vector.extract_strided_slice %450 {offsets = [0, 0], sizes = [2, 32], strides = [1, 1]} : vector<2x96xf32> to vector<2x32xf32>
    %453 = arith.addf %451, %452 : vector<2x32xf32>
    %454 = arith.negf %453 : vector<2x32xf32>
    %455 = math.exp %454 : vector<2x32xf32>
    %cst_96 = arith.constant 1.000000e+00 : f32
    %456 = vector.broadcast %cst_96 : f32 to vector<2x32xf32>
    %457 = arith.addf %456, %455 : vector<2x32xf32>
    %458 = arith.divf %456, %457 : vector<2x32xf32>
    %459 = vector.extract_strided_slice %446 {offsets = [0, 32], sizes = [2, 32], strides = [1, 1]} : vector<2x96xf32> to vector<2x32xf32>
    %460 = vector.extract_strided_slice %450 {offsets = [0, 32], sizes = [2, 32], strides = [1, 1]} : vector<2x96xf32> to vector<2x32xf32>
    %461 = arith.addf %459, %460 : vector<2x32xf32>
    %462 = arith.negf %461 : vector<2x32xf32>
    %463 = math.exp %462 : vector<2x32xf32>
    %cst_97 = arith.constant 1.000000e+00 : f32
    %464 = vector.broadcast %cst_97 : f32 to vector<2x32xf32>
    %465 = arith.addf %464, %463 : vector<2x32xf32>
    %466 = arith.divf %464, %465 : vector<2x32xf32>
    %467 = vector.extract_strided_slice %446 {offsets = [0, 64], sizes = [2, 32], strides = [1, 1]} : vector<2x96xf32> to vector<2x32xf32>
    %468 = vector.extract_strided_slice %450 {offsets = [0, 64], sizes = [2, 32], strides = [1, 1]} : vector<2x96xf32> to vector<2x32xf32>
    %469 = arith.mulf %458, %468 : vector<2x32xf32>
    %470 = arith.addf %467, %469 : vector<2x32xf32>
    %471 = math.tanh %470 : vector<2x32xf32>
    %cst_98 = arith.constant 1.000000e+00 : f32
    %472 = vector.broadcast %cst_98 : f32 to vector<2x32xf32>
    %473 = arith.subf %472, %466 : vector<2x32xf32>
    %474 = arith.mulf %473, %471 : vector<2x32xf32>
    %475 = arith.mulf %466, %444 : vector<2x32xf32>
    %476 = arith.addf %474, %475 : vector<2x32xf32>
    %c8_99 = arith.constant 8 : index
    %c0_100 = arith.constant 0 : index
    %477 = vector.load %arg21[%c8_99, %c0_100] : memref<16x32xf32, #tpu.memory_space<vmem>>, vector<2x32xf32>
    tpu.vector_store %arg21[%c8_99, %c0_100], %476 {strides = array<i32>} : memref<16x32xf32, #tpu.memory_space<vmem>>, vector<2x32xf32>,
    %478 = vector.extract_strided_slice %25 {offsets = [10, 0], sizes = [2, 96], strides = [1, 1]} : vector<16x96xf32> to vector<2x96xf32>
    %479 = arith.truncf %476 : vector<2x32xf32> to vector<2x32xbf16>
    %cst_101 = arith.constant dense<0.000000e+00> : vector<2x96xf32>
    %480 = tpu.matmul %479, %45, %cst_101 {dimension_numbers = #tpu.dot_dimension_numbers<[1], [0], [0], [1], [0, 0, 1, 1], [], []>} : vector<2x32xbf16>, vector<32x96xbf16>, vector<2x96xf32> -> vector<2x96xf32>
    %481 = vector.broadcast %46 : vector<1x96xf32> to vector<2x96xf32>
    %482 = arith.addf %480, %481 : vector<2x96xf32>
    %483 = vector.extract_strided_slice %478 {offsets = [0, 0], sizes = [2, 32], strides = [1, 1]} : vector<2x96xf32> to vector<2x32xf32>
    %484 = vector.extract_strided_slice %482 {offsets = [0, 0], sizes = [2, 32], strides = [1, 1]} : vector<2x96xf32> to vector<2x32xf32>
    %485 = arith.addf %483, %484 : vector<2x32xf32>
    %486 = arith.negf %485 : vector<2x32xf32>
    %487 = math.exp %486 : vector<2x32xf32>
    %cst_102 = arith.constant 1.000000e+00 : f32
    %488 = vector.broadcast %cst_102 : f32 to vector<2x32xf32>
    %489 = arith.addf %488, %487 : vector<2x32xf32>
    %490 = arith.divf %488, %489 : vector<2x32xf32>
    %491 = vector.extract_strided_slice %478 {offsets = [0, 32], sizes = [2, 32], strides = [1, 1]} : vector<2x96xf32> to vector<2x32xf32>
    %492 = vector.extract_strided_slice %482 {offsets = [0, 32], sizes = [2, 32], strides = [1, 1]} : vector<2x96xf32> to vector<2x32xf32>
    %493 = arith.addf %491, %492 : vector<2x32xf32>
    %494 = arith.negf %493 : vector<2x32xf32>
    %495 = math.exp %494 : vector<2x32xf32>
    %cst_103 = arith.constant 1.000000e+00 : f32
    %496 = vector.broadcast %cst_103 : f32 to vector<2x32xf32>
    %497 = arith.addf %496, %495 : vector<2x32xf32>
    %498 = arith.divf %496, %497 : vector<2x32xf32>
    %499 = vector.extract_strided_slice %478 {offsets = [0, 64], sizes = [2, 32], strides = [1, 1]} : vector<2x96xf32> to vector<2x32xf32>
    %500 = vector.extract_strided_slice %482 {offsets = [0, 64], sizes = [2, 32], strides = [1, 1]} : vector<2x96xf32> to vector<2x32xf32>
    %501 = arith.mulf %490, %500 : vector<2x32xf32>
    %502 = arith.addf %499, %501 : vector<2x32xf32>
    %503 = math.tanh %502 : vector<2x32xf32>
    %cst_104 = arith.constant 1.000000e+00 : f32
    %504 = vector.broadcast %cst_104 : f32 to vector<2x32xf32>
    %505 = arith.subf %504, %498 : vector<2x32xf32>
    %506 = arith.mulf %505, %503 : vector<2x32xf32>
    %507 = arith.mulf %498, %476 : vector<2x32xf32>
    %508 = arith.addf %506, %507 : vector<2x32xf32>
    %c10_105 = arith.constant 10 : index
    %c0_106 = arith.constant 0 : index
    %509 = vector.load %arg21[%c10_105, %c0_106] : memref<16x32xf32, #tpu.memory_space<vmem>>, vector<2x32xf32>
    tpu.vector_store %arg21[%c10_105, %c0_106], %508 {strides = array<i32>} : memref<16x32xf32, #tpu.memory_space<vmem>>, vector<2x32xf32>,
    %510 = vector.extract_strided_slice %25 {offsets = [12, 0], sizes = [2, 96], strides = [1, 1]} : vector<16x96xf32> to vector<2x96xf32>
    %511 = arith.truncf %508 : vector<2x32xf32> to vector<2x32xbf16>
    %cst_107 = arith.constant dense<0.000000e+00> : vector<2x96xf32>
    %512 = tpu.matmul %511, %45, %cst_107 {dimension_numbers = #tpu.dot_dimension_numbers<[1], [0], [0], [1], [0, 0, 1, 1], [], []>} : vector<2x32xbf16>, vector<32x96xbf16>, vector<2x96xf32> -> vector<2x96xf32>
    %513 = vector.broadcast %46 : vector<1x96xf32> to vector<2x96xf32>
    %514 = arith.addf %512, %513 : vector<2x96xf32>
    %515 = vector.extract_strided_slice %510 {offsets = [0, 0], sizes = [2, 32], strides = [1, 1]} : vector<2x96xf32> to vector<2x32xf32>
    %516 = vector.extract_strided_slice %514 {offsets = [0, 0], sizes = [2, 32], strides = [1, 1]} : vector<2x96xf32> to vector<2x32xf32>
    %517 = arith.addf %515, %516 : vector<2x32xf32>
    %518 = arith.negf %517 : vector<2x32xf32>
    %519 = math.exp %518 : vector<2x32xf32>
    %cst_108 = arith.constant 1.000000e+00 : f32
    %520 = vector.broadcast %cst_108 : f32 to vector<2x32xf32>
    %521 = arith.addf %520, %519 : vector<2x32xf32>
    %522 = arith.divf %520, %521 : vector<2x32xf32>
    %523 = vector.extract_strided_slice %510 {offsets = [0, 32], sizes = [2, 32], strides = [1, 1]} : vector<2x96xf32> to vector<2x32xf32>
    %524 = vector.extract_strided_slice %514 {offsets = [0, 32], sizes = [2, 32], strides = [1, 1]} : vector<2x96xf32> to vector<2x32xf32>
    %525 = arith.addf %523, %524 : vector<2x32xf32>
    %526 = arith.negf %525 : vector<2x32xf32>
    %527 = math.exp %526 : vector<2x32xf32>
    %cst_109 = arith.constant 1.000000e+00 : f32
    %528 = vector.broadcast %cst_109 : f32 to vector<2x32xf32>
    %529 = arith.addf %528, %527 : vector<2x32xf32>
    %530 = arith.divf %528, %529 : vector<2x32xf32>
    %531 = vector.extract_strided_slice %510 {offsets = [0, 64], sizes = [2, 32], strides = [1, 1]} : vector<2x96xf32> to vector<2x32xf32>
    %532 = vector.extract_strided_slice %514 {offsets = [0, 64], sizes = [2, 32], strides = [1, 1]} : vector<2x96xf32> to vector<2x32xf32>
    %533 = arith.mulf %522, %532 : vector<2x32xf32>
    %534 = arith.addf %531, %533 : vector<2x32xf32>
    %535 = math.tanh %534 : vector<2x32xf32>
    %cst_110 = arith.constant 1.000000e+00 : f32
    %536 = vector.broadcast %cst_110 : f32 to vector<2x32xf32>
    %537 = arith.subf %536, %530 : vector<2x32xf32>
    %538 = arith.mulf %537, %535 : vector<2x32xf32>
    %539 = arith.mulf %530, %508 : vector<2x32xf32>
    %540 = arith.addf %538, %539 : vector<2x32xf32>
    %c12_111 = arith.constant 12 : index
    %c0_112 = arith.constant 0 : index
    %541 = vector.load %arg21[%c12_111, %c0_112] : memref<16x32xf32, #tpu.memory_space<vmem>>, vector<2x32xf32>
    tpu.vector_store %arg21[%c12_111, %c0_112], %540 {strides = array<i32>} : memref<16x32xf32, #tpu.memory_space<vmem>>, vector<2x32xf32>,
    %542 = vector.extract_strided_slice %25 {offsets = [14, 0], sizes = [2, 96], strides = [1, 1]} : vector<16x96xf32> to vector<2x96xf32>
    %543 = arith.truncf %540 : vector<2x32xf32> to vector<2x32xbf16>
    %cst_113 = arith.constant dense<0.000000e+00> : vector<2x96xf32>
    %544 = tpu.matmul %543, %45, %cst_113 {dimension_numbers = #tpu.dot_dimension_numbers<[1], [0], [0], [1], [0, 0, 1, 1], [], []>} : vector<2x32xbf16>, vector<32x96xbf16>, vector<2x96xf32> -> vector<2x96xf32>
    %545 = vector.broadcast %46 : vector<1x96xf32> to vector<2x96xf32>
    %546 = arith.addf %544, %545 : vector<2x96xf32>
    %547 = vector.extract_strided_slice %542 {offsets = [0, 0], sizes = [2, 32], strides = [1, 1]} : vector<2x96xf32> to vector<2x32xf32>
    %548 = vector.extract_strided_slice %546 {offsets = [0, 0], sizes = [2, 32], strides = [1, 1]} : vector<2x96xf32> to vector<2x32xf32>
    %549 = arith.addf %547, %548 : vector<2x32xf32>
    %550 = arith.negf %549 : vector<2x32xf32>
    %551 = math.exp %550 : vector<2x32xf32>
    %cst_114 = arith.constant 1.000000e+00 : f32
    %552 = vector.broadcast %cst_114 : f32 to vector<2x32xf32>
    %553 = arith.addf %552, %551 : vector<2x32xf32>
    %554 = arith.divf %552, %553 : vector<2x32xf32>
    %555 = vector.extract_strided_slice %542 {offsets = [0, 32], sizes = [2, 32], strides = [1, 1]} : vector<2x96xf32> to vector<2x32xf32>
    %556 = vector.extract_strided_slice %546 {offsets = [0, 32], sizes = [2, 32], strides = [1, 1]} : vector<2x96xf32> to vector<2x32xf32>
    %557 = arith.addf %555, %556 : vector<2x32xf32>
    %558 = arith.negf %557 : vector<2x32xf32>
    %559 = math.exp %558 : vector<2x32xf32>
    %cst_115 = arith.constant 1.000000e+00 : f32
    %560 = vector.broadcast %cst_115 : f32 to vector<2x32xf32>
    %561 = arith.addf %560, %559 : vector<2x32xf32>
    %562 = arith.divf %560, %561 : vector<2x32xf32>
    %563 = vector.extract_strided_slice %542 {offsets = [0, 64], sizes = [2, 32], strides = [1, 1]} : vector<2x96xf32> to vector<2x32xf32>
    %564 = vector.extract_strided_slice %546 {offsets = [0, 64], sizes = [2, 32], strides = [1, 1]} : vector<2x96xf32> to vector<2x32xf32>
    %565 = arith.mulf %554, %564 : vector<2x32xf32>
    %566 = arith.addf %563, %565 : vector<2x32xf32>
    %567 = math.tanh %566 : vector<2x32xf32>
    %cst_116 = arith.constant 1.000000e+00 : f32
    %568 = vector.broadcast %cst_116 : f32 to vector<2x32xf32>
    %569 = arith.subf %568, %562 : vector<2x32xf32>
    %570 = arith.mulf %569, %567 : vector<2x32xf32>
    %571 = arith.mulf %562, %540 : vector<2x32xf32>
    %572 = arith.addf %570, %571 : vector<2x32xf32>
    %c14_117 = arith.constant 14 : index
    %c0_118 = arith.constant 0 : index
    %573 = vector.load %arg21[%c14_117, %c0_118] : memref<16x32xf32, #tpu.memory_space<vmem>>, vector<2x32xf32>
    tpu.vector_store %arg21[%c14_117, %c0_118], %572 {strides = array<i32>} : memref<16x32xf32, #tpu.memory_space<vmem>>, vector<2x32xf32>,
    %c0_119 = arith.constant 0 : index
    %c0_120 = arith.constant 0 : index
    %574 = vector.load %arg21[%c0_119, %c0_120] : memref<16x32xf32, #tpu.memory_space<vmem>>, vector<16x32xf32>
    %575 = arith.truncf %317 : vector<16x32xf32> to vector<16x32xbf16>
    %576 = arith.truncf %574 : vector<16x32xf32> to vector<16x32xbf16>
    %c0_121 = arith.constant 0 : index
    %c0_122 = arith.constant 0 : index
    %577 = vector.load %arg13[%c0_121, %c0_122] : memref<32x32xbf16, #tpu.memory_space<vmem>>, vector<32x32xbf16>
    %cst_123 = arith.constant dense<0.000000e+00> : vector<16x32xf32>
    %578 = tpu.matmul %575, %577, %cst_123 {dimension_numbers = #tpu.dot_dimension_numbers<[1], [0], [0], [1], [0, 0, 1, 1], [], []>} : vector<16x32xbf16>, vector<32x32xbf16>, vector<16x32xf32> -> vector<16x32xf32>
    %579 = arith.truncf %578 : vector<16x32xf32> to vector<16x32xbf16>
    %cst_124 = arith.constant dense<0.000000e+00> : vector<16x16xf32>
    %580 = tpu.matmul %576, %579, %cst_124 {dimension_numbers = #tpu.dot_dimension_numbers<[1], [1], [0], [0], [0, 0, 1, 0], [], []>} : vector<16x32xbf16>, vector<16x32xbf16>, vector<16x16xf32> -> vector<16x16xf32>
    %c0_125 = arith.constant 0 : index
    %c0_126 = arith.constant 0 : index
    %581 = vector.load %arg12[%c0_125, %c0_126] : memref<16x16xf32, #tpu.memory_space<vmem>>, vector<16x16xf32>
    %582 = arith.addf %580, %581 : vector<16x16xf32>
    %cst_127 = arith.constant dense<0xFF800000> : vector<16xf32>
    %583 = vector.multi_reduction <maximumf>, %582, %cst_127 [1] : vector<16x16xf32> to vector<16xf32>
    %584 = vector.shape_cast %583 : vector<16xf32> to vector<16x1xf32>
    %585 = vector.broadcast %584 : vector<16x1xf32> to vector<16x16xf32>
    %586 = arith.subf %582, %585 : vector<16x16xf32>
    %587 = math.exp %586 : vector<16x16xf32>
    %cst_128 = arith.constant dense<0.000000e+00> : vector<16xf32>
    %588 = vector.multi_reduction <add>, %587, %cst_128 [1] : vector<16x16xf32> to vector<16xf32>
    %589 = vector.shape_cast %588 : vector<16xf32> to vector<16x1xf32>
    %590 = vector.broadcast %589 : vector<16x1xf32> to vector<16x16xf32>
    %591 = arith.divf %587, %590 : vector<16x16xf32>
    %592 = arith.truncf %591 : vector<16x16xf32> to vector<16x16xbf16>
    %cst_129 = arith.constant dense<0.000000e+00> : vector<16x32xf32>
    %593 = tpu.matmul %592, %575, %cst_129 {dimension_numbers = #tpu.dot_dimension_numbers<[1], [0], [0], [1], [0, 0, 1, 1], [], []>} : vector<16x16xbf16>, vector<16x32xbf16>, vector<16x32xf32> -> vector<16x32xf32>
    %594 = arith.truncf %593 : vector<16x32xf32> to vector<16x32xbf16>
    %c0_130 = arith.constant 0 : index
    %c0_131 = arith.constant 0 : index
    %595 = vector.load %arg14[%c0_130, %c0_131] : memref<32x32xbf16, #tpu.memory_space<vmem>>, vector<32x32xbf16>
    %cst_132 = arith.constant dense<0.000000e+00> : vector<16x32xf32>
    %596 = tpu.matmul %594, %595, %cst_132 {dimension_numbers = #tpu.dot_dimension_numbers<[1], [0], [0], [1], [0, 0, 1, 1], [], []>} : vector<16x32xbf16>, vector<32x32xbf16>, vector<16x32xf32> -> vector<16x32xf32>
    %c0_133 = arith.constant 0 : index
    %c0_134 = arith.constant 0 : index
    %597 = vector.load %arg15[%c0_133, %c0_134] : memref<32x32xbf16, #tpu.memory_space<vmem>>, vector<32x32xbf16>
    %cst_135 = arith.constant dense<0.000000e+00> : vector<16x32xf32>
    %598 = tpu.matmul %576, %597, %cst_135 {dimension_numbers = #tpu.dot_dimension_numbers<[1], [0], [0], [1], [0, 0, 1, 1], [], []>} : vector<16x32xbf16>, vector<32x32xbf16>, vector<16x32xf32> -> vector<16x32xf32>
    %599 = arith.addf %596, %598 : vector<16x32xf32>
    %c0_136 = arith.constant 0 : index
    %c0_137 = arith.constant 0 : index
    %600 = vector.load %arg16[%c0_136, %c0_137] : memref<1x32xf32, #tpu.memory_space<vmem>>, vector<1x32xf32>
    %601 = vector.broadcast %600 : vector<1x32xf32> to vector<16x32xf32>
    %602 = arith.addf %599, %601 : vector<16x32xf32>
    %603 = arith.truncf %602 : vector<16x32xf32> to vector<16x32xbf16>
    %c0_138 = arith.constant 0 : index
    %c0_139 = arith.constant 0 : index
    %604 = vector.load %arg17[%c0_138, %c0_139] : memref<32x128xbf16, #tpu.memory_space<vmem>>, vector<32x128xbf16>
    %cst_140 = arith.constant dense<0.000000e+00> : vector<16x128xf32>
    %605 = tpu.matmul %603, %604, %cst_140 {dimension_numbers = #tpu.dot_dimension_numbers<[1], [0], [0], [1], [0, 0, 1, 1], [], []>} : vector<16x32xbf16>, vector<32x128xbf16>, vector<16x128xf32> -> vector<16x128xf32>
    %c0_141 = arith.constant 0 : index
    %c0_142 = arith.constant 0 : index
    %606 = vector.load %arg18[%c0_141, %c0_142] : memref<1x128xf32, #tpu.memory_space<vmem>>, vector<1x128xf32>
    %607 = vector.broadcast %606 : vector<1x128xf32> to vector<16x128xf32>
    %608 = arith.addf %605, %607 : vector<16x128xf32>
    %cst_143 = arith.constant dense<0xFF800000> : vector<16xf32>
    %609 = vector.multi_reduction <maximumf>, %608, %cst_143 [1] : vector<16x128xf32> to vector<16xf32>
    %610 = vector.shape_cast %609 : vector<16xf32> to vector<16x1xf32>
    %611 = vector.broadcast %610 : vector<16x1xf32> to vector<16x128xf32>
    %612 = arith.subf %608, %611 : vector<16x128xf32>
    %613 = math.exp %612 : vector<16x128xf32>
    %cst_144 = arith.constant dense<0.000000e+00> : vector<16xf32>
    %614 = vector.multi_reduction <add>, %613, %cst_144 [1] : vector<16x128xf32> to vector<16xf32>
    %615 = vector.shape_cast %614 : vector<16xf32> to vector<16x1xf32>
    %616 = math.log %615 : vector<16x1xf32>
    %617 = vector.broadcast %616 : vector<16x1xf32> to vector<16x128xf32>
    %618 = arith.subf %612, %617 : vector<16x128xf32>
    %cst_145 = arith.constant 0.000000e+00 : f32
    %619 = vector.broadcast %cst_145 : f32 to vector<16x128xf32>
    %620 = arith.subf %619, %618 : vector<16x128xf32>
    %c0_146 = arith.constant 0 : index
    %c0_147 = arith.constant 0 : index
    %621 = vector.load %arg19[%c0_146, %c0_147] : memref<16x128xf32, #tpu.memory_space<vmem>>, vector<16x128xf32>
    tpu.vector_store %arg19[%c0_146, %c0_147], %620 {strides = array<i32>} : memref<16x128xf32, #tpu.memory_space<vmem>>, vector<16x128xf32>,
    return
  }
  func.func @transform_0(%arg0: i32) -> (i32, i32) {
    %c0_i32 = arith.constant 0 : i32
    %c0_i32_0 = arith.constant 0 : i32
    %c0_i32_1 = arith.constant 0 : i32
    return %c0_i32, %c0_i32_0 : i32, i32
  }
  func.func @transform_1(%arg0: i32) -> (i32, i32) {
    %c0_i32 = arith.constant 0 : i32
    %c0_i32_0 = arith.constant 0 : i32
    %c0_i32_1 = arith.constant 0 : i32
    return %c0_i32, %c0_i32_0 : i32, i32
  }
  func.func @transform_2(%arg0: i32) -> (i32, i32) {
    %c0_i32 = arith.constant 0 : i32
    %c0_i32_0 = arith.constant 0 : i32
    %c0_i32_1 = arith.constant 0 : i32
    return %c0_i32, %c0_i32_0 : i32, i32
  }
  func.func @transform_3(%arg0: i32) -> (i32, i32) {
    %c0_i32 = arith.constant 0 : i32
    %c0_i32_0 = arith.constant 0 : i32
    %c0_i32_1 = arith.constant 0 : i32
    return %c0_i32, %c0_i32_0 : i32, i32
  }
  func.func @transform_4(%arg0: i32) -> (i32, i32) {
    %c0_i32 = arith.constant 0 : i32
    %c0_i32_0 = arith.constant 0 : i32
    %c0_i32_1 = arith.constant 0 : i32
    return %c0_i32, %c0_i32_0 : i32, i32
  }
  func.func @transform_5(%arg0: i32) -> (i32, i32) {
    %c0_i32 = arith.constant 0 : i32
    %c0_i32_0 = arith.constant 0 : i32
    %c0_i32_1 = arith.constant 0 : i32
    return %c0_i32, %c0_i32_0 : i32, i32
  }
  func.func @transform_6(%arg0: i32) -> (i32, i32) {
    %c0_i32 = arith.constant 0 : i32
    %c0_i32_0 = arith.constant 0 : i32
    %c0_i32_1 = arith.constant 0 : i32
    return %c0_i32, %c0_i32_0 : i32, i32
  }
  func.func @transform_7(%arg0: i32) -> (i32, i32) {
    %c0_i32 = arith.constant 0 : i32
    %c0_i32_0 = arith.constant 0 : i32
    %c0_i32_1 = arith.constant 0 : i32
    return %c0_i32, %c0_i32_0 : i32, i32
  }
  func.func @transform_8(%arg0: i32) -> (i32, i32) {
    %c0_i32 = arith.constant 0 : i32
    %c0_i32_0 = arith.constant 0 : i32
    %c0_i32_1 = arith.constant 0 : i32
    return %c0_i32, %c0_i32_0 : i32, i32
  }
  func.func @transform_9(%arg0: i32) -> (i32, i32) {
    %c0_i32 = arith.constant 0 : i32
    %c0_i32_0 = arith.constant 0 : i32
    %c0_i32_1 = arith.constant 0 : i32
    return %c0_i32, %c0_i32_0 : i32, i32
  }
  func.func @transform_10(%arg0: i32) -> (i32, i32) {
    %c0_i32 = arith.constant 0 : i32
    %c0_i32_0 = arith.constant 0 : i32
    %c0_i32_1 = arith.constant 0 : i32
    return %c0_i32, %c0_i32_0 : i32, i32
  }
  func.func @transform_11(%arg0: i32) -> (i32, i32) {
    %c0_i32 = arith.constant 0 : i32
    %c0_i32_0 = arith.constant 0 : i32
    %c0_i32_1 = arith.constant 0 : i32
    return %c0_i32, %c0_i32_0 : i32, i32
  }
  func.func @transform_12(%arg0: i32) -> (i32, i32) {
    %c0_i32 = arith.constant 0 : i32
    %c0_i32_0 = arith.constant 0 : i32
    %c0_i32_1 = arith.constant 0 : i32
    return %c0_i32, %c0_i32_0 : i32, i32
  }
  func.func @transform_13(%arg0: i32) -> (i32, i32) {
    %c0_i32 = arith.constant 0 : i32
    %c0_i32_0 = arith.constant 0 : i32
    %c0_i32_1 = arith.constant 0 : i32
    return %c0_i32, %c0_i32_0 : i32, i32
  }
  func.func @transform_14(%arg0: i32) -> (i32, i32) {
    %c0_i32 = arith.constant 0 : i32
    %c0_i32_0 = arith.constant 0 : i32
    %c0_i32_1 = arith.constant 0 : i32
    return %c0_i32, %c0_i32_0 : i32, i32
  }
  func.func @transform_15(%arg0: i32) -> (i32, i32) {
    %c0_i32 = arith.constant 0 : i32
    %c0_i32_0 = arith.constant 0 : i32
    %c0_i32_1 = arith.constant 0 : i32
    return %c0_i32, %c0_i32_0 : i32, i32
  }
  func.func @transform_16(%arg0: i32) -> (i32, i32) {
    %c0_i32 = arith.constant 0 : i32
    %c0_i32_0 = arith.constant 0 : i32
    %c0_i32_1 = arith.constant 0 : i32
    return %c0_i32, %c0_i32_0 : i32, i32
  }
  func.func @transform_17(%arg0: i32) -> (i32, i32) {
    %c0_i32 = arith.constant 0 : i32
    %c0_i32_0 = arith.constant 0 : i32
    %c0_i32_1 = arith.constant 0 : i32
    return %c0_i32, %c0_i32_0 : i32, i32
  }
  func.func @transform_18(%arg0: i32) -> (i32, i32) {
    %c0_i32 = arith.constant 0 : i32
    %c0_i32_0 = arith.constant 0 : i32
    %c0_i32_1 = arith.constant 0 : i32
    return %c0_i32, %c0_i32_0 : i32, i32
  }
}

</mosaic_0001>

<bundles_post_ra>
// kernel: seq2seq_forward.1
= control target key start
LH: loop header
LB: loop body
LE: loop exit
PB: predicated region body
PF: predicated region fallthrough
CT: control target
= control target key end

     0   :  { %s3672_s0 = inlined_call_operand.vmem [shape: s32[16,1], index: 0, kind: input, shape index: {}]   ;;  %s3673_s1 = inlined_call_operand.vmem [shape: s32[16,1], index: 1, kind: input, shape index: {}]   ;;  %s3674_s2 = inlined_call_operand.vmem [shape: bf16[64,96], index: 2, kind: input, shape index: {}]   ;;  %s3675_s3 = inlined_call_operand.hbm [shape: f32[1,96], index: 3, kind: input, shape index: {}]   ;;  %s3676_s4 = inlined_call_operand.vmem [shape: bf16[32,96], index: 4, kind: input, shape index: {}]   ;;  %s3677_s5 = inlined_call_operand.hbm [shape: f32[1,96], index: 5, kind: input, shape index: {}]   ;;  %s3678_s6 = inlined_call_operand.vmem [shape: bf16[64,96], index: 6, kind: input, shape index: {}]   ;;  %s3679_s7 = inlined_call_operand.hbm [shape: f32[1,96], index: 7, kind: input, shape index: {}]   ;;  %s3680_s8 = inlined_call_operand.vmem [shape: bf16[32,96], index: 8, kind: input, shape index: {}]   ;;  %s3681_s9 = inlined_call_operand.hbm [shape: f32[1,96], index: 9, kind: input, shape index: {}]   ;;  %s3682_s10 = inlined_call_operand.hbm [shape: f32[1,96], index: 10, kind: input, shape index: {}]   ;;  %s3683_s11 = inlined_call_operand.vmem [shape: f32[16,16], index: 11, kind: input, shape index: {}]   ;;  %s3684_s12 = inlined_call_operand.vmem [shape: bf16[32,32], index: 12, kind: input, shape index: {}]   ;;  %s3685_s13 = inlined_call_operand.hbm [shape: bf16[32,32], index: 13, kind: input, shape index: {}]   ;;  %s3686_s14 = inlined_call_operand.hbm [shape: bf16[32,32], index: 14, kind: input, shape index: {}]   ;;  %s3687_s15 = inlined_call_operand.hbm [shape: f32[1,32], index: 15, kind: input, shape index: {}]   ;;  %s3688_s16 = inlined_call_operand.hbm [shape: bf16[32,128], index: 16, kind: input, shape index: {}]   ;;  %s3689_s17 = inlined_call_operand.hbm [shape: f32[1,128], index: 17, kind: input, shape index: {}]   ;;  %s3690_s18 = inlined_call_operand.vmem [shape: f32[16,128], index: 18, kind: output, shape index: {}]  }
   0x1   :  { %3694 = sst [smem:[#allocation26_spill]] %s3672_s0 }
   0x2   :  { %3695 = sst [smem:[#allocation27_spill]] %s3673_s1 }
   0x3   :  { %3696 = sst [smem:[#allocation28_spill]] %s3674_s2 }
   0x4   :  { %23 = vsyncpa [#allocation5], 0 }
   0x5   :  { %24 = vsyncpa [#allocation7], 0 }
   0x6   :  { %25 = vsyncpa [#allocation10], 0 }
   0x7   :  { %26 = vsyncpa [#allocation13], 0 }
   0x8   :  { %27 = vsyncpa [#allocation16], 0 }
   0x9   :  { %28 = vsyncpa [#allocation19], 0  ;;  %s2925_s27 = smov [#allocation6]   ;;  %s2926_s29 = smov [#allocation9]  }
   0xa   :  { %s53_s28 = sshll.u32 %s2925_s27, 4  ;;  %s77_s30 = sshll.u32 %s2926_s29, 4  ;;  %s54_s28 = int_to_ptr.vmem [resolvable:$true] %s53_s28  ;;  %s78_s30 = int_to_ptr.vmem [resolvable:$true] %s77_s30 }
   0xb   :  { %s2693_s1 = scalar_lea.hbm %s3677_s5, 16 }
   0xc   :  { %p2694_p0 = scmp.ne.s32.totalorder %s3677_s5, %s2693_s1  ;;  %p2697_p1 = scmp.lt.u32.totalorder %s2693_s1, %s3677_s5 }
   0xe   :  { %p2699_p2 = pnand %p2697_p1, %p2694_p0 }
  0x10   :  { %2702 = shalt.err (!%p2699_p2)
}
  0x11   :  { %s2703_s23 = scalar_lea.vmem %s54_s28, 16  ;;  %s2707_s24 = scalar_lea.vmem %s54_s28, 32 }
  0x12   :  { %p2704_p3 = scmp.ne.s32.totalorder %s54_s28, %s2703_s23  ;;  %p2708_p4 = scmp.lt.s32.totalorder %s54_s28, %s54_s28 }
  0x13   :  { %p2709_p5 = scmp.lt.s32.totalorder %s2707_s24, %s2703_s23 }
  0x15   :  { %p2710_p6 = por %p2709_p5, %p2708_p4 }
  0x17   :  { %p2711_p7 = pnand %p2710_p6, %p2704_p3 }
  0x19   :  { %2714 = shalt.err (!%p2711_p7)
}
  0x1a   :  { %56 = dma.hbm_to_vmem [thread:$0]  %s3677_s5, 16, %s54_s28, [#allocation7]  }
  0x1b   :  { %s2715_s0 = scalar_lea.hbm %s3681_s9, 16 }
  0x1c   :  { %p2716_p8 = scmp.ne.s32.totalorder %s3681_s9, %s2715_s0  ;;  %p2719_p9 = scmp.lt.u32.totalorder %s2715_s0, %s3681_s9 }
  0x1e   :  { %p2721_p10 = pnand %p2719_p9, %p2716_p8 }
  0x20   :  { %2724 = shalt.err (!%p2721_p10)
}
  0x21   :  { %s2725_s22 = scalar_lea.vmem %s78_s30, 16  ;;  %s2729_s2 = scalar_lea.vmem %s78_s30, 32 }
  0x22   :  { %p2726_p11 = scmp.ne.s32.totalorder %s78_s30, %s2725_s22  ;;  %p2730_p12 = scmp.lt.s32.totalorder %s78_s30, %s78_s30 }
  0x23   :  { %p2731_p13 = scmp.lt.s32.totalorder %s2729_s2, %s2725_s22 }
  0x25   :  { %p2732_p0 = por %p2731_p13, %p2730_p12 }
  0x27   :  { %p2733_p1 = pnand %p2732_p0, %p2726_p11 }
  0x29   :  { %2736 = shalt.err (!%p2733_p1)
}
  0x2a   :  { %80 = dma.hbm_to_vmem [thread:$0]  %s3681_s9, 16, %s78_s30, [#allocation10]  }
  0x2b   :  { %s2927_s23 = smov [#allocation12]   ;;  %s2737_s27 = scalar_lea.hbm %s3685_s13, 256 }
  0x2c   :  { %s100_s24 = sshll.u32 %s2927_s23, 4  ;;  %p2738_p2 = scmp.ne.s32.totalorder %s3685_s13, %s2737_s27  ;;  %s101_s24 = int_to_ptr.vmem [resolvable:$true] %s100_s24 }
  0x2d   :  { %p2741_p3 = scmp.lt.u32.totalorder %s2737_s27, %s3685_s13 }
  0x2f   :  { %p2743_p4 = pnand %p2741_p3, %p2738_p2 }
  0x31   :  { %2746 = shalt.err (!%p2743_p4)
}
  0x32   :  { %s2747_s20 = scalar_lea.vmem %s101_s24, 256  ;;  %p2752_p6 = scmp.lt.s32.totalorder %s101_s24, %s101_s24 }
  0x33   :  { %p2748_p5 = scmp.ne.s32.totalorder %s101_s24, %s2747_s20  ;;  %p2753_p7 = scmp.lt.s32.totalorder %s2747_s20, %s2747_s20 }
  0x35   :  { %p2754_p8 = por %p2753_p7, %p2752_p6 }
  0x37   :  { %p2755_p9 = pnand %p2754_p8, %p2748_p5 }
  0x39   :  { %2758 = shalt.err (!%p2755_p9)
}
  0x3a   :  { %s2928_s9 = smov 64   ;;  %s2929_s30 = smov 4  }
  0x3b   :  { %106 = dma.hbm_to_vmem [thread:$0]  %s3685_s13, 256, %s101_s24, [#allocation13], %s2928_s9, %s2928_s9, %s2929_s30  }
  0x3c   :  { %s2930_s2 = smov [#allocation15]   ;;  %s2931_s28 = smov [#allocation4]  }
  0x3d   :  { %s125_s5 = sshll.u32 %s2930_s2, 4  ;;  %s41_s23 = sshll.u32 %s2931_s28, 4  ;;  %s126_s5 = int_to_ptr.vmem [resolvable:$true] %s125_s5  ;;  %s42_s23 = int_to_ptr.vmem [resolvable:$true] %s41_s23 }
  0x3e   :  { %s2759_s27 = scalar_lea.hbm %s3687_s15, 16 }
  0x3f   :  { %p2760_p10 = scmp.ne.s32.totalorder %s3687_s15, %s2759_s27  ;;  %p2763_p11 = scmp.lt.u32.totalorder %s2759_s27, %s3687_s15 }
  0x41   :  { %p2765_p12 = pnand %p2763_p11, %p2760_p10 }
  0x43   :  { %2768 = shalt.err (!%p2765_p12)
}
  0x44   :  { %s2769_s13 = scalar_lea.vmem %s126_s5, 16  ;;  %s2773_s24 = scalar_lea.vmem %s126_s5, 32 }
  0x45   :  { %p2770_p13 = scmp.ne.s32.totalorder %s126_s5, %s2769_s13  ;;  %p2774_p0 = scmp.lt.s32.totalorder %s126_s5, %s126_s5 }
  0x46   :  { %p2775_p1 = scmp.lt.s32.totalorder %s2773_s24, %s2769_s13 }
  0x48   :  { %p2776_p2 = por %p2775_p1, %p2774_p0 }
  0x4a   :  { %p2777_p3 = pnand %p2776_p2, %p2770_p13 }
  0x4c   :  { %2780 = shalt.err (!%p2777_p3)
}
  0x4d   :  { %128 = dma.hbm_to_vmem [thread:$0]  %s3687_s15, 16, %s126_s5, [#allocation16]  }
  0x4e   :  { %s2781_s28 = scalar_lea.hbm %s3675_s3, 16 }
  0x4f   :  { %p2782_p4 = scmp.ne.s32.totalorder %s3675_s3, %s2781_s28  ;;  %p2785_p5 = scmp.lt.u32.totalorder %s2781_s28, %s3675_s3 }
  0x51   :  { %p2787_p6 = pnand %p2785_p5, %p2782_p4 }
  0x53   :  { %2790 = shalt.err (!%p2787_p6)
}
  0x54   :  { %s2791_s0 = scalar_lea.vmem %s42_s23, 16  ;;  %s2795_s19 = scalar_lea.vmem %s42_s23, 32 }
  0x55   :  { %p2792_p7 = scmp.ne.s32.totalorder %s42_s23, %s2791_s0  ;;  %p2796_p8 = scmp.lt.s32.totalorder %s42_s23, %s42_s23 }
  0x56   :  { %p2797_p9 = scmp.lt.s32.totalorder %s2795_s19, %s2791_s0 }
  0x58   :  { %p2798_p10 = por %p2797_p9, %p2796_p8 }
  0x5a   :  { %p2799_p11 = pnand %p2798_p10, %p2792_p7 }
  0x5c   :  { %2802 = shalt.err (!%p2799_p11)
}
  0x5d   :  { %44 = dma.hbm_to_vmem [thread:$0]  %s3675_s3, 16, %s42_s23, [#allocation5]  }
  0x5e   :  { %s2932_s1 = smov [#allocation8]   ;;  %s2933_s24 = smov [#allocation11]  }
  0x5f   :  { %s65_s13 = sshll.u32 %s2932_s1, 4  ;;  %s87_s20 = sshll.u32 %s2933_s24, 4  ;;  %s66_s13 = int_to_ptr.vmem [resolvable:$true] %s65_s13  ;;  %s88_s20 = int_to_ptr.vmem [resolvable:$true] %s87_s20 }
  0x60   :  { %s2803_s2 = scalar_lea.hbm %s3679_s7, 16 }
  0x61   :  { %p2804_p12 = scmp.ne.s32.totalorder %s3679_s7, %s2803_s2  ;;  %p2807_p13 = scmp.lt.u32.totalorder %s2803_s2, %s3679_s7 }
  0x63   :  { %p2809_p0 = pnand %p2807_p13, %p2804_p12 }
  0x65   :  { %2812 = shalt.err (!%p2809_p0)
}
  0x66   :  { %s2813_s3 = scalar_lea.vmem %s66_s13, 16  ;;  %s2817_s23 = scalar_lea.vmem %s66_s13, 32 }
  0x67   :  { %p2814_p1 = scmp.ne.s32.totalorder %s66_s13, %s2813_s3  ;;  %p2818_p2 = scmp.lt.s32.totalorder %s66_s13, %s66_s13 }
  0x68   :  { %p2819_p3 = scmp.lt.s32.totalorder %s2817_s23, %s2813_s3 }
  0x6a   :  { %p2820_p4 = por %p2819_p3, %p2818_p2 }
  0x6c   :  { %p2821_p5 = pnand %p2820_p4, %p2814_p1 }
  0x6e   :  { %2824 = shalt.err (!%p2821_p5)
}
  0x6f   :  { %68 = dma.hbm_to_vmem [thread:$0]  %s3679_s7, 16, %s66_s13, [#allocation7]  }
  0x70   :  { %s2825_s5 = scalar_lea.hbm %s3682_s10, 16 }
  0x71   :  { %p2826_p6 = scmp.ne.s32.totalorder %s3682_s10, %s2825_s5  ;;  %p2829_p7 = scmp.lt.u32.totalorder %s2825_s5, %s3682_s10 }
  0x73   :  { %p2831_p8 = pnand %p2829_p7, %p2826_p6 }
  0x75   :  { %2834 = shalt.err (!%p2831_p8)
}
  0x76   :  { %s2835_s2 = scalar_lea.vmem %s88_s20, 16  ;;  %s2839_s28 = scalar_lea.vmem %s88_s20, 32 }
  0x77   :  { %p2836_p9 = scmp.ne.s32.totalorder %s88_s20, %s2835_s2  ;;  %p2840_p10 = scmp.lt.s32.totalorder %s88_s20, %s88_s20 }
  0x78   :  { %p2841_p11 = scmp.lt.s32.totalorder %s2839_s28, %s2835_s2 }
  0x7a   :  { %p2842_p12 = por %p2841_p11, %p2840_p10 }
  0x7c   :  { %p2843_p13 = pnand %p2842_p12, %p2836_p9 }
  0x7e   :  { %2846 = shalt.err (!%p2843_p13)
}
  0x7f   :  { %90 = dma.hbm_to_vmem [thread:$0]  %s3682_s10, 16, %s88_s20, [#allocation10]  }
  0x80   :  { %s2934_s25 = smov [#allocation14]   ;;  %s2935_s27 = smov [#allocation17]  }
  0x81   :  { %s112_s26 = sshll.u32 %s2934_s25, 4  ;;  %s134_s3 = sshll.u32 %s2935_s27, 4  ;;  %s113_s26 = int_to_ptr.vmem [resolvable:$true] %s112_s26  ;;  %s135_s3 = int_to_ptr.vmem [resolvable:$true] %s134_s3 }
  0x82   :  { %s2847_s0 = scalar_lea.hbm %s3686_s14, 256 }
  0x83   :  { %p2848_p0 = scmp.ne.s32.totalorder %s3686_s14, %s2847_s0  ;;  %p2851_p1 = scmp.lt.u32.totalorder %s2847_s0, %s3686_s14 }
  0x85   :  { %p2853_p2 = pnand %p2851_p1, %p2848_p0 }
  0x87   :  { %2856 = shalt.err (!%p2853_p2)
}
  0x88   :  { %s2857_s10 = scalar_lea.vmem %s113_s26, 256  ;;  %p2862_p4 = scmp.lt.s32.totalorder %s113_s26, %s113_s26 }
  0x89   :  { %p2858_p3 = scmp.ne.s32.totalorder %s113_s26, %s2857_s10  ;;  %p2863_p5 = scmp.lt.s32.totalorder %s2857_s10, %s2857_s10 }
  0x8b   :  { %p2864_p6 = por %p2863_p5, %p2862_p4 }
  0x8d   :  { %p2865_p7 = pnand %p2864_p6, %p2858_p3 }
  0x8f   :  { %2868 = shalt.err (!%p2865_p7)
}
  0x90   :  { %118 = dma.hbm_to_vmem [thread:$0]  %s3686_s14, 256, %s113_s26, [#allocation13], %s2928_s9, %s2928_s9, %s2929_s30  }
  0x91   :  { %s2869_s2 = scalar_lea.hbm %s3688_s16, 256 }
  0x92   :  { %p2870_p8 = scmp.ne.s32.totalorder %s3688_s16, %s2869_s2  ;;  %p2873_p9 = scmp.lt.u32.totalorder %s2869_s2, %s3688_s16 }
  0x94   :  { %p2875_p10 = pnand %p2873_p9, %p2870_p8 }
  0x96   :  { %2878 = shalt.err (!%p2875_p10)
}
  0x97   :  { %s2879_s27 = scalar_lea.vmem %s135_s3, 256  ;;  %p2884_p12 = scmp.lt.s32.totalorder %s135_s3, %s135_s3 }
  0x98   :  { %p2880_p11 = scmp.ne.s32.totalorder %s135_s3, %s2879_s27  ;;  %p2885_p13 = scmp.lt.s32.totalorder %s2879_s27, %s2879_s27 }
  0x9a   :  { %p2886_p0 = por %p2885_p13, %p2884_p12 }
  0x9c   :  { %p2887_p1 = pnand %p2886_p0, %p2880_p11 }
  0x9e   :  { %2890 = shalt.err (!%p2887_p1)
}
  0x9f   :  { %140 = dma.hbm_to_vmem [thread:$0]  %s3688_s16, 256, %s135_s3, [#allocation16], %s2928_s9, %s2928_s9, %s2929_s30  }
  0xa0   :  { %s2936_s23 = smov [#allocation18]   ;;  %s2891_s15 = scalar_lea.hbm %s3689_s17, 16 }
  0xa1   :  { %s147_s29 = sshll.u32 %s2936_s23, 4  ;;  %p2892_p2 = scmp.ne.s32.totalorder %s3689_s17, %s2891_s15  ;;  %s148_s29 = int_to_ptr.vmem [resolvable:$true] %s147_s29 }
  0xa2   :  { %p2895_p3 = scmp.lt.u32.totalorder %s2891_s15, %s3689_s17 }
  0xa4   :  { %p2897_p4 = pnand %p2895_p3, %p2892_p2 }
  0xa6   :  { %2900 = shalt.err (!%p2897_p4)
}
  0xa7   :  { %s2901_s24 = scalar_lea.vmem %s148_s29, 16  ;;  %s2905_s16 = scalar_lea.vmem %s148_s29, 32 }
  0xa8   :  { %p2902_p5 = scmp.ne.s32.totalorder %s148_s29, %s2901_s24  ;;  %p2906_p6 = scmp.lt.s32.totalorder %s148_s29, %s148_s29 }
  0xa9   :  { %p2907_p7 = scmp.lt.s32.totalorder %s2905_s16, %s2901_s24 }
  0xab   :  { %p2908_p8 = por %p2907_p7, %p2906_p6 }
  0xad   :  { %p2909_p9 = pnand %p2908_p8, %p2902_p5 }
  0xaf   :  { %2912 = shalt.err (!%p2909_p9)
}
  0xb0   :  { %150 = dma.hbm_to_vmem [thread:$0]  %s3689_s17, 16, %s148_s29, [#allocation19]  }
  0xb1   :  { %2913 = dma.done.wait [#allocation5], 16  }
  0xb2   :  { %2914 = vsyncadd [#allocation5], 4294967280 }
  0xb3   :  { %2915 = dma.done.wait [#allocation7], 32  }
  0xb4   :  { %2916 = vsyncadd [#allocation7], 4294967264 }
  0xb5   :  { %2917 = dma.done.wait [#allocation10], 32  }
  0xb6   :  { %2918 = vsyncadd [#allocation10], 4294967264 }
  0xb7   :  { %2919 = dma.done.wait [#allocation13], 512  }
  0xb8   :  { %2920 = vsyncadd [#allocation13], 4294966784 }
  0xb9   :  { %2921 = dma.done.wait [#allocation16], 272  }
  0xba   :  { %2922 = vsyncadd [#allocation16], 4294967024 }
  0xbb   :  { %2923 = dma.done.wait [#allocation19], 16  }
  0xbc   :  { %2924 = vsyncadd [#allocation19], 4294967280  ;;  %v2937_v0 = vmov 0   ;;  %v2938_v1 = vmov 0.0   ;;  %s3697_s22 = sld [smem:[#allocation26_spill]]  ;;  %s3698_s7 = sld [smem:[#allocation28_spill]]  ;;  %v184_v8 = vlaneseq }
  0xbd   :  { %2559 = vset.pattern.permute.xlu0 %v2937_v0  ;;  %2347 = vmatprep.subr.bf16.mxu0 %v2938_v1  ;;  %vm2939_vm0 = vmmov 0   ;;  %vm236_vm3 = vcmask 523264   ;;  %v3202_v14 = vld [vmem:[%s3676_s4] sm:$0xff]   ;;  %v3209_v16 = vld [vmem:[%s3676_s4 + $0x8] sm:$0xff]   ;;  %vm387_vm4 = vcmask 1041408   ;;  %vm389_vm5 = vcmask 1043456  }
  0xbe   :  { %2560 = vset.pattern.permute.xlu1 %v2937_v0  ;;  %2359 = vmatprep.subr.bf16.mxu1 %v2938_v1  ;;  %v3193_v9 = vand.u32 127, %v184_v8  ;;  %v399_v17 = vshrl.u32 %v184_v8, 7  ;;  %v2208_v18 = vld [vmem:[#allocation4] ss:$0 sm:$0xff]  ;;  %v396_v20 = vld [vmem:[#allocation11] sm:$0x1] }
  0xbf   :  { %2355 = vmatprep.mubr.msk.bf16.mxu0 %vm2939_vm0, %v2938_v1  ;;  %2367 = vmatprep.mubr.msk.bf16.mxu1 %vm2939_vm0, %v2938_v1  ;;  %v405_v22 = vsub.f32 1.0, %v396_v20  ;;  %vm391_vm6 = vcmask 1045504   ;;  %v3224_v37 = vld [vmem:[#allocation6] ss:$0 sm:$0xff]  ;;  %s3699_s20 = sld [smem:[#allocation27_spill]]  ;;  %v2568_v63 = vld [vmem:[%s3678_s6 + $0x8] sm:$0xff]  }
  0xc0   :  { %v400_v19 = vsub.s32 0, %v399_v17  ;;  %v2567_v62 = vld [vmem:[%s3678_s6] sm:$0xff]   ;;  %vm444_vm9 = vcmask 261120   ;;  %vm518_vm10 = vcmask 254976   ;;  %vm685_vm11 = vcmask 259076  }
  0xc1   :  { %2360 = vmatpush3.bf16.msra.mxu1 %v2567_v62  ;;  %vm601_vm12 = vcmask 257026   ;;  %vm769_vm13 = vcmask 261126   ;;  %vm1118_vm14 = vcmp.lt.s32.totalorder %v3193_v9, 16  ;;  %vm1911_vm15 = vcmask 130048  }
  0xc2   :  { %v182_v2 = vld [vmem:[%s3697_s22] sm:$0xff]  ;;  %v183_v4 = vld [vmem:[%s3697_s22 + $0x8] sm:$0xff]  ;;  %v2563_v6 = vld [vmem:[%s3698_s7 + $0x10] sm:$0xff]   ;;  %v401_v25 = vrot.slane %v396_v20, %v400_v19  ;;  %v410_v31 = vrot.slane %v405_v22, %v400_v19  ;;  %2361 = vmatprep.subr.bf16.mxu1 %v2938_v1  ;;  %s2940_s22 = smov 96  }
  0xc3   :  { %187 = vperm.xlu0 %2559, %v182_v2   ;;  %v2561_v3 = vld [vmem:[%s3698_s7] sm:$0xff]   ;;  %v2562_v5 = vld [vmem:[%s3698_s7 + $0x8] sm:$0xff]   ;;  %v2564_v7 = vld [vmem:[%s3698_s7 + $0x18] sm:$0xff]  }
  0xc4   :  { %2348 = vmatpush3.bf16.msra.mxu0 %v2561_v3  ;;  %v3287_v22 = vld [vmem:[#allocation8] ss:$0 sm:$0xff] }
  0xc5   :  { %2349 = vmatprep.subr.bf16.mxu0 %v2938_v1  ;;  %v281_v59 = vld [vmem:[%s3699_s20] sm:$0xff]  ;;  %2362 = vmatpush3.bf16.msra.mxu1 %v2568_v63  ;;  %v282_v3 = vld [vmem:[%s3699_s20 + $0x8] sm:$0xff] }
  0xc6   :  { %2363 = vmatprep.subr.bf16.mxu1 %v2938_v1 }
  0xc7   :  { %190 = vperm.xlu0 %2559, %v183_v4   ;;  %v2570_v4 = vld [vmem:[%s3678_s6 + $0x18] sm:$0xff]  }
  0xc8   :  { %2350 = vmatpush3.bf16.msra.mxu0 %v2562_v5 }
  0xc9   :  { %2351 = vmatprep.subr.bf16.mxu0 %v2938_v1 }
  0xcc   :  { %2352 = vmatpush3.bf16.msra.mxu0 %v2563_v6 }
  0xcd   :  { %2353 = vmatprep.subr.bf16.mxu0 %v2938_v1 }
  0xd0   :  { %2354 = vmatpush3.bf16.msra.mxu0 %v2564_v7 }
  0xd1   :  { %2371 = vmatprep.subr.bf16.mxu0 %v2938_v1 }
 0x142   :  { %v188_v10 = vpop.permute.xlu0 %187 }
 0x143   :  { %vm192_vm1 = vcmp.eq.s32.totalorder %v188_v10, %v3193_v9 }
 0x144   :  { %v194_v12 = vsel %vm192_vm1, 1.0, %v2938_v1 }
 0x146   :  { %v191_v11 = vpop.permute.xlu0 %190 }
 0x147   :  { %vm193_vm2 = vcmp.eq.s32.totalorder %v191_v11, %v3193_v9 }
 0x148   :  { %v195_v13 = vsel %vm193_vm2, 1.0, %v2938_v1 }
 0x149   :  { %v196_v15 = vpack.c.bf16 %v195_v13, %v194_v12 }
 0x14b   :  { %2356 = vmatmul.mubr.msk.bf16.vlgmr.msra.gmra.mrb[0].mxu0 %vm236_vm3, %v196_v15 }
 0x14c   :  { %2372 = vmatpush3.bf16.msra.mxu0 %v3202_v14  ;;  %2375 = vmatprep.mubr.msk.bf16.mxu0 %vm2939_vm0, %v2938_v1 }
 0x14d   :  { %2373 = vmatprep.subr.bf16.mxu0 %v2938_v1 }
 0x150   :  { %2374 = vmatpush3.bf16.msra.mxu0 %v3209_v16 }
 0x151   :  { %2387 = vmatprep.subr.bf16.mxu0 %v2938_v1 }
 0x153   :  { %2376 = vmatmul.mubr.bf16.vlgmr.msra.gmra.mrb[4].mxu0 %v2937_v0  ;;  %v2569_v0 = vld [vmem:[%s3678_s6 + $0x10] sm:$0xff]  }
 0x154   :  { %2388 = vmatpush3.bf16.msra.mxu0 %v3202_v14  ;;  %2391 = vmatprep.mubr.msk.bf16.mxu0 %vm2939_vm0, %v2938_v1 }
 0x155   :  { %2389 = vmatprep.subr.bf16.mxu0 %v2938_v1  ;;  %2364 = vmatpush3.bf16.msra.mxu1 %v2569_v0 }
 0x156   :  { %2365 = vmatprep.subr.bf16.mxu1 %v2938_v1 }
 0x158   :  { %2390 = vmatpush3.bf16.msra.mxu0 %v3209_v16 }
 0x159   :  { %2403 = vmatprep.subr.bf16.mxu0 %v2938_v1  ;;  %2366 = vmatpush3.bf16.msra.mxu1 %v2570_v4 }
 0x15a   :  { %2379 = vmatprep.subr.bf16.mxu1 %v2938_v1 }
 0x21e   :  { %v274_v21 = vpop.f32.mrb[0].mxu0 }
 0x21f   :  { %v275_v23 = vadd.f32 %v2208_v18, %v274_v21  ;;  %v2357_v24 = vpop.f32.mrb[1].mxu0 }
 0x220   :  { %v277_v26 = vpop.f32.mrb[2].mxu0 }
 0x221   :  { %v383_v27 = vrot.slane %v275_v23, 6  ;;  %v385_v28 = vrot.slane %v275_v23, 2  ;;  %v278_v29 = vadd.f32 %v2208_v18, %v277_v26  ;;  %v2358_v30 = vpop.f32.mrb[3].mxu0  ;;  %v403_v46 = vmul.f32 %v401_v25, %v275_v23 }
 0x223   :  { %v393_v32 = vsel %vm387_vm4, %v383_v27, %v385_v28  ;;  %v378_v33 = vrot.slane %v278_v29, 6  ;;  %v380_v34 = vrot.slane %v278_v29, 2  ;;  %v404_v35 = vmul.f32 %v401_v25, %v278_v29 }
 0x224   :  { %v394_v36 = vsel %vm389_vm5, %v393_v32, %v383_v27 }
 0x225   :  { %v395_v38 = vsel %vm391_vm6, %v394_v36, %v385_v28  ;;  %v388_v39 = vsel %vm387_vm4, %v378_v33, %v380_v34 }
 0x226   :  { %v390_v40 = vsel %vm389_vm5, %v388_v39, %v378_v33  ;;  %v413_v41 = vmul.f32 %v410_v31, %v395_v38  ;;  %v482_v42 = vpop.f32.mrb[4].mxu0 }
 0x227   :  { %v392_v43 = vsel %vm391_vm6, %v390_v40, %v380_v34  ;;  %v483_v44 = vadd.f32 %v3224_v37, %v482_v42  ;;  %v2377_v45 = vpop.f32.mrb[5].mxu0 }
 0x228   :  { %v412_v47 = vmul.f32 %v410_v31, %v392_v43  ;;  %v3231_v48 = vadd.f32 %v413_v41, %v404_v35  ;;  %v485_v49 = vpop.f32.mrb[6].mxu0 }
 0x229   :  { %496 = vrot.lane.b32.xlu1 %v483_v44, %s2928_s9  ;;  %v2378_v50 = vpop.f32.mrb[7].mxu0 }
 0x22a   :  { %v3234_v51 = vadd.f32 %v412_v47, %v403_v46 }
 0x22c   :  { %v488_v52 = vadd.f32 %v483_v44, %v3234_v51 }
 0x22e   :  { %v2223_v53 = vmul.f32 -1.442695, %v488_v52 }
 0x230   :  { %2581 = vpow2.f32 %v2223_v53 }
 0x23a   :  { %v2582_v54 = vpop.eup %2581 }
 0x23b   :  { %v492_v55 = vadd.f32 1.0, %v2582_v54 }
 0x23d   :  { %2583 = vrcp.f32 %v492_v55 }
 0x247   :  { %v2584_v56 = vpop.eup %2583 }
 0x248   :  { %v506_v5 = vsub.f32 1.0, %v2584_v56  ;;  %v512_v7 = vmul.f32 0.0, %v2584_v56 }
 0x29b   :  { %v497_v57 = vpop.permute.xlu1 %496 }
 0x29c   :  { %v499_v58 = vmul.f32 %v2584_v56, %v497_v57 }
 0x29e   :  { %501 = vrot.lane.b32.xlu1 %v499_v58, %s2928_s9 }
 0x2a2   :  { %284 = vperm.xlu1 %2560, %v281_v59  }
 0x310   :  { %v502_v60 = vpop.permute.xlu1 %501 }
 0x311   :  { %v504_v61 = vadd.f32 %v502_v60, %v3234_v51 }
 0x313   :  { %2585 = vtanh.f32 %v504_v61 }
 0x31d   :  { %v2586_v2 = vpop.eup %2585 }
 0x31e   :  { %508 = vrot.lane.b32.xlu0 %v2586_v2, %s2940_s22 }
 0x321   :  { %v285_v12 = vpop.permute.xlu1 %284 }
 0x322   :  { %287 = vperm.xlu0 %2559, %v282_v3   ;;  %vm289_vm7 = vcmp.eq.s32.totalorder %v285_v12, %v3193_v9 }
 0x323   :  { %v291_v15 = vsel %vm289_vm7, 1.0, %v2938_v1 }
 0x390   :  { %v509_v6 = vpop.permute.xlu0 %508 }
 0x391   :  { %v511_v8 = vmul.f32 %v509_v6, %v506_v5 }
 0x393   :  { %v3262_v10 = vadd.f32 %v512_v7, %v511_v8 }
 0x395   :  { %v520_v11 = vpack.c.bf16 %v3262_v10, %v3262_v10  ;;  %v593_v44 = vrot.slane %v3262_v10, 6 }
 0x397   :  { %522 = vrot.lane.b32.xlu1 %v520_v11, %s2940_s22 }
 0x3a1   :  { %v288_v13 = vpop.permute.xlu0 %287 }
 0x3a2   :  { %vm290_vm8 = vcmp.eq.s32.totalorder %v288_v13, %v3193_v9 }
 0x3a3   :  { %v292_v17 = vsel %vm290_vm8, 1.0, %v2938_v1 }
 0x3a4   :  { %v293_v18 = vpack.c.bf16 %v292_v17, %v291_v15 }
 0x3a6   :  { %2368 = vmatmul.mubr.msk.bf16.vlgmr.msra.gmra.mrb[0].mxu1 %vm236_vm3, %v293_v18 }
 0x3a7   :  { %2380 = vmatpush3.bf16.msra.mxu1 %v3202_v14  ;;  %2383 = vmatprep.mubr.msk.bf16.mxu1 %vm2939_vm0, %v2938_v1 }
 0x3a8   :  { %2381 = vmatprep.subr.bf16.mxu1 %v2938_v1 }
 0x3ab   :  { %2382 = vmatpush3.bf16.msra.mxu1 %v3209_v16 }
 0x3ac   :  { %2395 = vmatprep.subr.bf16.mxu1 %v2938_v1 }
 0x409   :  { %v523_v19 = vpop.permute.xlu1 %522 }
 0x40a   :  { %2384 = vmatmul.mubr.msk.bf16.vlgmr.msra.gmra.mrb[4].mxu1 %vm444_vm9, %v523_v19 }
 0x40b   :  { %2396 = vmatpush3.bf16.msra.mxu1 %v3202_v14  ;;  %2399 = vmatprep.mubr.msk.bf16.mxu1 %vm2939_vm0, %v2938_v1 }
 0x40c   :  { %2397 = vmatprep.subr.bf16.mxu1 %v2938_v1 }
 0x40f   :  { %2398 = vmatpush3.bf16.msra.mxu1 %v3209_v16 }
 0x410   :  { %2411 = vmatprep.subr.bf16.mxu1 %v2938_v1 }
 0x479   :  { %v3285_v20 = vpop.f32.mrb[0].mxu1 }
 0x47a   :  { %v2369_v21 = vpop.f32.mrb[1].mxu1 }
 0x47b   :  { %v373_v23 = vpop.f32.mrb[2].mxu1 }
 0x47c   :  { %v3290_v24 = vadd.f32 %v3287_v22, %v373_v23  ;;  %v2370_v25 = vpop.f32.mrb[3].mxu1 }
 0x4dd   :  { %v561_v26 = vpop.f32.mrb[4].mxu1 }
 0x4de   :  { %v562_v27 = vadd.f32 %v3224_v37, %v561_v26  ;;  %v2385_v28 = vpop.f32.mrb[5].mxu1 }
 0x4df   :  { %v564_v29 = vpop.f32.mrb[6].mxu1 }
 0x4e0   :  { %v568_v30 = vrot.slane %v562_v27, 6  ;;  %v2386_v31 = vpop.f32.mrb[7].mxu1 }
 0x4e2   :  { %577 = vrot.lane.b32.xlu0 %v568_v30, %s2928_s9  ;;  %v570_v32 = vadd.f32 %v568_v30, %v3234_v51 }
 0x4e4   :  { %v2225_v33 = vmul.f32 -1.442695, %v570_v32 }
 0x4e6   :  { %2587 = vpow2.f32 %v2225_v33 }
 0x4f0   :  { %v2588_v34 = vpop.eup %2587 }
 0x4f1   :  { %v574_v35 = vadd.f32 1.0, %v2588_v34 }
 0x4f3   :  { %2589 = vrcp.f32 %v574_v35 }
 0x4fd   :  { %v2590_v36 = vpop.eup %2589 }
 0x4fe   :  { %v587_v43 = vsub.f32 1.0, %v2590_v36  ;;  %v595_v46 = vmul.f32 %v2590_v36, %v593_v44 }
 0x554   :  { %v578_v38 = vpop.permute.xlu0 %577 }
 0x555   :  { %v580_v39 = vmul.f32 %v2590_v36, %v578_v38 }
 0x557   :  { %582 = vrot.lane.b32.xlu1 %v580_v39, %s2928_s9 }
 0x5c9   :  { %v583_v40 = vpop.permute.xlu1 %582 }
 0x5ca   :  { %v585_v41 = vadd.f32 %v583_v40, %v3234_v51 }
 0x5cc   :  { %2591 = vtanh.f32 %v585_v41 }
 0x5d6   :  { %v2592_v42 = vpop.eup %2591 }
 0x5d7   :  { %589 = vrot.lane.b32.xlu0 %v2592_v42, %s2940_s22 }
 0x649   :  { %v590_v45 = vpop.permute.xlu0 %589 }
 0x64a   :  { %v592_v47 = vmul.f32 %v590_v45, %v587_v43 }
 0x64c   :  { %v3299_v49 = vadd.f32 %v595_v46, %v592_v47 }
 0x64e   :  { %v603_v50 = vpack.c.bf16 %v3299_v49, %v3299_v49  ;;  %v677_v8 = vrot.slane %v3299_v49, 6 }
 0x650   :  { %v605_v52 = vrot.slane %v603_v50, 1 }
 0x652   :  { %606 = vrot.lane.b32.xlu1 %v605_v52, %s2940_s22 }
 0x6c4   :  { %v607_v53 = vpop.permute.xlu1 %606 }
 0x6c5   :  { %2392 = vmatmul.mubr.msk.bf16.vlgmr.msra.gmra.mrb[8].mxu0 %vm444_vm9, %v607_v53 }
 0x6c6   :  { %2404 = vmatpush3.bf16.msra.mxu0 %v3202_v14  ;;  %2407 = vmatprep.mubr.msk.bf16.mxu0 %vm2939_vm0, %v2938_v1 }
 0x6c7   :  { %2405 = vmatprep.subr.bf16.mxu0 %v2938_v1 }
 0x6ca   :  { %2406 = vmatpush3.bf16.msra.mxu0 %v3209_v16 }
 0x6cb   :  { %2419 = vmatprep.subr.bf16.mxu0 %v2938_v1 }
 0x798   :  { %v645_v54 = vpop.f32.mrb[8].mxu0 }
 0x799   :  { %v646_v55 = vadd.f32 %v3224_v37, %v645_v54  ;;  %v2393_v56 = vpop.f32.mrb[9].mxu0 }
 0x79a   :  { %v648_v57 = vpop.f32.mrb[10].mxu0 }
 0x79b   :  { %v652_v58 = vrot.slane %v646_v55, 4  ;;  %v2394_v59 = vpop.f32.mrb[11].mxu0 }
 0x79d   :  { %661 = vrot.lane.b32.xlu0 %v652_v58, %s2928_s9  ;;  %v654_v60 = vadd.f32 %v652_v58, %v3234_v51 }
 0x79f   :  { %v2227_v61 = vmul.f32 -1.442695, %v654_v60 }
 0x7a1   :  { %2593 = vpow2.f32 %v2227_v61 }
 0x7ab   :  { %v2594_v62 = vpop.eup %2593 }
 0x7ac   :  { %v658_v63 = vadd.f32 1.0, %v2594_v62 }
 0x7ae   :  { %2595 = vrcp.f32 %v658_v63 }
 0x7b8   :  { %v2596_v0 = vpop.eup %2595 }
 0x7b9   :  { %v671_v7 = vsub.f32 1.0, %v2596_v0  ;;  %v679_v12 = vmul.f32 %v2596_v0, %v677_v8 }
 0x80f   :  { %v662_v2 = vpop.permute.xlu0 %661 }
 0x810   :  { %v664_v3 = vmul.f32 %v2596_v0, %v662_v2 }
 0x812   :  { %666 = vrot.lane.b32.xlu1 %v664_v3, %s2928_s9 }
 0x884   :  { %v667_v4 = vpop.permute.xlu1 %666 }
 0x885   :  { %v669_v5 = vadd.f32 %v667_v4, %v3234_v51 }
 0x887   :  { %2597 = vtanh.f32 %v669_v5 }
 0x891   :  { %v2598_v6 = vpop.eup %2597 }
 0x892   :  { %673 = vrot.lane.b32.xlu0 %v2598_v6, %s2940_s22 }
 0x904   :  { %v674_v11 = vpop.permute.xlu0 %673 }
 0x905   :  { %v676_v13 = vmul.f32 %v674_v11, %v671_v7 }
 0x907   :  { %v3318_v15 = vadd.f32 %v679_v12, %v676_v13 }
 0x909   :  { %v687_v17 = vpack.c.bf16 %v3318_v15, %v3318_v15  ;;  %v761_v41 = vrot.slane %v3318_v15, 6 }
 0x90b   :  { %v689_v18 = vrot.slane %v687_v17, 2 }
 0x90d   :  { %690 = vrot.lane.b32.xlu1 %v689_v18, %s2940_s22 }
 0x97f   :  { %v691_v19 = vpop.permute.xlu1 %690 }
 0x980   :  { %2400 = vmatmul.mubr.msk.bf16.vlgmr.msra.gmra.mrb[8].mxu1 %vm444_vm9, %v691_v19 }
 0x981   :  { %2412 = vmatpush3.bf16.msra.mxu1 %v3202_v14  ;;  %2415 = vmatprep.mubr.msk.bf16.mxu1 %vm2939_vm0, %v2938_v1 }
 0x982   :  { %2413 = vmatprep.subr.bf16.mxu1 %v2938_v1 }
 0x985   :  { %2414 = vmatpush3.bf16.msra.mxu1 %v3209_v16 }
 0x986   :  { %2427 = vmatprep.subr.bf16.mxu1 %v2938_v1 }
 0xa53   :  { %v729_v21 = vpop.f32.mrb[8].mxu1 }
 0xa54   :  { %v730_v23 = vadd.f32 %v3224_v37, %v729_v21  ;;  %v2401_v25 = vpop.f32.mrb[9].mxu1 }
 0xa55   :  { %v732_v26 = vpop.f32.mrb[10].mxu1 }
 0xa56   :  { %v736_v27 = vrot.slane %v730_v23, 2  ;;  %v2402_v28 = vpop.f32.mrb[11].mxu1 }
 0xa58   :  { %745 = vrot.lane.b32.xlu0 %v736_v27, %s2928_s9  ;;  %v738_v29 = vadd.f32 %v736_v27, %v3234_v51 }
 0xa5a   :  { %v2229_v30 = vmul.f32 -1.442695, %v738_v29 }
 0xa5c   :  { %2599 = vpow2.f32 %v2229_v30 }
 0xa66   :  { %v2600_v31 = vpop.eup %2599 }
 0xa67   :  { %v742_v32 = vadd.f32 1.0, %v2600_v31 }
 0xa69   :  { %2601 = vrcp.f32 %v742_v32 }
 0xa73   :  { %v2602_v33 = vpop.eup %2601 }
 0xa74   :  { %v755_v40 = vsub.f32 1.0, %v2602_v33  ;;  %v763_v43 = vmul.f32 %v2602_v33, %v761_v41 }
 0xaca   :  { %v746_v34 = vpop.permute.xlu0 %745 }
 0xacb   :  { %v748_v35 = vmul.f32 %v2602_v33, %v746_v34 }
 0xacd   :  { %750 = vrot.lane.b32.xlu1 %v748_v35, %s2928_s9 }
 0xb3f   :  { %v751_v36 = vpop.permute.xlu1 %750 }
 0xb40   :  { %v753_v38 = vadd.f32 %v751_v36, %v3234_v51 }
 0xb42   :  { %2603 = vtanh.f32 %v753_v38 }
 0xb4c   :  { %v2604_v39 = vpop.eup %2603 }
 0xb4d   :  { %757 = vrot.lane.b32.xlu0 %v2604_v39, %s2940_s22 }
 0xbbf   :  { %v758_v42 = vpop.permute.xlu0 %757 }
 0xbc0   :  { %v760_v44 = vmul.f32 %v758_v42, %v755_v40 }
 0xbc2   :  { %v3337_v45 = vadd.f32 %v763_v43, %v760_v44 }
 0xbc4   :  { %v771_v46 = vpack.c.bf16 %v3337_v45, %v3337_v45  ;;  %v843_v4 = vrot.slane %v3337_v45, 6 }
 0xbc6   :  { %v773_v47 = vrot.slane %v771_v46, 3 }
 0xbc8   :  { %774 = vrot.lane.b32.xlu1 %v773_v47, %s2940_s22 }
 0xc3a   :  { %v775_v50 = vpop.permute.xlu1 %774 }
 0xc3b   :  { %2408 = vmatmul.mubr.msk.bf16.vlgmr.msra.gmra.mrb[12].mxu0 %vm444_vm9, %v775_v50 }
 0xc3c   :  { %2420 = vmatpush3.bf16.msra.mxu0 %v3202_v14  ;;  %2423 = vmatprep.mubr.msk.bf16.mxu0 %vm2939_vm0, %v2938_v1 }
 0xc3d   :  { %2421 = vmatprep.subr.bf16.mxu0 %v2938_v1 }
 0xc40   :  { %2422 = vmatpush3.bf16.msra.mxu0 %v3209_v16 }
 0xc41   :  { %2435 = vmatprep.subr.bf16.mxu0 %v2938_v1 }
 0xd0e   :  { %v813_v51 = vpop.f32.mrb[12].mxu0 }
 0xd0f   :  { %v814_v52 = vadd.f32 %v3224_v37, %v813_v51  ;;  %v2409_v53 = vpop.f32.mrb[13].mxu0 }
 0xd10   :  { %v816_v54 = vpop.f32.mrb[14].mxu0 }
 0xd11   :  { %827 = vrot.lane.b32.xlu0 %v814_v52, %s2928_s9  ;;  %v2410_v55 = vpop.f32.mrb[15].mxu0  ;;  %v819_v56 = vadd.f32 %v814_v52, %v3231_v48 }
 0xd13   :  { %v2231_v57 = vmul.f32 -1.442695, %v819_v56 }
 0xd15   :  { %2605 = vpow2.f32 %v2231_v57 }
 0xd1f   :  { %v2606_v58 = vpop.eup %2605 }
 0xd20   :  { %v823_v59 = vadd.f32 1.0, %v2606_v58 }
 0xd22   :  { %2607 = vrcp.f32 %v823_v59 }
 0xd2c   :  { %v2608_v60 = vpop.eup %2607 }
 0xd2d   :  { %v837_v3 = vsub.f32 1.0, %v2608_v60  ;;  %v845_v6 = vmul.f32 %v2608_v60, %v843_v4 }
 0xd83   :  { %v828_v61 = vpop.permute.xlu0 %827 }
 0xd84   :  { %v830_v62 = vmul.f32 %v2608_v60, %v828_v61 }
 0xd86   :  { %832 = vrot.lane.b32.xlu1 %v830_v62, %s2928_s9 }
 0xdf8   :  { %v833_v63 = vpop.permute.xlu1 %832 }
 0xdf9   :  { %v835_v0 = vadd.f32 %v833_v63, %v3231_v48 }
 0xdfb   :  { %2609 = vtanh.f32 %v835_v0 }
 0xe05   :  { %v2610_v2 = vpop.eup %2609 }
 0xe06   :  { %839 = vrot.lane.b32.xlu0 %v2610_v2, %s2940_s22 }
 0xe78   :  { %v840_v5 = vpop.permute.xlu0 %839 }
 0xe79   :  { %v842_v7 = vmul.f32 %v840_v5, %v837_v3 }
 0xe7b   :  { %v3356_v8 = vadd.f32 %v845_v6, %v842_v7 }
 0xe7d   :  { %v852_v11 = vpack.c.bf16 %v3356_v8, %v3356_v8  ;;  %v925_v34 = vrot.slane %v3356_v8, 6 }
 0xe7f   :  { %854 = vrot.lane.b32.xlu1 %v852_v11, %s2940_s22 }
 0xef1   :  { %v855_v12 = vpop.permute.xlu1 %854 }
 0xef2   :  { %2416 = vmatmul.mubr.msk.bf16.vlgmr.msra.gmra.mrb[12].mxu1 %vm444_vm9, %v855_v12 }
 0xef3   :  { %2428 = vmatpush3.bf16.msra.mxu1 %v3202_v14  ;;  %2431 = vmatprep.mubr.msk.bf16.mxu1 %vm2939_vm0, %v2938_v1 }
 0xef4   :  { %2429 = vmatprep.subr.bf16.mxu1 %v2938_v1 }
 0xef7   :  { %2430 = vmatpush3.bf16.msra.mxu1 %v3209_v16 }
 0xef8   :  { %2443 = vmatprep.subr.bf16.mxu1 %v2938_v1 }
 0xfc5   :  { %v893_v13 = vpop.f32.mrb[12].mxu1 }
 0xfc6   :  { %v894_v17 = vadd.f32 %v3224_v37, %v893_v13  ;;  %v2417_v18 = vpop.f32.mrb[13].mxu1 }
 0xfc7   :  { %v896_v19 = vpop.f32.mrb[14].mxu1 }
 0xfc8   :  { %v900_v21 = vrot.slane %v894_v17, 6  ;;  %v2418_v23 = vpop.f32.mrb[15].mxu1 }
 0xfca   :  { %909 = vrot.lane.b32.xlu0 %v900_v21, %s2928_s9  ;;  %v902_v14 = vadd.f32 %v900_v21, %v3231_v48 }
 0xfcc   :  { %v2233_v25 = vmul.f32 -1.442695, %v902_v14 }
 0xfce   :  { %2611 = vpow2.f32 %v2233_v25 }
 0xfd8   :  { %v2612_v26 = vpop.eup %2611 }
 0xfd9   :  { %v906_v27 = vadd.f32 1.0, %v2612_v26 }
 0xfdb   :  { %2613 = vrcp.f32 %v906_v27 }
 0xfe5   :  { %v2614_v28 = vpop.eup %2613 }
 0xfe6   :  { %v919_v33 = vsub.f32 1.0, %v2614_v28  ;;  %v927_v36 = vmul.f32 %v2614_v28, %v925_v34 }
0x103c   :  { %v910_v16 = vpop.permute.xlu0 %909 }
0x103d   :  { %v912_v29 = vmul.f32 %v2614_v28, %v910_v16 }
0x103f   :  { %914 = vrot.lane.b32.xlu1 %v912_v29, %s2928_s9  ;;  %v3406_v29 = vld [vmem:[%s3680_s8] sm:$0xff]  }
0x10b1   :  { %v915_v30 = vpop.permute.xlu1 %914 }
0x10b2   :  { %v917_v31 = vadd.f32 %v915_v30, %v3231_v48  ;;  %v3412_v30 = vld [vmem:[%s3680_s8 + $0x8] sm:$0xff]  }
0x10b4   :  { %2615 = vtanh.f32 %v917_v31 }
0x10be   :  { %v2616_v32 = vpop.eup %2615 }
0x10bf   :  { %921 = vrot.lane.b32.xlu0 %v2616_v32, %s2940_s22 }
0x1131   :  { %v922_v35 = vpop.permute.xlu0 %921 }
0x1132   :  { %v924_v38 = vmul.f32 %v922_v35, %v919_v33 }
0x1134   :  { %v3375_v39 = vadd.f32 %v927_v36, %v924_v38 }
0x1136   :  { %v934_v40 = vpack.c.bf16 %v3375_v39, %v3375_v39  ;;  %v1008_v63 = vrot.slane %v3375_v39, 6 }
0x1138   :  { %v936_v41 = vrot.slane %v934_v40, 1 }
0x113a   :  { %937 = vrot.lane.b32.xlu1 %v936_v41, %s2940_s22 }
0x11ac   :  { %v938_v42 = vpop.permute.xlu1 %937 }
0x11ad   :  { %2424 = vmatmul.mubr.msk.bf16.vlgmr.msra.gmra.mrb[16].mxu0 %vm444_vm9, %v938_v42  ;;  %v3435_v42 = vld [vmem:[#allocation9] ss:$0 sm:$0xff] }
0x11ae   :  { %2439 = vmatprep.mubr.msk.bf16.mxu0 %vm2939_vm0, %v2938_v1  ;;  %2436 = vmatpush3.bf16.msra.mxu0 %v3406_v29 }
0x11af   :  { %2437 = vmatprep.subr.bf16.mxu0 %v2938_v1 }
0x11b2   :  { %2438 = vmatpush3.bf16.msra.mxu0 %v3412_v30 }
0x11b3   :  { %2451 = vmatprep.subr.bf16.mxu0 %v2938_v1 }
0x1280   :  { %v976_v43 = vpop.f32.mrb[16].mxu0 }
0x1281   :  { %v977_v44 = vadd.f32 %v3224_v37, %v976_v43  ;;  %v2425_v46 = vpop.f32.mrb[17].mxu0 }
0x1282   :  { %v979_v47 = vpop.f32.mrb[18].mxu0 }
0x1283   :  { %v983_v50 = vrot.slane %v977_v44, 4  ;;  %v2426_v51 = vpop.f32.mrb[19].mxu0 }
0x1284   :  { %v3441_v51 = vadd.f32 %v3287_v22, %v3285_v20 }
0x1285   :  { %992 = vrot.lane.b32.xlu0 %v983_v50, %s2928_s9  ;;  %v985_v52 = vadd.f32 %v983_v50, %v3231_v48 }
0x1287   :  { %v2235_v53 = vmul.f32 -1.442695, %v985_v52 }
0x1289   :  { %2617 = vpow2.f32 %v2235_v53 }
0x1293   :  { %v2618_v54 = vpop.eup %2617 }
0x1294   :  { %v989_v55 = vadd.f32 1.0, %v2618_v54 }
0x1296   :  { %2619 = vrcp.f32 %v989_v55 }
0x12a0   :  { %v2620_v56 = vpop.eup %2619 }
0x12a1   :  { %v1002_v62 = vsub.f32 1.0, %v2620_v56  ;;  %v1010_v2 = vmul.f32 %v2620_v56, %v1008_v63 }
0x12f7   :  { %v993_v57 = vpop.permute.xlu0 %992 }
0x12f8   :  { %v995_v58 = vmul.f32 %v2620_v56, %v993_v57 }
0x12fa   :  { %997 = vrot.lane.b32.xlu1 %v995_v58, %s2928_s9 }
0x136c   :  { %v998_v59 = vpop.permute.xlu1 %997 }
0x136d   :  { %v1000_v60 = vadd.f32 %v998_v59, %v3231_v48 }
0x136f   :  { %2621 = vtanh.f32 %v1000_v60 }
0x1379   :  { %v2622_v61 = vpop.eup %2621 }
0x137a   :  { %1004 = vrot.lane.b32.xlu0 %v2622_v61, %s2940_s22 }
0x13ec   :  { %v1005_v0 = vpop.permute.xlu0 %1004 }
0x13ed   :  { %v1007_v3 = vmul.f32 %v1005_v0, %v1002_v62 }
0x13ef   :  { %v3390_v4 = vadd.f32 %v1010_v2, %v1007_v3 }
0x13f1   :  { %v1017_v5 = vpack.c.bf16 %v3390_v4, %v3390_v4  ;;  %v1091_v32 = vrot.slane %v3390_v4, 6 }
0x13f3   :  { %v1019_v6 = vrot.slane %v1017_v5, 2 }
0x13f5   :  { %1020 = vrot.lane.b32.xlu1 %v1019_v6, %s2940_s22 }
0x1467   :  { %v1021_v7 = vpop.permute.xlu1 %1020 }
0x1468   :  { %2432 = vmatmul.mubr.msk.bf16.vlgmr.msra.gmra.mrb[16].mxu1 %vm444_vm9, %v1021_v7 }
0x1469   :  { %2447 = vmatprep.mubr.msk.bf16.mxu1 %vm2939_vm0, %v2938_v1  ;;  %2444 = vmatpush3.bf16.msra.mxu1 %v3406_v29 }
0x146a   :  { %2445 = vmatprep.subr.bf16.mxu1 %v2938_v1 }
0x146d   :  { %2446 = vmatpush3.bf16.msra.mxu1 %v3412_v30 }
0x146e   :  { %2459 = vmatprep.subr.bf16.mxu1 %v2938_v1 }
0x153b   :  { %v1059_v11 = vpop.f32.mrb[16].mxu1 }
0x153c   :  { %v1060_v12 = vadd.f32 %v3224_v37, %v1059_v11  ;;  %v2433_v13 = vpop.f32.mrb[17].mxu1 }
0x153d   :  { %v1062_v17 = vpop.f32.mrb[18].mxu1 }
0x153e   :  { %v1066_v18 = vrot.slane %v1060_v12, 2  ;;  %v2434_v19 = vpop.f32.mrb[19].mxu1 }
0x1540   :  { %1075 = vrot.lane.b32.xlu0 %v1066_v18, %s2928_s9  ;;  %v1068_v21 = vadd.f32 %v1066_v18, %v3231_v48 }
0x1542   :  { %v2237_v23 = vmul.f32 -1.442695, %v1068_v21 }
0x1544   :  { %2623 = vpow2.f32 %v2237_v23 }
0x154e   :  { %v2624_v14 = vpop.eup %2623 }
0x154f   :  { %v1072_v25 = vadd.f32 1.0, %v2624_v14 }
0x1551   :  { %2625 = vrcp.f32 %v1072_v25 }
0x155b   :  { %v2626_v26 = vpop.eup %2625 }
0x155c   :  { %v1085_v31 = vsub.f32 1.0, %v2626_v26  ;;  %v1093_v34 = vmul.f32 %v2626_v26, %v1091_v32 }
0x15b2   :  { %v1076_v27 = vpop.permute.xlu0 %1075 }
0x15b3   :  { %v1078_v28 = vmul.f32 %v2626_v26, %v1076_v27 }
0x15b5   :  { %1080 = vrot.lane.b32.xlu1 %v1078_v28, %s2928_s9 }
0x1627   :  { %v1081_v16 = vpop.permute.xlu1 %1080 }
0x1628   :  { %v1083_v37 = vadd.f32 %v1081_v16, %v3231_v48 }
0x162a   :  { %2627 = vtanh.f32 %v1083_v37 }
0x1634   :  { %v2628_v48 = vpop.eup %2627 }
0x1635   :  { %1087 = vrot.lane.b32.xlu0 %v2628_v48, %s2940_s22 }
0x16a7   :  { %v1088_v33 = vpop.permute.xlu0 %1087 }
0x16a8   :  { %v1090_v35 = vmul.f32 %v1088_v33, %v1085_v31 }
0x16aa   :  { %v3423_v36 = vadd.f32 %v1093_v34, %v1090_v35 }
0x16ac   :  { %v1121_v38 = vpack.c.bf16 %v3423_v36, %v3423_v36  ;;  %v1211_v22 = vrot.slane %v3423_v36, 6 }
0x16ae   :  { %v1129_v40 = vrot.slane %v1121_v38, 3 }
0x16b0   :  { %1130 = vrot.lane.b32.xlu1 %v1129_v40, %s2940_s22 }
0x1722   :  { %v1131_v41 = vpop.permute.xlu1 %1130 }
0x1723   :  { %2440 = vmatmul.mubr.msk.bf16.vlgmr.msra.gmra.mrb[20].mxu0 %vm444_vm9, %v1131_v41 }
0x1724   :  { %2452 = vmatpush3.bf16.msra.mxu0 %v3406_v29  ;;  %2455 = vmatprep.mubr.msk.bf16.mxu0 %vm2939_vm0, %v2938_v1 }
0x1725   :  { %2453 = vmatprep.subr.bf16.mxu0 %v2938_v1 }
0x1728   :  { %2454 = vmatpush3.bf16.msra.mxu0 %v3412_v30 }
0x1729   :  { %2467 = vmatprep.subr.bf16.mxu0 %v2938_v1 }
0x17f6   :  { %v1181_v43 = vpop.f32.mrb[20].mxu0 }
0x17f7   :  { %v1182_v44 = vadd.f32 %v3435_v42, %v1181_v43  ;;  %v2441_v46 = vpop.f32.mrb[21].mxu0 }
0x17f8   :  { %v1184_v47 = vpop.f32.mrb[22].mxu0 }
0x17f9   :  { %1195 = vrot.lane.b32.xlu0 %v1182_v44, %s2928_s9  ;;  %v2442_v50 = vpop.f32.mrb[23].mxu0  ;;  %v1187_v52 = vadd.f32 %v1182_v44, %v3441_v51 }
0x17fb   :  { %v2242_v53 = vmul.f32 -1.442695, %v1187_v52 }
0x17fd   :  { %2629 = vpow2.f32 %v2242_v53 }
0x1807   :  { %v2630_v54 = vpop.eup %2629 }
0x1808   :  { %v1191_v55 = vadd.f32 1.0, %v2630_v54 }
0x180a   :  { %2631 = vrcp.f32 %v1191_v55 }
0x1814   :  { %v2632_v56 = vpop.eup %2631 }
0x1815   :  { %v1205_v20 = vsub.f32 1.0, %v2632_v56  ;;  %v1213_v63 = vmul.f32 %v2632_v56, %v1211_v22 }
0x186b   :  { %v1196_v57 = vpop.permute.xlu0 %1195 }
0x186c   :  { %v1198_v58 = vmul.f32 %v2632_v56, %v1196_v57 }
0x186e   :  { %1200 = vrot.lane.b32.xlu1 %v1198_v58, %s2928_s9 }
0x18e0   :  { %v1201_v59 = vpop.permute.xlu1 %1200 }
0x18e1   :  { %v1203_v60 = vadd.f32 %v1201_v59, %v3441_v51 }
0x18e3   :  { %2633 = vtanh.f32 %v1203_v60 }
0x18ed   :  { %v2634_v61 = vpop.eup %2633 }
0x18ee   :  { %1207 = vrot.lane.b32.xlu0 %v2634_v61, %s2940_s22 }
0x1960   :  { %v1208_v62 = vpop.permute.xlu0 %1207 }
0x1961   :  { %v1210_v0 = vmul.f32 %v1208_v62, %v1205_v20 }
0x1963   :  { %v3448_v2 = vadd.f32 %v1213_v63, %v1210_v0 }
0x1965   :  { %v1220_v3 = vpack.c.bf16 %v3448_v2, %v3448_v2  ;;  %v1293_v48 = vrot.slane %v3448_v2, 6 }
0x1967   :  { %1222 = vrot.lane.b32.xlu1 %v1220_v3, %s2940_s22 }
0x19d9   :  { %v1223_v5 = vpop.permute.xlu1 %1222 }
0x19da   :  { %2448 = vmatmul.mubr.msk.bf16.vlgmr.msra.gmra.mrb[20].mxu1 %vm444_vm9, %v1223_v5 }
0x19db   :  { %2460 = vmatpush3.bf16.msra.mxu1 %v3406_v29  ;;  %2463 = vmatprep.mubr.msk.bf16.mxu1 %vm2939_vm0, %v2938_v1 }
0x19dc   :  { %2461 = vmatprep.subr.bf16.mxu1 %v2938_v1 }
0x19df   :  { %2462 = vmatpush3.bf16.msra.mxu1 %v3412_v30 }
0x19e0   :  { %2475 = vmatprep.subr.bf16.mxu1 %v2938_v1 }
0x1aad   :  { %v1261_v6 = vpop.f32.mrb[20].mxu1 }
0x1aae   :  { %v1262_v7 = vadd.f32 %v3435_v42, %v1261_v6  ;;  %v2449_v11 = vpop.f32.mrb[21].mxu1 }
0x1aaf   :  { %v1264_v12 = vpop.f32.mrb[22].mxu1 }
0x1ab0   :  { %v1268_v13 = vrot.slane %v1262_v7, 6  ;;  %v2450_v17 = vpop.f32.mrb[23].mxu1 }
0x1ab2   :  { %1277 = vrot.lane.b32.xlu0 %v1268_v13, %s2928_s9  ;;  %v1270_v18 = vadd.f32 %v1268_v13, %v3441_v51 }
0x1ab4   :  { %v2244_v19 = vmul.f32 -1.442695, %v1270_v18 }
0x1ab6   :  { %2635 = vpow2.f32 %v2244_v19 }
0x1ac0   :  { %v2636_v21 = vpop.eup %2635 }
0x1ac1   :  { %v1274_v23 = vadd.f32 1.0, %v2636_v21 }
0x1ac3   :  { %2637 = vrcp.f32 %v1274_v23 }
0x1acd   :  { %v2638_v14 = vpop.eup %2637 }
0x1ace   :  { %v1287_v37 = vsub.f32 1.0, %v2638_v14  ;;  %v1295_v32 = vmul.f32 %v2638_v14, %v1293_v48 }
0x1b24   :  { %v1278_v25 = vpop.permute.xlu0 %1277 }
0x1b25   :  { %v1280_v26 = vmul.f32 %v2638_v14, %v1278_v25 }
0x1b27   :  { %1282 = vrot.lane.b32.xlu1 %v1280_v26, %s2928_s9 }
0x1b99   :  { %v1283_v27 = vpop.permute.xlu1 %1282 }
0x1b9a   :  { %v1285_v28 = vadd.f32 %v1283_v27, %v3441_v51 }
0x1b9c   :  { %2639 = vtanh.f32 %v1285_v28 }
0x1ba6   :  { %v2640_v16 = vpop.eup %2639 }
0x1ba7   :  { %1289 = vrot.lane.b32.xlu0 %v2640_v16, %s2940_s22 }
0x1c19   :  { %v1290_v31 = vpop.permute.xlu0 %1289 }
0x1c1a   :  { %v1292_v33 = vmul.f32 %v1290_v31, %v1287_v37 }
0x1c1c   :  { %v3467_v34 = vadd.f32 %v1295_v32, %v1292_v33 }
0x1c1e   :  { %v1302_v35 = vpack.c.bf16 %v3467_v34, %v3467_v34  ;;  %v1376_v22 = vrot.slane %v3467_v34, 6 }
0x1c20   :  { %v1304_v38 = vrot.slane %v1302_v35, 1 }
0x1c22   :  { %1305 = vrot.lane.b32.xlu1 %v1304_v38, %s2940_s22 }
0x1c94   :  { %v1306_v40 = vpop.permute.xlu1 %1305 }
0x1c95   :  { %2456 = vmatmul.mubr.msk.bf16.vlgmr.msra.gmra.mrb[24].mxu0 %vm444_vm9, %v1306_v40 }
0x1c96   :  { %2468 = vmatpush3.bf16.msra.mxu0 %v3406_v29  ;;  %2471 = vmatprep.mubr.msk.bf16.mxu0 %vm2939_vm0, %v2938_v1 }
0x1c97   :  { %2469 = vmatprep.subr.bf16.mxu0 %v2938_v1 }
0x1c9a   :  { %2470 = vmatpush3.bf16.msra.mxu0 %v3412_v30 }
0x1c9b   :  { %2483 = vmatprep.subr.bf16.mxu0 %v2938_v1 }
0x1d68   :  { %v1344_v41 = vpop.f32.mrb[24].mxu0 }
0x1d69   :  { %v1345_v43 = vadd.f32 %v3435_v42, %v1344_v41  ;;  %v2457_v44 = vpop.f32.mrb[25].mxu0 }
0x1d6a   :  { %v1347_v46 = vpop.f32.mrb[26].mxu0 }
0x1d6b   :  { %v1351_v47 = vrot.slane %v1345_v43, 4  ;;  %v2458_v50 = vpop.f32.mrb[27].mxu0 }
0x1d6d   :  { %1360 = vrot.lane.b32.xlu0 %v1351_v47, %s2928_s9  ;;  %v1353_v52 = vadd.f32 %v1351_v47, %v3441_v51 }
0x1d6f   :  { %v2246_v53 = vmul.f32 -1.442695, %v1353_v52 }
0x1d71   :  { %2641 = vpow2.f32 %v2246_v53 }
0x1d7b   :  { %v2642_v54 = vpop.eup %2641 }
0x1d7c   :  { %v1357_v55 = vadd.f32 1.0, %v2642_v54 }
0x1d7e   :  { %2643 = vrcp.f32 %v1357_v55 }
0x1d88   :  { %v2644_v56 = vpop.eup %2643 }
0x1d89   :  { %v1370_v20 = vsub.f32 1.0, %v2644_v56  ;;  %v1378_v63 = vmul.f32 %v2644_v56, %v1376_v22 }
0x1ddf   :  { %v1361_v57 = vpop.permute.xlu0 %1360 }
0x1de0   :  { %v1363_v58 = vmul.f32 %v2644_v56, %v1361_v57 }
0x1de2   :  { %1365 = vrot.lane.b32.xlu1 %v1363_v58, %s2928_s9 }
0x1e54   :  { %v1366_v59 = vpop.permute.xlu1 %1365 }
0x1e55   :  { %v1368_v60 = vadd.f32 %v1366_v59, %v3441_v51 }
0x1e57   :  { %2645 = vtanh.f32 %v1368_v60 }
0x1e61   :  { %v2646_v61 = vpop.eup %2645 }
0x1e62   :  { %1372 = vrot.lane.b32.xlu0 %v2646_v61, %s2940_s22 }
0x1ed4   :  { %v1373_v62 = vpop.permute.xlu0 %1372 }
0x1ed5   :  { %v1375_v0 = vmul.f32 %v1373_v62, %v1370_v20 }
0x1ed7   :  { %v3486_v3 = vadd.f32 %v1378_v63, %v1375_v0 }
0x1ed9   :  { %v1385_v5 = vpack.c.bf16 %v3486_v3, %v3486_v3  ;;  %v1459_v32 = vrot.slane %v3486_v3, 6 }
0x1edb   :  { %v1387_v6 = vrot.slane %v1385_v5, 2 }
0x1edd   :  { %1388 = vrot.lane.b32.xlu1 %v1387_v6, %s2940_s22 }
0x1f4f   :  { %v1389_v7 = vpop.permute.xlu1 %1388 }
0x1f50   :  { %2464 = vmatmul.mubr.msk.bf16.vlgmr.msra.gmra.mrb[24].mxu1 %vm444_vm9, %v1389_v7 }
0x1f51   :  { %2476 = vmatpush3.bf16.msra.mxu1 %v3406_v29  ;;  %2479 = vmatprep.mubr.msk.bf16.mxu1 %vm2939_vm0, %v2938_v1 }
0x1f52   :  { %2477 = vmatprep.subr.bf16.mxu1 %v2938_v1 }
0x1f55   :  { %2478 = vmatpush3.bf16.msra.mxu1 %v3412_v30 }
0x1f56   :  { %2491 = vmatprep.subr.bf16.mxu1 %v2938_v1 }
0x2023   :  { %v1427_v11 = vpop.f32.mrb[24].mxu1 }
0x2024   :  { %v1428_v12 = vadd.f32 %v3435_v42, %v1427_v11  ;;  %v2465_v13 = vpop.f32.mrb[25].mxu1 }
0x2025   :  { %v1430_v17 = vpop.f32.mrb[26].mxu1 }
0x2026   :  { %v1434_v18 = vrot.slane %v1428_v12, 2  ;;  %v2466_v19 = vpop.f32.mrb[27].mxu1 }
0x2028   :  { %1443 = vrot.lane.b32.xlu0 %v1434_v18, %s2928_s9  ;;  %v1436_v21 = vadd.f32 %v1434_v18, %v3441_v51 }
0x202a   :  { %v2248_v23 = vmul.f32 -1.442695, %v1436_v21 }
0x202c   :  { %2647 = vpow2.f32 %v2248_v23 }
0x2036   :  { %v2648_v14 = vpop.eup %2647 }
0x2037   :  { %v1440_v25 = vadd.f32 1.0, %v2648_v14 }
0x2039   :  { %2649 = vrcp.f32 %v1440_v25 }
0x2043   :  { %v2650_v26 = vpop.eup %2649 }
0x2044   :  { %v1453_v31 = vsub.f32 1.0, %v2650_v26  ;;  %v1461_v35 = vmul.f32 %v2650_v26, %v1459_v32 }
0x209a   :  { %v1444_v27 = vpop.permute.xlu0 %1443 }
0x209b   :  { %v1446_v28 = vmul.f32 %v2650_v26, %v1444_v27 }
0x209d   :  { %1448 = vrot.lane.b32.xlu1 %v1446_v28, %s2928_s9 }
0x210f   :  { %v1449_v16 = vpop.permute.xlu1 %1448 }
0x2110   :  { %v1451_v37 = vadd.f32 %v1449_v16, %v3441_v51 }
0x2112   :  { %2651 = vtanh.f32 %v1451_v37 }
0x211c   :  { %v2652_v48 = vpop.eup %2651 }
0x211d   :  { %1455 = vrot.lane.b32.xlu0 %v2652_v48, %s2940_s22 }
0x218f   :  { %v1456_v33 = vpop.permute.xlu0 %1455 }
0x2190   :  { %v1458_v38 = vmul.f32 %v1456_v33, %v1453_v31 }
0x2192   :  { %v3505_v40 = vadd.f32 %v1461_v35, %v1458_v38 }
0x2194   :  { %v1468_v41 = vpack.c.bf16 %v3505_v40, %v3505_v40  ;;  %v1540_v62 = vrot.slane %v3505_v40, 6 }
0x2196   :  { %v1470_v43 = vrot.slane %v1468_v41, 3 }
0x2198   :  { %1471 = vrot.lane.b32.xlu1 %v1470_v43, %s2940_s22 }
0x220a   :  { %v1472_v44 = vpop.permute.xlu1 %1471 }
0x220b   :  { %2472 = vmatmul.mubr.msk.bf16.vlgmr.msra.gmra.mrb[28].mxu0 %vm444_vm9, %v1472_v44 }
0x220c   :  { %2484 = vmatpush3.bf16.msra.mxu0 %v3406_v29  ;;  %2487 = vmatprep.mubr.msk.bf16.mxu0 %vm2939_vm0, %v2938_v1 }
0x220d   :  { %2485 = vmatprep.subr.bf16.mxu0 %v2938_v1 }
0x2210   :  { %2486 = vmatpush3.bf16.msra.mxu0 %v3412_v30 }
0x2211   :  { %2499 = vmatprep.subr.bf16.mxu0 %v2938_v1 }
0x22de   :  { %v1510_v51 = vpop.f32.mrb[28].mxu0 }
0x22df   :  { %v1511_v46 = vadd.f32 %v3435_v42, %v1510_v51  ;;  %v2473_v47 = vpop.f32.mrb[29].mxu0 }
0x22e0   :  { %v1513_v50 = vpop.f32.mrb[30].mxu0 }
0x22e1   :  { %1524 = vrot.lane.b32.xlu0 %v1511_v46, %s2928_s9  ;;  %v2474_v52 = vpop.f32.mrb[31].mxu0  ;;  %v1516_v53 = vadd.f32 %v1511_v46, %v3290_v24 }
0x22e3   :  { %v2250_v54 = vmul.f32 -1.442695, %v1516_v53 }
0x22e5   :  { %2653 = vpow2.f32 %v2250_v54 }
0x22ef   :  { %v2654_v55 = vpop.eup %2653 }
0x22f0   :  { %v1520_v56 = vadd.f32 1.0, %v2654_v55 }
0x22f2   :  { %2655 = vrcp.f32 %v1520_v56 }
0x22fc   :  { %v2656_v57 = vpop.eup %2655 }
0x22fd   :  { %v1534_v22 = vsub.f32 1.0, %v2656_v57  ;;  %v1542_v0 = vmul.f32 %v2656_v57, %v1540_v62 }
0x2353   :  { %v1525_v58 = vpop.permute.xlu0 %1524 }
0x2354   :  { %v1527_v59 = vmul.f32 %v2656_v57, %v1525_v58 }
0x2356   :  { %1529 = vrot.lane.b32.xlu1 %v1527_v59, %s2928_s9 }
0x23c8   :  { %v1530_v60 = vpop.permute.xlu1 %1529 }
0x23c9   :  { %v1532_v61 = vadd.f32 %v1530_v60, %v3290_v24 }
0x23cb   :  { %2657 = vtanh.f32 %v1532_v61 }
0x23d5   :  { %v2658_v20 = vpop.eup %2657 }
0x23d6   :  { %1536 = vrot.lane.b32.xlu0 %v2658_v20, %s2940_s22 }
0x2448   :  { %v1537_v63 = vpop.permute.xlu0 %1536 }
0x2449   :  { %v1539_v5 = vmul.f32 %v1537_v63, %v1534_v22 }
0x244b   :  { %v3524_v6 = vadd.f32 %v1542_v0, %v1539_v5 }
0x244d   :  { %v1549_v7 = vpack.c.bf16 %v3524_v6, %v3524_v6  ;;  %v1622_v31 = vrot.slane %v3524_v6, 6 }
0x244f   :  { %1551 = vrot.lane.b32.xlu1 %v1549_v7, %s2940_s22 }
0x24c1   :  { %v1552_v11 = vpop.permute.xlu1 %1551 }
0x24c2   :  { %2480 = vmatmul.mubr.msk.bf16.vlgmr.msra.gmra.mrb[28].mxu1 %vm444_vm9, %v1552_v11 }
0x24c3   :  { %2492 = vmatpush3.bf16.msra.mxu1 %v3406_v29  ;;  %2495 = vmatprep.mubr.msk.bf16.mxu1 %vm2939_vm0, %v2938_v1 }
0x24c4   :  { %2493 = vmatprep.subr.bf16.mxu1 %v2938_v1 }
0x24c7   :  { %2494 = vmatpush3.bf16.msra.mxu1 %v3412_v30 }
0x24c8   :  { %2507 = vmatprep.subr.bf16.mxu1 %v2938_v1 }
0x2595   :  { %v1590_v12 = vpop.f32.mrb[28].mxu1 }
0x2596   :  { %v1591_v13 = vadd.f32 %v3435_v42, %v1590_v12  ;;  %v2481_v17 = vpop.f32.mrb[29].mxu1 }
0x2597   :  { %v1593_v18 = vpop.f32.mrb[30].mxu1  ;;  %v2574_v17 = vld [vmem:[%s3684_s12 + $0x8] sm:$0xff]  }
0x2598   :  { %v1597_v19 = vrot.slane %v1591_v13, 6  ;;  %v2482_v21 = vpop.f32.mrb[31].mxu1  ;;  %v2573_v13 = vld [vmem:[%s3684_s12] sm:$0xff]  }
0x259a   :  { %1606 = vrot.lane.b32.xlu0 %v1597_v19, %s2928_s9  ;;  %v1599_v29 = vadd.f32 %v1597_v19, %v3290_v24 }
0x259c   :  { %v2252_v23 = vmul.f32 -1.442695, %v1599_v29 }
0x259e   :  { %2659 = vpow2.f32 %v2252_v23 }
0x25a8   :  { %v2660_v14 = vpop.eup %2659 }
0x25a9   :  { %v1603_v25 = vadd.f32 1.0, %v2660_v14 }
0x25ab   :  { %2661 = vrcp.f32 %v1603_v25 }
0x25b5   :  { %v2662_v26 = vpop.eup %2661 }
0x25b6   :  { %v1616_v48 = vsub.f32 1.0, %v2662_v26  ;;  %v1624_v33 = vmul.f32 %v2662_v26, %v1622_v31 }
0x260c   :  { %v1607_v30 = vpop.permute.xlu0 %1606 }
0x260d   :  { %v1609_v27 = vmul.f32 %v2662_v26, %v1607_v30 }
0x260f   :  { %1611 = vrot.lane.b32.xlu1 %v1609_v27, %s2928_s9 }
0x2681   :  { %v1612_v28 = vpop.permute.xlu1 %1611 }
0x2682   :  { %v1614_v16 = vadd.f32 %v1612_v28, %v3290_v24 }
0x2684   :  { %2663 = vtanh.f32 %v1614_v16 }
0x268e   :  { %v2664_v37 = vpop.eup %2663 }
0x268f   :  { %1618 = vrot.lane.b32.xlu0 %v2664_v37, %s2940_s22 }
0x2701   :  { %v1619_v32 = vpop.permute.xlu0 %1618 }
0x2702   :  { %v1621_v35 = vmul.f32 %v1619_v32, %v1616_v48 }
0x2704   :  { %v3543_v38 = vadd.f32 %v1624_v33, %v1621_v35 }
0x2706   :  { %v1631_v41 = vpack.c.bf16 %v3543_v38, %v3543_v38  ;;  %v1705_v63 = vrot.slane %v3543_v38, 6 }
0x2708   :  { %v1633_v43 = vrot.slane %v1631_v41, 1 }
0x270a   :  { %1634 = vrot.lane.b32.xlu1 %v1633_v43, %s2940_s22 }
0x277c   :  { %v1635_v44 = vpop.permute.xlu1 %1634 }
0x277d   :  { %2488 = vmatmul.mubr.msk.bf16.vlgmr.msra.gmra.mrb[32].mxu0 %vm444_vm9, %v1635_v44 }
0x277e   :  { %2503 = vmatprep.mubr.msk.bf16.mxu0 %vm2939_vm0, %v2938_v1  ;;  %2500 = vmatpush3.bf16.msra.mxu0 %v2573_v13  ;;  %v2576_v13 = vld [vmem:[#allocation14 + $0x8] sm:$0xff]  }
0x277f   :  { %2501 = vmatprep.subr.bf16.mxu0 %v2938_v1 }
0x2782   :  { %2502 = vmatpush3.bf16.msra.mxu0 %v2574_v17  ;;  %v1862_v17 = vld [vmem:[%s3683_s11] sm:$0xff] }
0x2783   :  { %2513 = vmatprep.subr.bf16.mxu0 %v2938_v1 }
0x2850   :  { %v1673_v51 = vpop.f32.mrb[32].mxu0 }
0x2851   :  { %v1674_v46 = vadd.f32 %v3435_v42, %v1673_v51  ;;  %v2489_v47 = vpop.f32.mrb[33].mxu0 }
0x2852   :  { %v1676_v50 = vpop.f32.mrb[34].mxu0 }
0x2853   :  { %v1680_v52 = vrot.slane %v1674_v46, 4  ;;  %v2490_v53 = vpop.f32.mrb[35].mxu0 }
0x2855   :  { %1689 = vrot.lane.b32.xlu0 %v1680_v52, %s2928_s9  ;;  %v1682_v54 = vadd.f32 %v1680_v52, %v3290_v24 }
0x2857   :  { %v2254_v55 = vmul.f32 -1.442695, %v1682_v54 }
0x2859   :  { %2665 = vpow2.f32 %v2254_v55 }
0x2863   :  { %v2666_v56 = vpop.eup %2665 }
0x2864   :  { %v1686_v57 = vadd.f32 1.0, %v2666_v56 }
0x2866   :  { %2667 = vrcp.f32 %v1686_v57 }
0x2870   :  { %v2668_v58 = vpop.eup %2667 }
0x2871   :  { %v1699_v62 = vsub.f32 1.0, %v2668_v58  ;;  %v1707_v5 = vmul.f32 %v2668_v58, %v1705_v63 }
0x28c7   :  { %v1690_v59 = vpop.permute.xlu0 %1689 }
0x28c8   :  { %v1692_v60 = vmul.f32 %v2668_v58, %v1690_v59 }
0x28ca   :  { %1694 = vrot.lane.b32.xlu1 %v1692_v60, %s2928_s9 }
0x293c   :  { %v1695_v61 = vpop.permute.xlu1 %1694 }
0x293d   :  { %v1697_v20 = vadd.f32 %v1695_v61, %v3290_v24 }
0x293f   :  { %2669 = vtanh.f32 %v1697_v20 }
0x2949   :  { %v2670_v22 = vpop.eup %2669 }
0x294a   :  { %1701 = vrot.lane.b32.xlu0 %v2670_v22, %s2940_s22 }
0x294e   :  { %515 = vrot.lane.b32.xlu0 %v3262_v10, %s2940_s22 }
0x2952   :  { %682 = vrot.lane.b32.xlu0 %v3318_v15, %s2940_s22 }
0x2956   :  { %848 = vrot.lane.b32.xlu0 %v3356_v8, %s2940_s22 }
0x295a   :  { %1013 = vrot.lane.b32.xlu0 %v3390_v4, %s2940_s22 }
0x29bc   :  { %v1702_v0 = vpop.permute.xlu0 %1701 }
0x29bd   :  { %v1704_v7 = vmul.f32 %v1702_v0, %v1699_v62 }
0x29bf   :  { %v3566_v11 = vadd.f32 %v1707_v5, %v1704_v7 }
0x29c0   :  { %v516_v12 = vpop.permute.xlu0 %515 }
0x29c1   :  { %519 = vst.msk [vmem:[#allocation2] sm:$0x3] %vm518_vm10, %v516_v12  ;;  %v1714_v10 = vpack.c.bf16 %v3566_v11, %v3566_v11 }
0x29c3   :  { %v1716_v15 = vrot.slane %v1714_v10, 2 }
0x29c4   :  { %v683_v8 = vpop.permute.xlu0 %682 }
0x29c5   :  { %686 = vst.msk [vmem:[#allocation2] sm:$0x30] %vm685_vm11, %v683_v8  ;;  %1717 = vrot.lane.b32.xlu1 %v1716_v15, %s2940_s22  ;;  %v2575_v8 = vld [vmem:[#allocation14] sm:$0xff]  }
0x29c8   :  { %v849_v4 = vpop.permute.xlu0 %848 }
0x29c9   :  { %851 = vst.msk [vmem:[#allocation2 + $0x8] sm:$0x3] %vm518_vm10, %v849_v4  ;;  %598 = vrot.lane.b32.xlu1 %v3299_v49, %s2940_s22 }
0x29cc   :  { %v1014_v18 = vpop.permute.xlu0 %1013 }
0x29cd   :  { %1016 = vst.msk [vmem:[#allocation2 + $0x8] sm:$0x30] %vm685_vm11, %v1014_v18  ;;  %766 = vrot.lane.b32.xlu1 %v3337_v45, %s2940_s22 }
0x29d1   :  { %930 = vrot.lane.b32.xlu1 %v3375_v39, %s2940_s22 }
0x29d5   :  { %1096 = vrot.lane.b32.xlu1 %v3423_v36, %s2940_s22 }
0x2a37   :  { %v1718_v49 = vpop.permute.xlu1 %1717 }
0x2a38   :  { %2496 = vmatmul.mubr.msk.bf16.vlgmr.msra.gmra.mrb[32].mxu1 %vm444_vm9, %v1718_v49  ;;  %v1863_v49 = vld [vmem:[%s3683_s11 + $0x8] sm:$0xff] }
0x2a39   :  { %2509 = vmatprep.mubr.msk.bf16.mxu1 %vm2939_vm0, %v2938_v1 }
0x2a3b   :  { %v599_v19 = vpop.permute.xlu1 %598 }
0x2a3c   :  { %602 = vst.msk [vmem:[#allocation2] sm:$0xc] %vm601_vm12, %v599_v19 }
0x2a3f   :  { %v767_v45 = vpop.permute.xlu1 %766 }
0x2a40   :  { %770 = vst.msk [vmem:[#allocation2] sm:$0xc0] %vm769_vm13, %v767_v45 }
0x2a43   :  { %v931_v21 = vpop.permute.xlu1 %930 }
0x2a44   :  { %933 = vst.msk [vmem:[#allocation2 + $0x8] sm:$0xc] %vm601_vm12, %v931_v21 }
0x2a47   :  { %v1097_v39 = vpop.permute.xlu1 %1096  ;;  %v1100_v29 = vld [vmem:[#allocation2] sm:$0xff] }
0x2a48   :  { %1099 = vst.msk [vmem:[#allocation2 + $0x8] sm:$0xc0] %vm769_vm13, %v1097_v39  ;;  %v1108_v36 = vrot.slane %v1100_v29, 6  ;;  %v1110_v23 = vrot.slane %v1100_v29, 2 }
0x2a4a   :  { %v1115_v14 = vsel %vm387_vm4, %v1108_v36, %v1110_v23 }
0x2a4b   :  { %v1116_v27 = vsel %vm389_vm5, %v1115_v14, %v1108_v36 }
0x2a4c   :  { %v1117_v48 = vsel %vm391_vm6, %v1116_v27, %v1110_v23 }
0x2a4f   :  { %v1101_v25 = vld [vmem:[#allocation2 + $0x8] sm:$0xff] }
0x2a50   :  { %v1103_v26 = vrot.slane %v1101_v25, 6  ;;  %v1105_v30 = vrot.slane %v1101_v25, 2  ;;  %v1120_v32 = vsel %vm1118_vm14, %v1101_v25, %v1117_v48 }
0x2a52   :  { %v1112_v28 = vsel %vm387_vm4, %v1103_v26, %v1105_v30 }
0x2a53   :  { %v1113_v16 = vsel %vm389_vm5, %v1112_v28, %v1103_v26 }
0x2a54   :  { %v1114_v37 = vsel %vm391_vm6, %v1113_v16, %v1105_v30 }
0x2a55   :  { %v1119_v31 = vsel %vm1118_vm14, %v1100_v29, %v1114_v37 }
0x2a56   :  { %v1799_v33 = vpack.c.bf16 %v1120_v32, %v1119_v31 }
0x2a58   :  { %2504 = vmatmul.mubr.msk.bf16.vlgmr.msra.gmra.mrb[36].mxu0 %vm444_vm9, %v1799_v33 }
0x2a59   :  { %2514 = vmatpush3.bf16.msra.mxu0 %v1799_v33  ;;  %2515 = vmatprep.mubr.msk.bf16.mxu0 %vm2939_vm0, %v2938_v1 }
0x2a5a   :  { %2527 = vmatprep.subr.bf16.mxu0 %v2938_v1 }
0x2b0b   :  { %v1756_v35 = vpop.f32.mrb[32].mxu1 }
0x2b0c   :  { %v1757_v9 = vadd.f32 %v3435_v42, %v1756_v35  ;;  %v2497_v41 = vpop.f32.mrb[33].mxu1 }
0x2b0d   :  { %v1759_v43 = vpop.f32.mrb[34].mxu1 }
0x2b0e   :  { %v1763_v44 = vrot.slane %v1757_v9, 2  ;;  %v2498_v51 = vpop.f32.mrb[35].mxu1 }
0x2b10   :  { %1772 = vrot.lane.b32.xlu0 %v1763_v44, %s2928_s9  ;;  %v1765_v55 = vadd.f32 %v1763_v44, %v3290_v24 }
0x2b12   :  { %v2256_v56 = vmul.f32 -1.442695, %v1765_v55 }
0x2b14   :  { %2671 = vpow2.f32 %v2256_v56 }
0x2b1e   :  { %v2672_v42 = vpop.eup %2671 }
0x2b1f   :  { %v1769_v57 = vadd.f32 1.0, %v2672_v42 }
0x2b21   :  { %2673 = vrcp.f32 %v1769_v57 }
0x2b2b   :  { %v1854_v46 = vpop.f32.mrb[36].mxu0  ;;  %v2674_v58 = vpop.eup %2673 }
0x2b2c   :  { %v2505_v47 = vpop.f32.mrb[37].mxu0 }
0x2b2d   :  { %v1857_v50 = vpop.f32.mrb[38].mxu0 }
0x2b2e   :  { %v1861_v52 = vpack.c.bf16 %v1857_v50, %v1854_v46  ;;  %v2506_v53 = vpop.f32.mrb[39].mxu0  ;;  %v2577_v50 = vld [vmem:[#allocation12] sm:$0xff]  }
0x2b2f   :  { %v2578_v53 = vld [vmem:[#allocation12 + $0x8] sm:$0xff]  }
0x2b30   :  { %v1868_v54 = vsel %vm444_vm9, %v1861_v52, 0 }
0x2b31   :  { %2508 = vmatpush3.bf16.xpose.msra.mxu1 %v1868_v54 }
0x2b32   :  { %2519 = vmatprep.subr.bf16.mxu1 %v2938_v1 }
0x2b82   :  { %v1773_v59 = vpop.permute.xlu0 %1772 }
0x2b83   :  { %v1775_v60 = vmul.f32 %v2674_v58, %v1773_v59  ;;  %v2580_v59 = vld [vmem:[#allocation17 + $0x8] sm:$0xff]  }
0x2b85   :  { %1777 = vrot.lane.b32.xlu1 %v1775_v60, %s2928_s9 }
0x2b89   :  { %1216 = vrot.lane.b32.xlu1 %v3448_v2, %s2940_s22 }
0x2b8d   :  { %1381 = vrot.lane.b32.xlu1 %v3486_v3, %s2940_s22 }
0x2b91   :  { %1545 = vrot.lane.b32.xlu1 %v3524_v6, %s2940_s22  ;;  %v1788_v6 = vrot.slane %v3566_v11, 6 }
0x2b93   :  { %v1790_v5 = vmul.f32 %v2674_v58, %v1788_v6 }
0x2b95   :  { %1710 = vrot.lane.b32.xlu1 %v3566_v11, %s2940_s22 }
0x2bf7   :  { %v1778_v61 = vpop.permute.xlu1 %1777 }
0x2bf8   :  { %v1780_v20 = vadd.f32 %v1778_v61, %v3290_v24  ;;  %v1782_v24 = vsub.f32 1.0, %v2674_v58  ;;  %v2579_v58 = vld [vmem:[#allocation17] sm:$0xff]  }
0x2bfa   :  { %2675 = vtanh.f32 %v1780_v20 }
0x2bfb   :  { %v1217_v22 = vpop.permute.xlu1 %1216 }
0x2bfc   :  { %1219 = vst.msk [vmem:[#allocation3] sm:$0x3] %vm518_vm10, %v1217_v22  ;;  %v2268_v22 = vld [vmem:[#allocation15] ss:$0 sm:$0xff] }
0x2bff   :  { %v1382_v62 = vpop.permute.xlu1 %1381 }
0x2c00   :  { %1384 = vst.msk [vmem:[#allocation3] sm:$0x30] %vm685_vm11, %v1382_v62 }
0x2c03   :  { %v1546_v2 = vpop.permute.xlu1 %1545 }
0x2c04   :  { %v2676_v63 = vpop.eup %2675  ;;  %1548 = vst.msk [vmem:[#allocation3 + $0x8] sm:$0x3] %vm518_vm10, %v1546_v2 }
0x2c05   :  { %1784 = vrot.lane.b32.xlu0 %v2676_v63, %s2940_s22 }
0x2c07   :  { %v1711_v3 = vpop.permute.xlu1 %1710 }
0x2c08   :  { %1713 = vst.msk [vmem:[#allocation3 + $0x8] sm:$0x30] %vm685_vm11, %v1711_v3 }
0x2c09   :  { %1298 = vrot.lane.b32.xlu0 %v3467_v34, %s2940_s22 }
0x2c0d   :  { %1464 = vrot.lane.b32.xlu0 %v3505_v40, %s2940_s22 }
0x2c11   :  { %1627 = vrot.lane.b32.xlu0 %v3543_v38, %s2940_s22 }
0x2c77   :  { %v1785_v0 = vpop.permute.xlu0 %1784 }
0x2c78   :  { %v1787_v7 = vmul.f32 %v1785_v0, %v1782_v24  ;;  %v2269_v0 = vld [vmem:[#allocation18] ss:$0 sm:$0xff] }
0x2c7a   :  { %v1791_v12 = vadd.f32 %v1790_v5, %v1787_v7 }
0x2c7b   :  { %v1299_v10 = vpop.permute.xlu0 %1298 }
0x2c7c   :  { %1301 = vst.msk [vmem:[#allocation3] sm:$0xc] %vm601_vm12, %v1299_v10  ;;  %1793 = vrot.lane.b32.xlu0 %v1791_v12, %s2940_s22 }
0x2c7f   :  { %v1465_v15 = vpop.permute.xlu0 %1464 }
0x2c80   :  { %1467 = vst.msk [vmem:[#allocation3] sm:$0xc0] %vm769_vm13, %v1465_v15 }
0x2c83   :  { %v1628_v34 = vpop.permute.xlu0 %1627 }
0x2c84   :  { %1630 = vst.msk [vmem:[#allocation3 + $0x8] sm:$0xc] %vm601_vm12, %v1628_v34 }
0x2c87   :  { %v1797_v38 = vld [vmem:[#allocation3] sm:$0xff] }
0x2cee   :  { %v1794_v40 = vpop.permute.xlu0 %1793 }
0x2cef   :  { %1796 = vst.msk [vmem:[#allocation3 + $0x8] sm:$0xc0] %vm769_vm13, %v1794_v40 }
0x2cf6   :  { %v1798_v11 = vld [vmem:[#allocation3 + $0x8] sm:$0xff] }
0x2cf7   :  { %v1800_v4 = vpack.c.bf16 %v1798_v11, %v1797_v38 }
0x2cf9   :  { %2510 = vmatmul.mubr.msk.bf16.vlgmr.msra.gmra.mrb[36].mxu1 %vm444_vm9, %v1800_v4 }
0x2cfa   :  { %2520 = vmatpush3.bf16.msra.mxu1 %v2575_v8  ;;  %2523 = vmatprep.mubr.msk.bf16.mxu1 %vm2939_vm0, %v2938_v1 }
0x2cfb   :  { %2521 = vmatprep.subr.bf16.mxu1 %v2938_v1 }
0x2cfe   :  { %2522 = vmatpush3.bf16.msra.mxu1 %v2576_v13 }
0x2cff   :  { %2535 = vmatprep.subr.bf16.mxu1 %v2938_v1 }
0x2d01   :  { %2524 = vmatmul.mubr.msk.bf16.vlgmr.msra.gmra.mrb[40].mxu1 %vm444_vm9, %v1800_v4 }
0x2d02   :  { %2539 = vmatprep.mubr.msk.bf16.mxu1 %vm2939_vm0, %v2938_v1  ;;  %2536 = vmatpush3.bf16.msra.mxu1 %v2579_v58 }
0x2d03   :  { %2537 = vmatprep.subr.bf16.mxu1 %v2938_v1 }
0x2d06   :  { %2538 = vmatpush3.bf16.msra.mxu1 %v2580_v59 }
0x2dcc   :  { %v1904_v18 = vpop.f32.mrb[36].mxu1 }
0x2dcd   :  { %v1905_v19 = vadd.f32 %v1904_v18, %v1862_v17  ;;  %v2511_v45 = vpop.f32.mrb[37].mxu1 }
0x2dce   :  { %v1907_v21 = vpop.f32.mrb[38].mxu1 }
0x2dcf   :  { %v1908_v39 = vadd.f32 %v1907_v21, %v1863_v49  ;;  %v2512_v29 = vpop.f32.mrb[39].mxu1  ;;  %v1912_v36 = vsel %vm1911_vm15, %v1905_v19, -inf }
0x2dd0   :  { %1913 = vmax.xlane.f32.xlu1 %v1912_v36 }
0x2dd1   :  { %v1915_v23 = vsel %vm1911_vm15, %v1908_v39, -inf }
0x2dd2   :  { %1916 = vmax.xlane.f32.xlu0 %v1915_v23 }
0x2dd4   :  { %v2034_v14 = vpop.f32.mrb[40].mxu1 }
0x2dd5   :  { %v2525_v25 = vpop.f32.mrb[41].mxu1 }
0x2dd6   :  { %v2037_v26 = vpop.f32.mrb[42].mxu1 }
0x2dd7   :  { %v2526_v30 = vpop.f32.mrb[43].mxu1 }
0x2e5d   :  { %v1914_v27 = vpop.xlane.xlu1 %1913 }
0x2e5e   :  { %v1918_v28 = vsub.f32 %v1905_v19, %v1914_v27 }
0x2e5f   :  { %v1917_v16 = vpop.xlane.xlu0 %1916 }
0x2e60   :  { %v1920_v37 = vmul.f32 1.442695, %v1918_v28  ;;  %v1919_v48 = vsub.f32 %v1908_v39, %v1917_v16 }
0x2e62   :  { %2677 = vpow2.f32 %v1920_v37  ;;  %v1922_v31 = vmul.f32 1.442695, %v1919_v48 }
0x2e64   :  { %2679 = vpow2.f32 %v1922_v31 }
0x2e6c   :  { %v2678_v32 = vpop.eup %2677 }
0x2e6d   :  { %v1924_v33 = vsel %vm1911_vm15, %v2678_v32, 0.0 }
0x2e6e   :  { %v2680_v35 = vpop.eup %2679  ;;  %1925 = vadd.xlane.f32.xlu0 %v1924_v33 }
0x2e6f   :  { %v1927_v9 = vsel %vm1911_vm15, %v2680_v35, 0.0 }
0x2e70   :  { %1928 = vadd.xlane.f32.xlu1 %v1927_v9 }
0x2efb   :  { %v1926_v41 = vpop.xlane.xlu0 %1925 }
0x2efc   :  { %2681 = vrcp.f32 %v1926_v41 }
0x2efd   :  { %v1929_v43 = vpop.xlane.xlu1 %1928 }
0x2efe   :  { %2683 = vrcp.f32 %v1929_v43 }
0x2f06   :  { %v2682_v44 = vpop.eup %2681 }
0x2f07   :  { %v1931_v46 = vmul.f32 %v2682_v44, %v2678_v32 }
0x2f08   :  { %v2684_v51 = vpop.eup %2683 }
0x2f09   :  { %v1933_v47 = vmul.f32 %v2684_v51, %v2680_v35 }
0x2f0b   :  { %v1934_v52 = vpack.c.bf16 %v1933_v47, %v1931_v46 }
0x2f0d   :  { %2516 = vmatmul.mubr.msk.bf16.vlgmr.msra.gmra.mrb[40].mxu0 %vm1911_vm15, %v1934_v52 }
0x2f0e   :  { %2528 = vmatpush3.bf16.msra.mxu0 %v2577_v50  ;;  %2531 = vmatprep.mubr.msk.bf16.mxu0 %vm2939_vm0, %v2938_v1 }
0x2f0f   :  { %2529 = vmatprep.subr.bf16.mxu0 %v2938_v1 }
0x2f12   :  { %2530 = vmatpush3.bf16.msra.mxu0 %v2578_v53 }
0x2fe0   :  { %v1972_v54 = vpop.f32.mrb[40].mxu0 }
0x2fe1   :  { %v2517_v55 = vpop.f32.mrb[41].mxu0 }
0x2fe2   :  { %v1975_v56 = vpop.f32.mrb[42].mxu0 }
0x2fe3   :  { %v1979_v42 = vpack.c.bf16 %v1975_v56, %v1972_v54  ;;  %v2518_v57 = vpop.f32.mrb[43].mxu0 }
0x2fe5   :  { %2532 = vmatmul.mubr.msk.bf16.vlgmr.msra.gmra.mrb[44].mxu0 %vm444_vm9, %v1979_v42 }
0x30b8   :  { %v2090_v60 = vpop.f32.mrb[44].mxu0 }
0x30b9   :  { %v2091_v61 = vadd.f32 %v2090_v60, %v2034_v14  ;;  %v2533_v20 = vpop.f32.mrb[45].mxu0 }
0x30ba   :  { %v2093_v62 = vpop.f32.mrb[46].mxu0 }
0x30bb   :  { %v2094_v2 = vadd.f32 %v2093_v62, %v2037_v26  ;;  %v2534_v63 = vpop.f32.mrb[47].mxu0  ;;  %v2104_v3 = vadd.f32 %v2268_v22, %v2091_v61 }
0x30bd   :  { %v2105_v24 = vadd.f32 %v2268_v22, %v2094_v2 }
0x30bf   :  { %v2106_v6 = vpack.c.bf16 %v2105_v24, %v2104_v3 }
0x30c1   :  { %2540 = vmatmul.mubr.msk.bf16.vlgmr.msra.gmra.mrb[44].mxu1 %vm444_vm9, %v2106_v6 }
0x3194   :  { %v2167_v5 = vpop.f32.mrb[44].mxu1 }
0x3195   :  { %v2168_v7 = vadd.f32 %v2269_v0, %v2167_v5  ;;  %v2541_v12 = vpop.f32.mrb[45].mxu1 }
0x3196   :  { %v2170_v10 = vpop.f32.mrb[46].mxu1 }
0x3197   :  { %v2171_v1 = vadd.f32 %v2269_v0, %v2170_v10  ;;  %2174 = vmax.xlane.f32.xlu0 %v2168_v7  ;;  %v2542_v15 = vpop.f32.mrb[47].mxu1 }
0x3199   :  { %2176 = vmax.xlane.f32.xlu1 %v2171_v1 }
0x3224   :  { %v2175_v34 = vpop.xlane.xlu0 %2174 }
0x3225   :  { %v2178_v40 = vsub.f32 %v2168_v7, %v2175_v34 }
0x3226   :  { %v2177_v38 = vpop.xlane.xlu1 %2176 }
0x3227   :  { %v2180_v11 = vmul.f32 1.442695, %v2178_v40  ;;  %v2179_v8 = vsub.f32 %v2171_v1, %v2177_v38 }
0x3229   :  { %2685 = vpow2.f32 %v2180_v11  ;;  %v2182_v4 = vmul.f32 1.442695, %v2179_v8 }
0x322b   :  { %2687 = vpow2.f32 %v2182_v4 }
0x3233   :  { %v2686_v13 = vpop.eup %2685 }
0x3234   :  { %2184 = vadd.xlane.f32.xlu0 %v2686_v13 }
0x3235   :  { %v2688_v17 = vpop.eup %2687 }
0x3236   :  { %2186 = vadd.xlane.f32.xlu1 %v2688_v17 }
0x32c1   :  { %v2185_v18 = vpop.xlane.xlu0 %2184 }
0x32c2   :  { %2689 = vlog2.f32 %v2185_v18 }
0x32c3   :  { %v2187_v49 = vpop.xlane.xlu1 %2186 }
0x32c4   :  { %2691 = vlog2.f32 %v2187_v49 }
0x32cc   :  { %v2690_v19 = vpop.eup %2689 }
0x32cd   :  { %v2189_v45 = vmul.f32 0.6931472, %v2690_v19 }
0x32ce   :  { %v2692_v21 = vpop.eup %2691 }
0x32cf   :  { %v2192_v39 = vsub.f32 %v2178_v40, %v2189_v45  ;;  %v2191_v29 = vmul.f32 0.6931472, %v2692_v21 }
0x32d1   :  { %v2194_v36 = vsub.f32 0.0, %v2192_v39  ;;  %v2193_v23 = vsub.f32 %v2179_v8, %v2191_v29 }
0x32d3   :  { %2196 = vst [vmem:[%s3690_s18] sm:$0xff] %v2194_v36  ;;  %v2195_v14 = vsub.f32 0.0, %v2193_v23 }
0x32d5   :  { %2197 = vst [vmem:[%s3690_s18 + $0x8] sm:$0xff] %v2195_v14 }
0x32d6   :  { %2202 = vsyncpa [#allocation5], 1 }
0x32d7   :  { %2203 = vsyncpa [#allocation7], 1 }
0x32d8   :  { %2204 = vsyncpa [#allocation10], 1 }
0x32d9   :  { %2205 = vsyncpa [#allocation13], 1 }
0x32da   :  { %2206 = vsyncpa [#allocation16], 1 }
0x32db   :  { %2207 = vsyncpa [#allocation19], 1 }

</bundles_post_ra>
